<compile_context>
chip_gen: v7x
topology: tpu7x:2x2x1
jax: 0.10.0
libtpu: 0.0.40
codegen_flags: <defaults>
</compile_context>

<pallas_src>
import functools

import jax
import jax.numpy as jnp
from jax.experimental import pallas as pl
from jax.experimental.pallas import tpu as pltpu


def _resblock_kernel(x_ref, w1_ref, s1_ref, b1_ref, w2_ref, s2_ref, b2_ref,
                     out_ref, xpad_ref, mid_ref, col_ref):
    # x_ref   : (1, H, W, C)       un-padded input (one image)
    # w1_ref  : (9*C, C) bf16      conv1 weights, rows ordered (kx, ky, cin)
    # s1_ref  : (1, C) f32         bn1 folded scale
    # b1_ref  : (1, C) f32         bn1 folded shift
    # w2_ref  : (9*C, C) bf16      conv2 weights
    # s2_ref  : (1, C) f32         bn2 folded scale
    # b2_ref  : (1, C) f32         bn2 folded shift
    # out_ref : (1, H, W, C)
    # xpad_ref: (H+2, W+2, C) f32  VMEM scratch, zero-halo padded input
    # mid_ref : (H+2, W+2, C) f32  VMEM scratch, padded relu(bn1(conv1))
    # col_ref : (H, W, 9*C)   f32  VMEM scratch, im2col slab (reused by conv2)
    _, H, W, C = out_ref.shape
    K9 = 9 * C

    # Stage the padded input in VMEM (halo handled here, not via wrapper pad).
    xpad_ref[...] = jnp.zeros_like(xpad_ref)
    xpad_ref[1:H + 1, 1:W + 1, :] = x_ref[0]

    def build_cols(src_ref):
        """im2col: pack the 9 conv taps along the lane axis of col_ref.

        The dx shift (sublane axis) is materialized once per dx; the dy shift
        rides the leading (untiled) axis and is free.  Returns the centre tap
        (dy=1, dx=1), i.e. the unpadded image, for reuse.
        """
        src = src_ref[...]                               # (H+2, W+2, C)
        center = None
        for dx in range(3):
            slab = src[:, dx:dx + W, :]                  # (H+2, W, C)
            for dy in range(3):
                tap = slab[dy:dy + H, :, :]              # (H, W, C)
                t = dx * 3 + dy
                col_ref[:, :, t * C:(t + 1) * C] = tap
                if dx == 1 and dy == 1:
                    center = tap
        return center

    # ---- conv1: single (H*W, 9C) x (9C, C) matmul, bf16 operands, f32 acc ----
    identity = build_cols(xpad_ref)                      # (H, W, C) f32
    slab1 = col_ref[...].reshape(H * W, K9).astype(jnp.bfloat16)
    acc1 = jnp.dot(slab1, w1_ref[...], preferred_element_type=jnp.float32)

    # ---- bn1 + relu, staged as a padded VMEM activation for conv2 ----
    out1 = jnp.maximum(acc1 * s1_ref[0] + b1_ref[0], 0.0)
    mid_ref[...] = jnp.zeros_like(mid_ref)
    mid_ref[1:H + 1, 1:W + 1, :] = out1.reshape(H, W, C)

    # ---- conv2 ----
    build_cols(mid_ref)
    slab2 = col_ref[...].reshape(H * W, K9).astype(jnp.bfloat16)
    acc2 = jnp.dot(slab2, w2_ref[...], preferred_element_type=jnp.float32)

    # ---- bn2 + residual add + relu ----
    out2 = acc2.reshape(H, W, C) * s2_ref[0] + b2_ref[0]
    out = jnp.maximum(out2 + identity, 0.0)
    out_ref[...] = out.reshape(1, H, W, C).astype(out_ref.dtype)


@functools.partial(jax.jit, static_argnames=("eps",))
def basic_res_block(x_nchw, w1_oihw, g1, bt1, m1, v1, w2_oihw, g2, bt2, m2, v2,
                    eps=1e-5):
    """Fused BasicResBlock forward (stride=1, downsample=None, eval-mode BN).

    x_nchw: (N, C, H, W) float32. Returns (N, C, H, W) float32.
    """
    # TODO(synk): training-mode BatchNorm batch statistics are not reproduced
    # (running stats are folded into scale/shift, matching module.eval()).
    # TODO(synk): stride != 1 / downsample (conv1x1+BN) branch is not handled;
    # this BasicResBlock config uses stride=1, downsample=None.
    N, C, H, W = x_nchw.shape
    x = jnp.transpose(x_nchw, (0, 2, 3, 1))  # NCHW -> NHWC (channels on lanes)

    def fold_bn(g, bt, m, v):
        s = (g * jax.lax.rsqrt(v + eps)).astype(jnp.float32)
        b = (bt - m * s).astype(jnp.float32)
        return s.reshape(1, C), b.reshape(1, C)

    s1, b1 = fold_bn(g1, bt1, m1, v1)
    s2, b2 = fold_bn(g2, bt2, m2, v2)

    def weight_matrix(w_oihw):
        # OIHW -> (kx, ky, cin, cout) -> (9*cin, cout); row order matches the
        # in-kernel im2col tap order (dx outer, dy inner, cin fastest).
        cout, cin = w_oihw.shape[0], w_oihw.shape[1]
        return (jnp.transpose(w_oihw, (3, 2, 1, 0))
                .reshape(9 * cin, cout).astype(jnp.bfloat16))

    w1m = weight_matrix(w1_oihw)
    w2m = weight_matrix(w2_oihw)

    out_nhwc = pl.pallas_call(
        _resblock_kernel,
        out_shape=jax.ShapeDtypeStruct((N, H, W, C), x.dtype),
        grid_spec=pltpu.PrefetchScalarGridSpec(
            num_scalar_prefetch=0,
            grid=(N,),
            in_specs=[
                pl.BlockSpec((1, H, W, C), lambda b: (b, 0, 0, 0)),
                pl.BlockSpec((9 * C, C), lambda b: (0, 0)),
                pl.BlockSpec((1, C), lambda b: (0, 0)),
                pl.BlockSpec((1, C), lambda b: (0, 0)),
                pl.BlockSpec((9 * C, C), lambda b: (0, 0)),
                pl.BlockSpec((1, C), lambda b: (0, 0)),
                pl.BlockSpec((1, C), lambda b: (0, 0)),
            ],
            out_specs=pl.BlockSpec((1, H, W, C), lambda b: (b, 0, 0, 0)),
            scratch_shapes=[
                pltpu.VMEM((H + 2, W + 2, C), jnp.float32),  # padded input
                pltpu.VMEM((H + 2, W + 2, C), jnp.float32),  # padded mid act
                pltpu.VMEM((H, W, 9 * C), jnp.float32),      # im2col slab
            ],
        ),
        # One image per grid step; "parallel" lets v7x shard images across its
        # two TensorCores.
        # TODO(synk): add H-band tiling (and vmem_limit_bytes) for large
        # ResNet shapes so the resident set stays under v7x's 64 MiB VMEM.
        compiler_params=pltpu.CompilerParams(
            dimension_semantics=("parallel",)),
    )(x, w1m, s1, b1, w2m, s2, b2)

    # NHWC -> NCHW
    return jnp.transpose(out_nhwc, (0, 3, 1, 2))


def _reference_nchw(x, w1_oihw, g1, bt1, m1, v1, w2_oihw, g2, bt2, m2, v2,
                    eps=1e-5):
    """Pure-JAX f32 reference matching the PyTorch forward (eval-mode BN)."""
    dn = ("NCHW", "OIHW", "NCHW")

    def bn(y, g, bt, m, v):
        return ((y - m[None, :, None, None])
                / jnp.sqrt(v[None, :, None, None] + eps)
                * g[None, :, None, None] + bt[None, :, None, None])

    out = jax.lax.conv_general_dilated(x, w1_oihw, (1, 1), ((1, 1), (1, 1)),
                                       dimension_numbers=dn)
    out = jnp.maximum(bn(out, g1, bt1, m1, v1), 0.0)
    out = jax.lax.conv_general_dilated(out, w2_oihw, (1, 1), ((1, 1), (1, 1)),
                                       dimension_numbers=dn)
    out = bn(out, g2, bt2, m2, v2) + x
    return jnp.maximum(out, 0.0)


if __name__ == "__main__":
    # Small config consistent with BasicResBlock(inplanes=4, planes=4),
    # stride=1, downsample=None.
    N, C, H, W = 2, 4, 16, 16
    eps = 1e-5

    key = jax.random.PRNGKey(0)
    kx, kw1, kw2, kbn = jax.random.split(key, 4)

    x = jax.random.normal(kx, (N, C, H, W), jnp.float32)

    # conv weights in PyTorch OIHW layout, deterministic init
    w1_oihw = 0.1 * jax.random.normal(kw1, (C, C, 3, 3), jnp.float32)
    w2_oihw = 0.1 * jax.random.normal(kw2, (C, C, 3, 3), jnp.float32)

    # Non-trivial BatchNorm running stats / affine params (eval mode).
    kb = jax.random.split(kbn, 8)
    g1 = 1.0 + 0.1 * jax.random.normal(kb[0], (C,), jnp.float32)
    bt1 = 0.1 * jax.random.normal(kb[1], (C,), jnp.float32)
    m1 = 0.1 * jax.random.normal(kb[2], (C,), jnp.float32)
    v1 = 1.0 + 0.1 * jax.random.uniform(kb[3], (C,), jnp.float32)
    g2 = 1.0 + 0.1 * jax.random.normal(kb[4], (C,), jnp.float32)
    bt2 = 0.1 * jax.random.normal(kb[5], (C,), jnp.float32)
    m2 = 0.1 * jax.random.normal(kb[6], (C,), jnp.float32)
    v2 = 1.0 + 0.1 * jax.random.uniform(kb[7], (C,), jnp.float32)

    out = basic_res_block(x, w1_oihw, g1, bt1, m1, v1,
                          w2_oihw, g2, bt2, m2, v2, eps=eps)
    out = jax.block_until_ready(out)

    ref = _reference_nchw(x, w1_oihw, g1, bt1, m1, v1,
                          w2_oihw, g2, bt2, m2, v2, eps)
    ref = jax.block_until_ready(ref)

    assert out.shape == (N, C, H, W)
    err = float(jnp.max(jnp.abs(out - ref)))
    # bf16 MXU operands with f32 accumulation -> loosened tolerance vs f32.
    if err > 5e-2:
        raise AssertionError(f"mismatch vs reference, max abs err = {err}")

    print("KERNEL_OK")
</pallas_src>

<mosaic_0001>
module attributes {stable_mosaic.version = 11 : i64} {
  func.func @_resblock_kernel(%arg0: i32, %arg1: memref<1x16x16x4xf32, #tpu.memory_space<vmem>>, %arg2: memref<36x4xbf16, #tpu.memory_space<vmem>>, %arg3: memref<1x4xf32, #tpu.memory_space<vmem>>, %arg4: memref<1x4xf32, #tpu.memory_space<vmem>>, %arg5: memref<36x4xbf16, #tpu.memory_space<vmem>>, %arg6: memref<1x4xf32, #tpu.memory_space<vmem>>, %arg7: memref<1x4xf32, #tpu.memory_space<vmem>>, %arg8: memref<1x16x16x4xf32, #tpu.memory_space<vmem>>, %arg9: memref<18x18x4xf32, #tpu.memory_space<vmem>>, %arg10: memref<18x18x4xf32, #tpu.memory_space<vmem>>, %arg11: memref<16x16x36xf32, #tpu.memory_space<vmem>>) attributes {dimension_semantics = [#tpu.dimension_semantics<parallel>], iteration_bounds = array<i64: 2>, scalar_prefetch = 0 : i64, scratch_operands = 3 : i64, tpu.core_type = #tpu.core_type<tc>, window_params = [{transform_indices = @transform_0, window_bounds = array<i64: 1, 16, 16, 4>}, {pipeline_mode = #tpu.pipeline_mode<synchronous>, transform_indices = @transform_1, window_bounds = array<i64: 36, 4>}, {pipeline_mode = #tpu.pipeline_mode<synchronous>, transform_indices = @transform_2, window_bounds = array<i64: 1, 4>}, {pipeline_mode = #tpu.pipeline_mode<synchronous>, transform_indices = @transform_3, window_bounds = array<i64: 1, 4>}, {pipeline_mode = #tpu.pipeline_mode<synchronous>, transform_indices = @transform_4, window_bounds = array<i64: 36, 4>}, {pipeline_mode = #tpu.pipeline_mode<synchronous>, transform_indices = @transform_5, window_bounds = array<i64: 1, 4>}, {pipeline_mode = #tpu.pipeline_mode<synchronous>, transform_indices = @transform_6, window_bounds = array<i64: 1, 4>}, {transform_indices = @transform_7, window_bounds = array<i64: 1, 16, 16, 4>}]} {
    %cst = arith.constant 0.000000e+00 : f32
    %0 = vector.broadcast %cst : f32 to vector<18x18x4xf32>
    %c0 = arith.constant 0 : index
    %c0_0 = arith.constant 0 : index
    %c0_1 = arith.constant 0 : index
    %1 = vector.load %arg9[%c0, %c0_0, %c0_1] : memref<18x18x4xf32, #tpu.memory_space<vmem>>, vector<18x18x4xf32>
    tpu.vector_store %arg9[%c0, %c0_0, %c0_1], %0 {strides = array<i32>} : memref<18x18x4xf32, #tpu.memory_space<vmem>>, vector<18x18x4xf32>,
    %c0_2 = arith.constant 0 : index
    %c0_3 = arith.constant 0 : index
    %c0_4 = arith.constant 0 : index
    %c0_5 = arith.constant 0 : index
    %2 = vector.load %arg1[%c0_2, %c0_3, %c0_4, %c0_5] : memref<1x16x16x4xf32, #tpu.memory_space<vmem>>, vector<1x16x16x4xf32>
    %3 = vector.shape_cast %2 : vector<1x16x16x4xf32> to vector<16x16x4xf32>
    %c1 = arith.constant 1 : index
    %c1_6 = arith.constant 1 : index
    %c0_7 = arith.constant 0 : index
    %4 = vector.load %arg9[%c1, %c1_6, %c0_7] : memref<18x18x4xf32, #tpu.memory_space<vmem>>, vector<16x16x4xf32>
    tpu.vector_store %arg9[%c1, %c1_6, %c0_7], %3 {strides = array<i32>} : memref<18x18x4xf32, #tpu.memory_space<vmem>>, vector<16x16x4xf32>,
    %c0_8 = arith.constant 0 : index
    %c0_9 = arith.constant 0 : index
    %c0_10 = arith.constant 0 : index
    %5 = vector.load %arg9[%c0_8, %c0_9, %c0_10] : memref<18x18x4xf32, #tpu.memory_space<vmem>>, vector<18x18x4xf32>
    %6 = vector.extract_strided_slice %5 {offsets = [0, 0, 0], sizes = [18, 16, 4], strides = [1, 1, 1]} : vector<18x18x4xf32> to vector<18x16x4xf32>
    %7 = vector.extract_strided_slice %6 {offsets = [0, 0, 0], sizes = [16, 16, 4], strides = [1, 1, 1]} : vector<18x16x4xf32> to vector<16x16x4xf32>
    %c0_11 = arith.constant 0 : index
    %c0_12 = arith.constant 0 : index
    %c0_13 = arith.constant 0 : index
    %8 = vector.load %arg11[%c0_11, %c0_12, %c0_13] : memref<16x16x36xf32, #tpu.memory_space<vmem>>, vector<16x16x4xf32>
    tpu.vector_store %arg11[%c0_11, %c0_12, %c0_13], %7 {strides = array<i32>} : memref<16x16x36xf32, #tpu.memory_space<vmem>>, vector<16x16x4xf32>,
    %9 = vector.extract_strided_slice %6 {offsets = [1, 0, 0], sizes = [16, 16, 4], strides = [1, 1, 1]} : vector<18x16x4xf32> to vector<16x16x4xf32>
    %c0_14 = arith.constant 0 : index
    %c0_15 = arith.constant 0 : index
    %c4 = arith.constant 4 : index
    %10 = vector.load %arg11[%c0_14, %c0_15, %c4] : memref<16x16x36xf32, #tpu.memory_space<vmem>>, vector<16x16x4xf32>
    tpu.vector_store %arg11[%c0_14, %c0_15, %c4], %9 {strides = array<i32>} : memref<16x16x36xf32, #tpu.memory_space<vmem>>, vector<16x16x4xf32>,
    %11 = vector.extract_strided_slice %6 {offsets = [2, 0, 0], sizes = [16, 16, 4], strides = [1, 1, 1]} : vector<18x16x4xf32> to vector<16x16x4xf32>
    %c0_16 = arith.constant 0 : index
    %c0_17 = arith.constant 0 : index
    %c8 = arith.constant 8 : index
    %12 = vector.load %arg11[%c0_16, %c0_17, %c8] : memref<16x16x36xf32, #tpu.memory_space<vmem>>, vector<16x16x4xf32>
    tpu.vector_store %arg11[%c0_16, %c0_17, %c8], %11 {strides = array<i32>} : memref<16x16x36xf32, #tpu.memory_space<vmem>>, vector<16x16x4xf32>,
    %13 = vector.extract_strided_slice %5 {offsets = [0, 1, 0], sizes = [18, 16, 4], strides = [1, 1, 1]} : vector<18x18x4xf32> to vector<18x16x4xf32>
    %14 = vector.extract_strided_slice %13 {offsets = [0, 0, 0], sizes = [16, 16, 4], strides = [1, 1, 1]} : vector<18x16x4xf32> to vector<16x16x4xf32>
    %c0_18 = arith.constant 0 : index
    %c0_19 = arith.constant 0 : index
    %c12 = arith.constant 12 : index
    %15 = vector.load %arg11[%c0_18, %c0_19, %c12] : memref<16x16x36xf32, #tpu.memory_space<vmem>>, vector<16x16x4xf32>
    tpu.vector_store %arg11[%c0_18, %c0_19, %c12], %14 {strides = array<i32>} : memref<16x16x36xf32, #tpu.memory_space<vmem>>, vector<16x16x4xf32>,
    %16 = vector.extract_strided_slice %13 {offsets = [1, 0, 0], sizes = [16, 16, 4], strides = [1, 1, 1]} : vector<18x16x4xf32> to vector<16x16x4xf32>
    %c0_20 = arith.constant 0 : index
    %c0_21 = arith.constant 0 : index
    %c16 = arith.constant 16 : index
    %17 = vector.load %arg11[%c0_20, %c0_21, %c16] : memref<16x16x36xf32, #tpu.memory_space<vmem>>, vector<16x16x4xf32>
    tpu.vector_store %arg11[%c0_20, %c0_21, %c16], %16 {strides = array<i32>} : memref<16x16x36xf32, #tpu.memory_space<vmem>>, vector<16x16x4xf32>,
    %18 = vector.extract_strided_slice %13 {offsets = [2, 0, 0], sizes = [16, 16, 4], strides = [1, 1, 1]} : vector<18x16x4xf32> to vector<16x16x4xf32>
    %c0_22 = arith.constant 0 : index
    %c0_23 = arith.constant 0 : index
    %c20 = arith.constant 20 : index
    %19 = vector.load %arg11[%c0_22, %c0_23, %c20] : memref<16x16x36xf32, #tpu.memory_space<vmem>>, vector<16x16x4xf32>
    tpu.vector_store %arg11[%c0_22, %c0_23, %c20], %18 {strides = array<i32>} : memref<16x16x36xf32, #tpu.memory_space<vmem>>, vector<16x16x4xf32>,
    %20 = vector.extract_strided_slice %5 {offsets = [0, 2, 0], sizes = [18, 16, 4], strides = [1, 1, 1]} : vector<18x18x4xf32> to vector<18x16x4xf32>
    %21 = vector.extract_strided_slice %20 {offsets = [0, 0, 0], sizes = [16, 16, 4], strides = [1, 1, 1]} : vector<18x16x4xf32> to vector<16x16x4xf32>
    %c0_24 = arith.constant 0 : index
    %c0_25 = arith.constant 0 : index
    %c24 = arith.constant 24 : index
    %22 = vector.load %arg11[%c0_24, %c0_25, %c24] : memref<16x16x36xf32, #tpu.memory_space<vmem>>, vector<16x16x4xf32>
    tpu.vector_store %arg11[%c0_24, %c0_25, %c24], %21 {strides = array<i32>} : memref<16x16x36xf32, #tpu.memory_space<vmem>>, vector<16x16x4xf32>,
    %23 = vector.extract_strided_slice %20 {offsets = [1, 0, 0], sizes = [16, 16, 4], strides = [1, 1, 1]} : vector<18x16x4xf32> to vector<16x16x4xf32>
    %c0_26 = arith.constant 0 : index
    %c0_27 = arith.constant 0 : index
    %c28 = arith.constant 28 : index
    %24 = vector.load %arg11[%c0_26, %c0_27, %c28] : memref<16x16x36xf32, #tpu.memory_space<vmem>>, vector<16x16x4xf32>
    tpu.vector_store %arg11[%c0_26, %c0_27, %c28], %23 {strides = array<i32>} : memref<16x16x36xf32, #tpu.memory_space<vmem>>, vector<16x16x4xf32>,
    %25 = vector.extract_strided_slice %20 {offsets = [2, 0, 0], sizes = [16, 16, 4], strides = [1, 1, 1]} : vector<18x16x4xf32> to vector<16x16x4xf32>
    %c0_28 = arith.constant 0 : index
    %c0_29 = arith.constant 0 : index
    %c32 = arith.constant 32 : index
    %26 = vector.load %arg11[%c0_28, %c0_29, %c32] : memref<16x16x36xf32, #tpu.memory_space<vmem>>, vector<16x16x4xf32>
    tpu.vector_store %arg11[%c0_28, %c0_29, %c32], %25 {strides = array<i32>} : memref<16x16x36xf32, #tpu.memory_space<vmem>>, vector<16x16x4xf32>,
    %c0_30 = arith.constant 0 : index
    %c0_31 = arith.constant 0 : index
    %c0_32 = arith.constant 0 : index
    %27 = vector.load %arg11[%c0_30, %c0_31, %c0_32] : memref<16x16x36xf32, #tpu.memory_space<vmem>>, vector<16x16x36xf32>
    %28 = vector.shape_cast %27 : vector<16x16x36xf32> to vector<256x36xf32>
    %29 = arith.truncf %28 : vector<256x36xf32> to vector<256x36xbf16>
    %c0_33 = arith.constant 0 : index
    %c0_34 = arith.constant 0 : index
    %30 = vector.load %arg2[%c0_33, %c0_34] : memref<36x4xbf16, #tpu.memory_space<vmem>>, vector<36x4xbf16>
    %cst_35 = arith.constant dense<0.000000e+00> : vector<256x4xf32>
    %31 = tpu.matmul %29, %30, %cst_35 {dimension_numbers = #tpu.dot_dimension_numbers<[1], [0], [0], [1], [0, 0, 1, 1], [], []>} : vector<256x36xbf16>, vector<36x4xbf16>, vector<256x4xf32> -> vector<256x4xf32>
    %c0_36 = arith.constant 0 : index
    %c0_37 = arith.constant 0 : index
    %32 = vector.load %arg3[%c0_36, %c0_37] : memref<1x4xf32, #tpu.memory_space<vmem>>, vector<1x4xf32>
    %33 = vector.shape_cast %32 : vector<1x4xf32> to vector<4xf32>
    %34 = vector.shape_cast %33 : vector<4xf32> to vector<1x4xf32>
    %35 = vector.broadcast %34 : vector<1x4xf32> to vector<256x4xf32>
    %36 = arith.mulf %31, %35 : vector<256x4xf32>
    %c0_38 = arith.constant 0 : index
    %c0_39 = arith.constant 0 : index
    %37 = vector.load %arg4[%c0_38, %c0_39] : memref<1x4xf32, #tpu.memory_space<vmem>>, vector<1x4xf32>
    %38 = vector.shape_cast %37 : vector<1x4xf32> to vector<4xf32>
    %39 = vector.shape_cast %38 : vector<4xf32> to vector<1x4xf32>
    %40 = vector.broadcast %39 : vector<1x4xf32> to vector<256x4xf32>
    %41 = arith.addf %36, %40 : vector<256x4xf32>
    %cst_40 = arith.constant 0.000000e+00 : f32
    %42 = vector.broadcast %cst_40 : f32 to vector<256x4xf32>
    %43 = arith.maximumf %41, %42 : vector<256x4xf32>
    %cst_41 = arith.constant 0.000000e+00 : f32
    %44 = vector.broadcast %cst_41 : f32 to vector<18x18x4xf32>
    %c0_42 = arith.constant 0 : index
    %c0_43 = arith.constant 0 : index
    %c0_44 = arith.constant 0 : index
    %45 = vector.load %arg10[%c0_42, %c0_43, %c0_44] : memref<18x18x4xf32, #tpu.memory_space<vmem>>, vector<18x18x4xf32>
    tpu.vector_store %arg10[%c0_42, %c0_43, %c0_44], %44 {strides = array<i32>} : memref<18x18x4xf32, #tpu.memory_space<vmem>>, vector<18x18x4xf32>,
    %46 = vector.shape_cast %43 : vector<256x4xf32> to vector<16x16x4xf32>
    %c1_45 = arith.constant 1 : index
    %c1_46 = arith.constant 1 : index
    %c0_47 = arith.constant 0 : index
    %47 = vector.load %arg10[%c1_45, %c1_46, %c0_47] : memref<18x18x4xf32, #tpu.memory_space<vmem>>, vector<16x16x4xf32>
    tpu.vector_store %arg10[%c1_45, %c1_46, %c0_47], %46 {strides = array<i32>} : memref<18x18x4xf32, #tpu.memory_space<vmem>>, vector<16x16x4xf32>,
    %c0_48 = arith.constant 0 : index
    %c0_49 = arith.constant 0 : index
    %c0_50 = arith.constant 0 : index
    %48 = vector.load %arg10[%c0_48, %c0_49, %c0_50] : memref<18x18x4xf32, #tpu.memory_space<vmem>>, vector<18x18x4xf32>
    %49 = vector.extract_strided_slice %48 {offsets = [0, 0, 0], sizes = [18, 16, 4], strides = [1, 1, 1]} : vector<18x18x4xf32> to vector<18x16x4xf32>
    %50 = vector.extract_strided_slice %49 {offsets = [0, 0, 0], sizes = [16, 16, 4], strides = [1, 1, 1]} : vector<18x16x4xf32> to vector<16x16x4xf32>
    %c0_51 = arith.constant 0 : index
    %c0_52 = arith.constant 0 : index
    %c0_53 = arith.constant 0 : index
    %51 = vector.load %arg11[%c0_51, %c0_52, %c0_53] : memref<16x16x36xf32, #tpu.memory_space<vmem>>, vector<16x16x4xf32>
    tpu.vector_store %arg11[%c0_51, %c0_52, %c0_53], %50 {strides = array<i32>} : memref<16x16x36xf32, #tpu.memory_space<vmem>>, vector<16x16x4xf32>,
    %52 = vector.extract_strided_slice %49 {offsets = [1, 0, 0], sizes = [16, 16, 4], strides = [1, 1, 1]} : vector<18x16x4xf32> to vector<16x16x4xf32>
    %c0_54 = arith.constant 0 : index
    %c0_55 = arith.constant 0 : index
    %c4_56 = arith.constant 4 : index
    %53 = vector.load %arg11[%c0_54, %c0_55, %c4_56] : memref<16x16x36xf32, #tpu.memory_space<vmem>>, vector<16x16x4xf32>
    tpu.vector_store %arg11[%c0_54, %c0_55, %c4_56], %52 {strides = array<i32>} : memref<16x16x36xf32, #tpu.memory_space<vmem>>, vector<16x16x4xf32>,
    %54 = vector.extract_strided_slice %49 {offsets = [2, 0, 0], sizes = [16, 16, 4], strides = [1, 1, 1]} : vector<18x16x4xf32> to vector<16x16x4xf32>
    %c0_57 = arith.constant 0 : index
    %c0_58 = arith.constant 0 : index
    %c8_59 = arith.constant 8 : index
    %55 = vector.load %arg11[%c0_57, %c0_58, %c8_59] : memref<16x16x36xf32, #tpu.memory_space<vmem>>, vector<16x16x4xf32>
    tpu.vector_store %arg11[%c0_57, %c0_58, %c8_59], %54 {strides = array<i32>} : memref<16x16x36xf32, #tpu.memory_space<vmem>>, vector<16x16x4xf32>,
    %56 = vector.extract_strided_slice %48 {offsets = [0, 1, 0], sizes = [18, 16, 4], strides = [1, 1, 1]} : vector<18x18x4xf32> to vector<18x16x4xf32>
    %57 = vector.extract_strided_slice %56 {offsets = [0, 0, 0], sizes = [16, 16, 4], strides = [1, 1, 1]} : vector<18x16x4xf32> to vector<16x16x4xf32>
    %c0_60 = arith.constant 0 : index
    %c0_61 = arith.constant 0 : index
    %c12_62 = arith.constant 12 : index
    %58 = vector.load %arg11[%c0_60, %c0_61, %c12_62] : memref<16x16x36xf32, #tpu.memory_space<vmem>>, vector<16x16x4xf32>
    tpu.vector_store %arg11[%c0_60, %c0_61, %c12_62], %57 {strides = array<i32>} : memref<16x16x36xf32, #tpu.memory_space<vmem>>, vector<16x16x4xf32>,
    %59 = vector.extract_strided_slice %56 {offsets = [1, 0, 0], sizes = [16, 16, 4], strides = [1, 1, 1]} : vector<18x16x4xf32> to vector<16x16x4xf32>
    %c0_63 = arith.constant 0 : index
    %c0_64 = arith.constant 0 : index
    %c16_65 = arith.constant 16 : index
    %60 = vector.load %arg11[%c0_63, %c0_64, %c16_65] : memref<16x16x36xf32, #tpu.memory_space<vmem>>, vector<16x16x4xf32>
    tpu.vector_store %arg11[%c0_63, %c0_64, %c16_65], %59 {strides = array<i32>} : memref<16x16x36xf32, #tpu.memory_space<vmem>>, vector<16x16x4xf32>,
    %61 = vector.extract_strided_slice %56 {offsets = [2, 0, 0], sizes = [16, 16, 4], strides = [1, 1, 1]} : vector<18x16x4xf32> to vector<16x16x4xf32>
    %c0_66 = arith.constant 0 : index
    %c0_67 = arith.constant 0 : index
    %c20_68 = arith.constant 20 : index
    %62 = vector.load %arg11[%c0_66, %c0_67, %c20_68] : memref<16x16x36xf32, #tpu.memory_space<vmem>>, vector<16x16x4xf32>
    tpu.vector_store %arg11[%c0_66, %c0_67, %c20_68], %61 {strides = array<i32>} : memref<16x16x36xf32, #tpu.memory_space<vmem>>, vector<16x16x4xf32>,
    %63 = vector.extract_strided_slice %48 {offsets = [0, 2, 0], sizes = [18, 16, 4], strides = [1, 1, 1]} : vector<18x18x4xf32> to vector<18x16x4xf32>
    %64 = vector.extract_strided_slice %63 {offsets = [0, 0, 0], sizes = [16, 16, 4], strides = [1, 1, 1]} : vector<18x16x4xf32> to vector<16x16x4xf32>
    %c0_69 = arith.constant 0 : index
    %c0_70 = arith.constant 0 : index
    %c24_71 = arith.constant 24 : index
    %65 = vector.load %arg11[%c0_69, %c0_70, %c24_71] : memref<16x16x36xf32, #tpu.memory_space<vmem>>, vector<16x16x4xf32>
    tpu.vector_store %arg11[%c0_69, %c0_70, %c24_71], %64 {strides = array<i32>} : memref<16x16x36xf32, #tpu.memory_space<vmem>>, vector<16x16x4xf32>,
    %66 = vector.extract_strided_slice %63 {offsets = [1, 0, 0], sizes = [16, 16, 4], strides = [1, 1, 1]} : vector<18x16x4xf32> to vector<16x16x4xf32>
    %c0_72 = arith.constant 0 : index
    %c0_73 = arith.constant 0 : index
    %c28_74 = arith.constant 28 : index
    %67 = vector.load %arg11[%c0_72, %c0_73, %c28_74] : memref<16x16x36xf32, #tpu.memory_space<vmem>>, vector<16x16x4xf32>
    tpu.vector_store %arg11[%c0_72, %c0_73, %c28_74], %66 {strides = array<i32>} : memref<16x16x36xf32, #tpu.memory_space<vmem>>, vector<16x16x4xf32>,
    %68 = vector.extract_strided_slice %63 {offsets = [2, 0, 0], sizes = [16, 16, 4], strides = [1, 1, 1]} : vector<18x16x4xf32> to vector<16x16x4xf32>
    %c0_75 = arith.constant 0 : index
    %c0_76 = arith.constant 0 : index
    %c32_77 = arith.constant 32 : index
    %69 = vector.load %arg11[%c0_75, %c0_76, %c32_77] : memref<16x16x36xf32, #tpu.memory_space<vmem>>, vector<16x16x4xf32>
    tpu.vector_store %arg11[%c0_75, %c0_76, %c32_77], %68 {strides = array<i32>} : memref<16x16x36xf32, #tpu.memory_space<vmem>>, vector<16x16x4xf32>,
    %c0_78 = arith.constant 0 : index
    %c0_79 = arith.constant 0 : index
    %c0_80 = arith.constant 0 : index
    %70 = vector.load %arg11[%c0_78, %c0_79, %c0_80] : memref<16x16x36xf32, #tpu.memory_space<vmem>>, vector<16x16x36xf32>
    %71 = vector.shape_cast %70 : vector<16x16x36xf32> to vector<256x36xf32>
    %72 = arith.truncf %71 : vector<256x36xf32> to vector<256x36xbf16>
    %c0_81 = arith.constant 0 : index
    %c0_82 = arith.constant 0 : index
    %73 = vector.load %arg5[%c0_81, %c0_82] : memref<36x4xbf16, #tpu.memory_space<vmem>>, vector<36x4xbf16>
    %cst_83 = arith.constant dense<0.000000e+00> : vector<256x4xf32>
    %74 = tpu.matmul %72, %73, %cst_83 {dimension_numbers = #tpu.dot_dimension_numbers<[1], [0], [0], [1], [0, 0, 1, 1], [], []>} : vector<256x36xbf16>, vector<36x4xbf16>, vector<256x4xf32> -> vector<256x4xf32>
    %75 = vector.shape_cast %74 : vector<256x4xf32> to vector<16x16x4xf32>
    %c0_84 = arith.constant 0 : index
    %c0_85 = arith.constant 0 : index
    %76 = vector.load %arg6[%c0_84, %c0_85] : memref<1x4xf32, #tpu.memory_space<vmem>>, vector<1x4xf32>
    %77 = vector.shape_cast %76 : vector<1x4xf32> to vector<4xf32>
    %78 = vector.shape_cast %77 : vector<4xf32> to vector<1x1x4xf32>
    %79 = vector.broadcast %78 : vector<1x1x4xf32> to vector<16x16x4xf32>
    %80 = arith.mulf %75, %79 : vector<16x16x4xf32>
    %c0_86 = arith.constant 0 : index
    %c0_87 = arith.constant 0 : index
    %81 = vector.load %arg7[%c0_86, %c0_87] : memref<1x4xf32, #tpu.memory_space<vmem>>, vector<1x4xf32>
    %82 = vector.shape_cast %81 : vector<1x4xf32> to vector<4xf32>
    %83 = vector.shape_cast %82 : vector<4xf32> to vector<1x1x4xf32>
    %84 = vector.broadcast %83 : vector<1x1x4xf32> to vector<16x16x4xf32>
    %85 = arith.addf %80, %84 : vector<16x16x4xf32>
    %86 = arith.addf %85, %16 : vector<16x16x4xf32>
    %cst_88 = arith.constant 0.000000e+00 : f32
    %87 = vector.broadcast %cst_88 : f32 to vector<16x16x4xf32>
    %88 = arith.maximumf %86, %87 : vector<16x16x4xf32>
    %89 = vector.shape_cast %88 : vector<16x16x4xf32> to vector<1x16x16x4xf32>
    %c0_89 = arith.constant 0 : index
    %c0_90 = arith.constant 0 : index
    %c0_91 = arith.constant 0 : index
    %c0_92 = arith.constant 0 : index
    %90 = vector.load %arg8[%c0_89, %c0_90, %c0_91, %c0_92] : memref<1x16x16x4xf32, #tpu.memory_space<vmem>>, vector<1x16x16x4xf32>
    tpu.vector_store %arg8[%c0_89, %c0_90, %c0_91, %c0_92], %89 {strides = array<i32>} : memref<1x16x16x4xf32, #tpu.memory_space<vmem>>, vector<1x16x16x4xf32>,
    return
  }
  func.func @transform_0(%arg0: i32) -> (i32, i32, i32, i32) {
    %c0_i32 = arith.constant 0 : i32
    %c0_i32_0 = arith.constant 0 : i32
    %c0_i32_1 = arith.constant 0 : i32
    %c0_i32_2 = arith.constant 0 : i32
    return %arg0, %c0_i32, %c0_i32_0, %c0_i32_1 : i32, i32, i32, i32
  }
  func.func @transform_1(%arg0: i32) -> (i32, i32) {
    %c0_i32 = arith.constant 0 : i32
    %c0_i32_0 = arith.constant 0 : i32
    %c0_i32_1 = arith.constant 0 : i32
    return %c0_i32, %c0_i32_0 : i32, i32
  }
  func.func @transform_2(%arg0: i32) -> (i32, i32) {
    %c0_i32 = arith.constant 0 : i32
    %c0_i32_0 = arith.constant 0 : i32
    %c0_i32_1 = arith.constant 0 : i32
    return %c0_i32, %c0_i32_0 : i32, i32
  }
  func.func @transform_3(%arg0: i32) -> (i32, i32) {
    %c0_i32 = arith.constant 0 : i32
    %c0_i32_0 = arith.constant 0 : i32
    %c0_i32_1 = arith.constant 0 : i32
    return %c0_i32, %c0_i32_0 : i32, i32
  }
  func.func @transform_4(%arg0: i32) -> (i32, i32) {
    %c0_i32 = arith.constant 0 : i32
    %c0_i32_0 = arith.constant 0 : i32
    %c0_i32_1 = arith.constant 0 : i32
    return %c0_i32, %c0_i32_0 : i32, i32
  }
  func.func @transform_5(%arg0: i32) -> (i32, i32) {
    %c0_i32 = arith.constant 0 : i32
    %c0_i32_0 = arith.constant 0 : i32
    %c0_i32_1 = arith.constant 0 : i32
    return %c0_i32, %c0_i32_0 : i32, i32
  }
  func.func @transform_6(%arg0: i32) -> (i32, i32) {
    %c0_i32 = arith.constant 0 : i32
    %c0_i32_0 = arith.constant 0 : i32
    %c0_i32_1 = arith.constant 0 : i32
    return %c0_i32, %c0_i32_0 : i32, i32
  }
  func.func @transform_7(%arg0: i32) -> (i32, i32, i32, i32) {
    %c0_i32 = arith.constant 0 : i32
    %c0_i32_0 = arith.constant 0 : i32
    %c0_i32_1 = arith.constant 0 : i32
    %c0_i32_2 = arith.constant 0 : i32
    return %arg0, %c0_i32, %c0_i32_0, %c0_i32_1 : i32, i32, i32, i32
  }
}

</mosaic_0001>

<bundles_post_ra>
// kernel: basic_res_block.1
= control target key start
LH: loop header
LB: loop body
LE: loop exit
PB: predicated region body
PF: predicated region fallthrough
CT: control target
= control target key end

     0   :  { %s4920_s24 = smov 0   ;;  %s8082_s0 = inlined_call_operand.vmem [shape: f32[2,16,16,4], index: 0, kind: input, shape index: {}]   ;;  %s8083_s1 = inlined_call_operand.vmem [shape: bf16[36,4], index: 1, kind: input, shape index: {}]   ;;  %s8084_s2 = inlined_call_operand.vmem [shape: f32[1,4], index: 2, kind: input, shape index: {}]   ;;  %s8085_s3 = inlined_call_operand.vmem [shape: f32[1,4], index: 3, kind: input, shape index: {}]   ;;  %s8086_s4 = inlined_call_operand.vmem [shape: bf16[36,4], index: 4, kind: input, shape index: {}]   ;;  %s8087_s5 = inlined_call_operand.vmem [shape: f32[1,4], index: 5, kind: input, shape index: {}]   ;;  %s8088_s6 = inlined_call_operand.vmem [shape: f32[1,4], index: 6, kind: input, shape index: {}]   ;;  %s8089_s7 = inlined_call_operand.vmem [shape: f32[2,16,16,4], index: 7, kind: output, shape index: {}]  }
   0x1 LB: > { %s4618_s25 = sadd.s32 4294967295, %s4869_s24   ;;  %p4622_p0 = scmp.ge.s32.totalorder %s4869_s24, 1  ;;  %s4869_s24 = sphi %s4920_s24, %s17_s24  }
   0x2   : > { %p237_p1 = scmp.lt.s32.totalorder %s4869_s24, 3 }
   0x4   : > { %p238_p2 = pnand %p4622_p0, %p237_p1 }
   0x6   : > { %241 = sbr.rel (%p238_p2) target bundleno = 2124 (0x84c), region = 48 }
   0xd   : > { %p4930_p3 = scmp.lt.s32.totalorder %s4618_s25, 1  ;;  %vm280_vm0 = vcmask 31744   ;;  %vm283_vm1 = vcmask 25600   ;;  %v4871_v0 = vmov 0.0   ;;  %s4872_s8 = smov 4   ;;  %vm615_vm2 = vcmask 64544  }
   0xe   : > { %288 = vst.msk [vmem:[#allocation2 + $0x30] sm:$0xff] %vm280_vm0, %v4871_v0  ;;  %289 = vst.msk [vmem:[#allocation2 + $0x38] sm:$0xff] %vm280_vm0, %v4871_v0  ;;  %s4873_s9 = smov 8   ;;  %s4874_s10 = smov 12   ;;  %vm746_vm3 = vcmask 97344   ;;  %vm943_vm4 = vcmask 130144  }
   0xf   : > { %281 = vst.msk [vmem:[#allocation2] sm:$0xff] %vm280_vm0, %v4871_v0  ;;  %282 = vst.msk [vmem:[#allocation2 + $0x8] sm:$0xff] %vm280_vm0, %v4871_v0  ;;  %s8268_s25 = smov (!%p4930_p3, %s4618_s25), 1  ;;  %s4875_s11 = smov 16   ;;  %vm941_vm5 = vcmask 130145   ;;  %vm945_vm6 = vcmask 122976  }
  0x10   : > { %285 = vst.msk [vmem:[#allocation2 + $0x18] sm:$0xff] %vm280_vm0, %v4871_v0  ;;  %286 = vst.msk [vmem:[#allocation2 + $0x20] sm:$0xff] %vm280_vm0, %v4871_v0  ;;  %s4671_s27 = sshll.u32 %s8268_s25, 8  ;;  %s4876_s12 = smov 20   ;;  %vm1139_vm7 = vcmask 162944   ;;  %vm1137_vm8 = vcmask 162945  }
  0x11   : > { %291 = vst.msk [vmem:[#allocation2 + $0x48] sm:$0xff] %vm280_vm0, %v4871_v0  ;;  %292 = vst.msk [vmem:[#allocation2 + $0x50] sm:$0xff] %vm280_vm0, %v4871_v0  ;;  %s5162_s30 = scalar_lea.vmem %s8082_s0, %s4671_s27  ;;  %vm1141_vm9 = vcmask 155776   ;;  %s4877_s13 = smov 24   ;;  %vm8094_vm10 = vcmask 195744   ;;  %vm8095_vm11 = vcmask 195745  }
  0x12   : > { %294 = vst.msk [vmem:[#allocation2 + $0x60] sm:$0xff] %vm280_vm0, %v4871_v0  ;;  %295 = vst.msk [vmem:[#allocation2 + $0x68] sm:$0xff] %vm280_vm0, %v4871_v0  ;;  %v338_v1 = vld [vmem:[%s5162_s30 + $0x10] sm:$0xff]  ;;  %v336_v2 = vld [vmem:[%s5162_s30] sm:$0xff]  ;;  %vm8091_vm12 = vcmask 188576   ;;  %s4878_s14 = smov 28   ;;  %s7853_s18 = scalar_lea.vmem %s8089_s7, %s4671_s27 }
  0x13   : > { %297 = vst.msk [vmem:[#allocation2 + $0x78] sm:$0xff] %vm280_vm0, %v4871_v0  ;;  %298 = vst.msk [vmem:[#allocation2 + $0x80] sm:$0xff] %vm280_vm0, %v4871_v0  ;;  %v339_v3 = vld [vmem:[%s5162_s30 + $0x18] sm:$0xff]  ;;  %v337_v4 = vld [vmem:[%s5162_s30 + $0x8] sm:$0xff]  ;;  %vm8093_vm13 = vcmask 228544   ;;  %vm8090_vm14 = vcmask 228546  }
  0x14   : > { %300 = vst.msk [vmem:[#allocation2 + $0x90] sm:$0xff] %vm280_vm0, %v4871_v0  ;;  %301 = vst.msk [vmem:[#allocation2 + $0x98] sm:$0xff] %vm280_vm0, %v4871_v0  ;;  %v340_v5 = vld [vmem:[%s5162_s30 + $0x20] sm:$0xff]  ;;  %v341_v6 = vld [vmem:[%s5162_s30 + $0x28] sm:$0xff]  ;;  %vm8092_vm15 = vcmask 222400   ;;  %s4879_s21 = smov 32  }
  0x15   : > { %303 = vst.msk [vmem:[#allocation2 + $0xa8] sm:$0xff] %vm280_vm0, %v4871_v0  ;;  %304 = vst.msk [vmem:[#allocation2 + $0xb0] sm:$0xff] %vm280_vm0, %v4871_v0  ;;  %v342_v7 = vld [vmem:[%s5162_s30 + $0x30] sm:$0xff]  ;;  %v343_v8 = vld [vmem:[%s5162_s30 + $0x38] sm:$0xff] }
  0x16   : > { %306 = vst.msk [vmem:[#allocation2 + $0xc0] sm:$0xff] %vm280_vm0, %v4871_v0  ;;  %307 = vst.msk [vmem:[#allocation2 + $0xc8] sm:$0xff] %vm280_vm0, %v4871_v0  ;;  %v344_v9 = vld [vmem:[%s5162_s30 + $0x40] sm:$0xff]  ;;  %v345_v10 = vld [vmem:[%s5162_s30 + $0x48] sm:$0xff] }
  0x17   : > { %309 = vst.msk [vmem:[#allocation2 + $0xd8] sm:$0xff] %vm280_vm0, %v4871_v0  ;;  %310 = vst.msk [vmem:[#allocation2 + $0xe0] sm:$0xff] %vm280_vm0, %v4871_v0  ;;  %v346_v11 = vld [vmem:[%s5162_s30 + $0x50] sm:$0xff]  ;;  %v347_v12 = vld [vmem:[%s5162_s30 + $0x58] sm:$0xff] }
  0x18   : > { %312 = vst.msk [vmem:[#allocation2 + $0xf0] sm:$0xff] %vm280_vm0, %v4871_v0  ;;  %313 = vst.msk [vmem:[#allocation2 + $0xf8] sm:$0xff] %vm280_vm0, %v4871_v0  ;;  %v348_v13 = vld [vmem:[%s5162_s30 + $0x60] sm:$0xff]  ;;  %v349_v14 = vld [vmem:[%s5162_s30 + $0x68] sm:$0xff] }
  0x19   : > { %315 = vst.msk [vmem:[#allocation2 + $0x108] sm:$0xff] %vm280_vm0, %v4871_v0  ;;  %316 = vst.msk [vmem:[#allocation2 + $0x110] sm:$0xff] %vm280_vm0, %v4871_v0  ;;  %v350_v15 = vld [vmem:[%s5162_s30 + $0x70] sm:$0xff]  ;;  %v351_v16 = vld [vmem:[%s5162_s30 + $0x78] sm:$0xff] }
  0x1a   : > { %318 = vst.msk [vmem:[#allocation2 + $0x120] sm:$0xff] %vm280_vm0, %v4871_v0  ;;  %319 = vst.msk [vmem:[#allocation2 + $0x128] sm:$0xff] %vm280_vm0, %v4871_v0  ;;  %v352_v17 = vld [vmem:[%s5162_s30 + $0x80] sm:$0xff]  ;;  %v353_v18 = vld [vmem:[%s5162_s30 + $0x88] sm:$0xff] }
  0x1b   : > { %321 = vst.msk [vmem:[#allocation2 + $0x138] sm:$0xff] %vm280_vm0, %v4871_v0  ;;  %322 = vst.msk [vmem:[#allocation2 + $0x140] sm:$0xff] %vm280_vm0, %v4871_v0  ;;  %v354_v19 = vld [vmem:[%s5162_s30 + $0x90] sm:$0xff]  ;;  %v355_v20 = vld [vmem:[%s5162_s30 + $0x98] sm:$0xff] }
  0x1c   : > { %324 = vst.msk [vmem:[#allocation2 + $0x150] sm:$0xff] %vm280_vm0, %v4871_v0  ;;  %325 = vst.msk [vmem:[#allocation2 + $0x158] sm:$0xff] %vm280_vm0, %v4871_v0  ;;  %v356_v21 = vld [vmem:[%s5162_s30 + $0xa0] sm:$0xff]  ;;  %v357_v22 = vld [vmem:[%s5162_s30 + $0xa8] sm:$0xff] }
  0x1d   : > { %327 = vst.msk [vmem:[#allocation2 + $0x168] sm:$0xff] %vm280_vm0, %v4871_v0  ;;  %328 = vst.msk [vmem:[#allocation2 + $0x170] sm:$0xff] %vm280_vm0, %v4871_v0  ;;  %v358_v23 = vld [vmem:[%s5162_s30 + $0xb0] sm:$0xff]  ;;  %v359_v24 = vld [vmem:[%s5162_s30 + $0xb8] sm:$0xff] }
  0x1e   : > { %330 = vst.msk [vmem:[#allocation2 + $0x180] sm:$0xff] %vm280_vm0, %v4871_v0  ;;  %331 = vst.msk [vmem:[#allocation2 + $0x188] sm:$0xff] %vm280_vm0, %v4871_v0  ;;  %v360_v49 = vld [vmem:[%s5162_s30 + $0xc0] sm:$0xff]  ;;  %v361_v50 = vld [vmem:[%s5162_s30 + $0xc8] sm:$0xff] }
  0x1f   : > { %333 = vst.msk [vmem:[#allocation2 + $0x198] sm:$0xff] %vm280_vm0, %v4871_v0  ;;  %334 = vst.msk [vmem:[#allocation2 + $0x1a0] sm:$0xff] %vm280_vm0, %v4871_v0  ;;  %v362_v51 = vld [vmem:[%s5162_s30 + $0xd0] sm:$0xff]  ;;  %v363_v52 = vld [vmem:[%s5162_s30 + $0xd8] sm:$0xff] }
  0x20   : > { %2361 = vst.msk [vmem:[#allocation3] sm:$0xff] %vm280_vm0, %v4871_v0  ;;  %2362 = vst.msk [vmem:[#allocation3 + $0x8] sm:$0xff] %vm280_vm0, %v4871_v0  ;;  %v364_v53 = vld [vmem:[%s5162_s30 + $0xe0] sm:$0xff]  ;;  %v365_v55 = vld [vmem:[%s5162_s30 + $0xe8] sm:$0xff] }
  0x21   : > { %2364 = vst.msk [vmem:[#allocation3 + $0x18] sm:$0xff] %vm280_vm0, %v4871_v0  ;;  %2365 = vst.msk [vmem:[#allocation3 + $0x20] sm:$0xff] %vm280_vm0, %v4871_v0  ;;  %v5328_v54 = vld [vmem:[#allocation2] sm:$0xff]  ;;  %v366_v56 = vld [vmem:[%s5162_s30 + $0xf0] sm:$0xff] }
  0x22   : > { %2367 = vst.msk [vmem:[#allocation3 + $0x30] sm:$0xff] %vm280_vm0, %v4871_v0  ;;  %2368 = vst.msk [vmem:[#allocation3 + $0x38] sm:$0xff] %vm280_vm0, %v4871_v0  ;;  %v367_v57 = vld [vmem:[%s5162_s30 + $0xf8] sm:$0xff]  ;;  %v5340_v58 = vld [vmem:[#allocation2 + $0x8] sm:$0xff] }
  0x23   : > { %2370 = vst.msk [vmem:[#allocation3 + $0x48] sm:$0xff] %vm280_vm0, %v4871_v0  ;;  %2371 = vst.msk [vmem:[#allocation3 + $0x50] sm:$0xff] %vm280_vm0, %v4871_v0 }
  0x24   : > { %2373 = vst.msk [vmem:[#allocation3 + $0x60] sm:$0xff] %vm280_vm0, %v4871_v0  ;;  %2374 = vst.msk [vmem:[#allocation3 + $0x68] sm:$0xff] %vm280_vm0, %v4871_v0 }
  0x25   : > { %2376 = vst.msk [vmem:[#allocation3 + $0x78] sm:$0xff] %vm280_vm0, %v4871_v0  ;;  %2377 = vst.msk [vmem:[#allocation3 + $0x80] sm:$0xff] %vm280_vm0, %v4871_v0 }
  0x26   : > { %2379 = vst.msk [vmem:[#allocation3 + $0x90] sm:$0xff] %vm280_vm0, %v4871_v0  ;;  %2380 = vst.msk [vmem:[#allocation3 + $0x98] sm:$0xff] %vm280_vm0, %v4871_v0 }
  0x27   : > { %2382 = vst.msk [vmem:[#allocation3 + $0xa8] sm:$0xff] %vm280_vm0, %v4871_v0  ;;  %2383 = vst.msk [vmem:[#allocation3 + $0xb0] sm:$0xff] %vm280_vm0, %v4871_v0 }
  0x28   : > { %2385 = vst.msk [vmem:[#allocation3 + $0xc0] sm:$0xff] %vm280_vm0, %v4871_v0  ;;  %2386 = vst.msk [vmem:[#allocation3 + $0xc8] sm:$0xff] %vm280_vm0, %v4871_v0 }
  0x29   : > { %2388 = vst.msk [vmem:[#allocation3 + $0xd8] sm:$0xff] %vm280_vm0, %v4871_v0  ;;  %2389 = vst.msk [vmem:[#allocation3 + $0xe0] sm:$0xff] %vm280_vm0, %v4871_v0 }
  0x2a   : > { %2391 = vst.msk [vmem:[#allocation3 + $0xf0] sm:$0xff] %vm280_vm0, %v4871_v0  ;;  %2392 = vst.msk [vmem:[#allocation3 + $0xf8] sm:$0xff] %vm280_vm0, %v4871_v0 }
  0x2b   : > { %2394 = vst.msk [vmem:[#allocation3 + $0x108] sm:$0xff] %vm280_vm0, %v4871_v0  ;;  %2395 = vst.msk [vmem:[#allocation3 + $0x110] sm:$0xff] %vm280_vm0, %v4871_v0 }
  0x2c   : > { %2397 = vst.msk [vmem:[#allocation3 + $0x120] sm:$0xff] %vm280_vm0, %v4871_v0  ;;  %2398 = vst.msk [vmem:[#allocation3 + $0x128] sm:$0xff] %vm280_vm0, %v4871_v0 }
  0x2d   : > { %2400 = vst.msk [vmem:[#allocation3 + $0x138] sm:$0xff] %vm280_vm0, %v4871_v0  ;;  %2401 = vst.msk [vmem:[#allocation3 + $0x140] sm:$0xff] %vm280_vm0, %v4871_v0 }
  0x2e   : > { %2403 = vst.msk [vmem:[#allocation3 + $0x150] sm:$0xff] %vm280_vm0, %v4871_v0  ;;  %2404 = vst.msk [vmem:[#allocation3 + $0x158] sm:$0xff] %vm280_vm0, %v4871_v0 }
  0x2f   : > { %2406 = vst.msk [vmem:[#allocation3 + $0x168] sm:$0xff] %vm280_vm0, %v4871_v0  ;;  %2407 = vst.msk [vmem:[#allocation3 + $0x170] sm:$0xff] %vm280_vm0, %v4871_v0 }
  0x30   : > { %2409 = vst.msk [vmem:[#allocation3 + $0x180] sm:$0xff] %vm280_vm0, %v4871_v0  ;;  %2410 = vst.msk [vmem:[#allocation3 + $0x188] sm:$0xff] %vm280_vm0, %v4871_v0 }
  0x31   : > { %2412 = vst.msk [vmem:[#allocation3 + $0x198] sm:$0xff] %vm280_vm0, %v4871_v0  ;;  %2413 = vst.msk [vmem:[#allocation3 + $0x1a0] sm:$0xff] %vm280_vm0, %v4871_v0 }
  0x32   : > { %290 = vst.msk [vmem:[#allocation2 + $0x40] sm:$0x3] %vm283_vm1, %v4871_v0  ;;  %284 = vst.msk [vmem:[#allocation2 + $0x10] sm:$0x3] %vm283_vm1, %v4871_v0 }
  0x33   : > { %287 = vst.msk [vmem:[#allocation2 + $0x28] sm:$0x3] %vm283_vm1, %v4871_v0  ;;  %293 = vst.msk [vmem:[#allocation2 + $0x58] sm:$0x3] %vm283_vm1, %v4871_v0 }
  0x34   : > { %296 = vst.msk [vmem:[#allocation2 + $0x70] sm:$0x3] %vm283_vm1, %v4871_v0  ;;  %299 = vst.msk [vmem:[#allocation2 + $0x88] sm:$0x3] %vm283_vm1, %v4871_v0 }
  0x35   : > { %302 = vst.msk [vmem:[#allocation2 + $0xa0] sm:$0x3] %vm283_vm1, %v4871_v0  ;;  %305 = vst.msk [vmem:[#allocation2 + $0xb8] sm:$0x3] %vm283_vm1, %v4871_v0 }
  0x36   : > { %308 = vst.msk [vmem:[#allocation2 + $0xd0] sm:$0x3] %vm283_vm1, %v4871_v0  ;;  %311 = vst.msk [vmem:[#allocation2 + $0xe8] sm:$0x3] %vm283_vm1, %v4871_v0 }
  0x37   : > { %314 = vst.msk [vmem:[#allocation2 + $0x100] sm:$0x3] %vm283_vm1, %v4871_v0  ;;  %317 = vst.msk [vmem:[#allocation2 + $0x118] sm:$0x3] %vm283_vm1, %v4871_v0 }
  0x38   : > { %320 = vst.msk [vmem:[#allocation2 + $0x130] sm:$0x3] %vm283_vm1, %v4871_v0  ;;  %323 = vst.msk [vmem:[#allocation2 + $0x148] sm:$0x3] %vm283_vm1, %v4871_v0 }
  0x39   : > { %326 = vst.msk [vmem:[#allocation2 + $0x160] sm:$0x3] %vm283_vm1, %v4871_v0  ;;  %329 = vst.msk [vmem:[#allocation2 + $0x178] sm:$0x3] %vm283_vm1, %v4871_v0 }
  0x3a   : > { %332 = vst.msk [vmem:[#allocation2 + $0x190] sm:$0x3] %vm283_vm1, %v4871_v0  ;;  %335 = vst.msk [vmem:[#allocation2 + $0x1a8] sm:$0x3] %vm283_vm1, %v4871_v0 }
  0x3b   : > { %2363 = vst.msk [vmem:[#allocation3 + $0x10] sm:$0x3] %vm283_vm1, %v4871_v0  ;;  %2366 = vst.msk [vmem:[#allocation3 + $0x28] sm:$0x3] %vm283_vm1, %v4871_v0 }
  0x3c   : > { %2369 = vst.msk [vmem:[#allocation3 + $0x40] sm:$0x3] %vm283_vm1, %v4871_v0  ;;  %2372 = vst.msk [vmem:[#allocation3 + $0x58] sm:$0x3] %vm283_vm1, %v4871_v0 }
  0x3d   : > { %2375 = vst.msk [vmem:[#allocation3 + $0x70] sm:$0x3] %vm283_vm1, %v4871_v0  ;;  %2378 = vst.msk [vmem:[#allocation3 + $0x88] sm:$0x3] %vm283_vm1, %v4871_v0 }
  0x3e   : > { %2381 = vst.msk [vmem:[#allocation3 + $0xa0] sm:$0x3] %vm283_vm1, %v4871_v0  ;;  %2384 = vst.msk [vmem:[#allocation3 + $0xb8] sm:$0x3] %vm283_vm1, %v4871_v0 }
  0x3f   : > { %2387 = vst.msk [vmem:[#allocation3 + $0xd0] sm:$0x3] %vm283_vm1, %v4871_v0  ;;  %2390 = vst.msk [vmem:[#allocation3 + $0xe8] sm:$0x3] %vm283_vm1, %v4871_v0 }
  0x40   : > { %2393 = vst.msk [vmem:[#allocation3 + $0x100] sm:$0x3] %vm283_vm1, %v4871_v0  ;;  %2396 = vst.msk [vmem:[#allocation3 + $0x118] sm:$0x3] %vm283_vm1, %v4871_v0 }
  0x41   : > { %2399 = vst.msk [vmem:[#allocation3 + $0x130] sm:$0x3] %vm283_vm1, %v4871_v0  ;;  %2402 = vst.msk [vmem:[#allocation3 + $0x148] sm:$0x3] %vm283_vm1, %v4871_v0 }
  0x42   : > { %2405 = vst.msk [vmem:[#allocation3 + $0x160] sm:$0x3] %vm283_vm1, %v4871_v0  ;;  %2408 = vst.msk [vmem:[#allocation3 + $0x178] sm:$0x3] %vm283_vm1, %v4871_v0 }
  0x43   : > { %2411 = vst.msk [vmem:[#allocation3 + $0x190] sm:$0x3] %vm283_vm1, %v4871_v0  ;;  %2414 = vst.msk [vmem:[#allocation3 + $0x1a8] sm:$0x3] %vm283_vm1, %v4871_v0  ;;  %vm2086_vm1 = vcmask 1041408  }
  0x44   : > { %371 = vst.msk [vmem:[#allocation2 + $0x31] sm:$0xff] %vm280_vm0, %v338_v1  ;;  %369 = vst.msk [vmem:[#allocation2 + $0x19] sm:$0xff] %vm280_vm0, %v336_v2 }
  0x45   : > { %372 = vst.msk [vmem:[#allocation2 + $0x39] sm:$0xff] %vm280_vm0, %v339_v3  ;;  %370 = vst.msk [vmem:[#allocation2 + $0x21] sm:$0xff] %vm280_vm0, %v337_v4 }
  0x46   : > { %373 = vst.msk [vmem:[#allocation2 + $0x49] sm:$0xff] %vm280_vm0, %v340_v5  ;;  %374 = vst.msk [vmem:[#allocation2 + $0x51] sm:$0xff] %vm280_vm0, %v341_v6 }
  0x47   : > { %375 = vst.msk [vmem:[#allocation2 + $0x61] sm:$0xff] %vm280_vm0, %v342_v7  ;;  %376 = vst.msk [vmem:[#allocation2 + $0x69] sm:$0xff] %vm280_vm0, %v343_v8  ;;  %v5488_v7 = vld [vmem:[#allocation2 + $0x1a0] sm:$0xff]  ;;  %v5490_v8 = vld [vmem:[#allocation2 + $0x198] sm:$0xff] }
  0x48   : > { %377 = vst.msk [vmem:[#allocation2 + $0x79] sm:$0xff] %vm280_vm0, %v344_v9  ;;  %378 = vst.msk [vmem:[#allocation2 + $0x81] sm:$0xff] %vm280_vm0, %v345_v10 }
  0x49   : > { %379 = vst.msk [vmem:[#allocation2 + $0x91] sm:$0xff] %vm280_vm0, %v346_v11  ;;  %380 = vst.msk [vmem:[#allocation2 + $0x99] sm:$0xff] %vm280_vm0, %v347_v12 }
  0x4a   : > { %381 = vst.msk [vmem:[#allocation2 + $0xa9] sm:$0xff] %vm280_vm0, %v348_v13  ;;  %382 = vst.msk [vmem:[#allocation2 + $0xb1] sm:$0xff] %vm280_vm0, %v349_v14  ;;  %v5504_v13 = vld [vmem:[#allocation2 + $0x10] sm:$0x3] }
  0x4b   : > { %383 = vst.msk [vmem:[#allocation2 + $0xc1] sm:$0xff] %vm280_vm0, %v350_v15  ;;  %384 = vst.msk [vmem:[#allocation2 + $0xc9] sm:$0xff] %vm280_vm0, %v351_v16  ;;  %v5209_v25 = vld [vmem:[#allocation2 + $0x30] sm:$0xff]  ;;  %v5211_v26 = vld [vmem:[#allocation2 + $0x18] sm:$0xff] }
  0x4c   : > { %385 = vst.msk [vmem:[#allocation2 + $0xd9] sm:$0xff] %vm280_vm0, %v352_v17  ;;  %386 = vst.msk [vmem:[#allocation2 + $0xe1] sm:$0xff] %vm280_vm0, %v353_v18  ;;  %v5213_v27 = vld [vmem:[#allocation2 + $0x38] sm:$0xff]  ;;  %523 = vrot.lane.b32.xlu1 %v5209_v25, %s4872_s8  ;;  %519 = vrot.lane.b32.xlu0 %v5211_v26, %s4872_s8  ;;  %v5228_v28 = vld [vmem:[#allocation2 + $0x20] sm:$0xff] }
  0x4d   : > { %387 = vst.msk [vmem:[#allocation2 + $0xf1] sm:$0xff] %vm280_vm0, %v354_v19  ;;  %388 = vst.msk [vmem:[#allocation2 + $0xf9] sm:$0xff] %vm280_vm0, %v355_v20  ;;  %v5230_v29 = vld [vmem:[#allocation2 + $0x50] sm:$0xff]  ;;  %v5232_v30 = vld [vmem:[#allocation2 + $0x48] sm:$0xff] }
  0x4e   : > { %389 = vst.msk [vmem:[#allocation2 + $0x109] sm:$0xff] %vm280_vm0, %v356_v21  ;;  %390 = vst.msk [vmem:[#allocation2 + $0x111] sm:$0xff] %vm280_vm0, %v357_v22  ;;  %v5240_v31 = vld [vmem:[#allocation2 + $0x68] sm:$0xff]  ;;  %v5242_v32 = vld [vmem:[#allocation2 + $0x60] sm:$0xff] }
  0x4f   : > { %391 = vst.msk [vmem:[#allocation2 + $0x121] sm:$0xff] %vm280_vm0, %v358_v23  ;;  %392 = vst.msk [vmem:[#allocation2 + $0x129] sm:$0xff] %vm280_vm0, %v359_v24  ;;  %v5244_v33 = vld [vmem:[#allocation2 + $0x78] sm:$0xff]  ;;  %v5250_v34 = vld [vmem:[#allocation2 + $0x80] sm:$0xff] }
  0x50   : > { %459 = vst.msk [vmem:[#allocation4 + $0x20] sm:$0xff] %vm280_vm0, %v5209_v25  ;;  %457 = vst.msk [vmem:[#allocation4 + $0x10] sm:$0xff] %vm280_vm0, %v5211_v26  ;;  %v5254_v35 = vld [vmem:[#allocation2 + $0x98] sm:$0xff]  ;;  %v5256_v36 = vld [vmem:[#allocation2 + $0x90] sm:$0xff]  ;;  %525 = vrot.lane.b32.xlu1 %v5213_v27, %s4872_s8  ;;  %521 = vrot.lane.b32.xlu0 %v5228_v28, %s4872_s8 }
  0x51   : > { %460 = vst.msk [vmem:[#allocation4 + $0x28] sm:$0xff] %vm280_vm0, %v5213_v27  ;;  %458 = vst.msk [vmem:[#allocation4 + $0x18] sm:$0xff] %vm280_vm0, %v5228_v28  ;;  %v5264_v37 = vld [vmem:[#allocation2 + $0xb0] sm:$0xff]  ;;  %v5266_v38 = vld [vmem:[#allocation2 + $0xa8] sm:$0xff] }
  0x52   : > { %462 = vst.msk [vmem:[#allocation4 + $0x38] sm:$0xff] %vm280_vm0, %v5230_v29  ;;  %461 = vst.msk [vmem:[#allocation4 + $0x30] sm:$0xff] %vm280_vm0, %v5232_v30  ;;  %v5268_v39 = vld [vmem:[#allocation2 + $0xc0] sm:$0xff]  ;;  %v5278_v40 = vld [vmem:[#allocation2 + $0xc8] sm:$0xff] }
  0x53   : > { %8119 = vst [vmem:[#allocation5_spill] sm:$0xff] %v5244_v33  ;;  %464 = vst.msk [vmem:[#allocation4 + $0x48] sm:$0xff] %vm280_vm0, %v5240_v31  ;;  %v5282_v41 = vld [vmem:[#allocation2 + $0xe0] sm:$0xff]  ;;  %v5284_v42 = vld [vmem:[#allocation2 + $0xd8] sm:$0xff] }
  0x54   : > { %463 = vst.msk [vmem:[#allocation4 + $0x40] sm:$0xff] %vm280_vm0, %v5242_v32  ;;  %8120 = vst [vmem:[#allocation6_spill] sm:$0xff] %v5250_v34  ;;  %v5292_v43 = vld [vmem:[#allocation2 + $0xf8] sm:$0xff]  ;;  %v5294_v44 = vld [vmem:[#allocation2 + $0xf0] sm:$0xff]  ;;  %529 = vrot.lane.b32.xlu1 %v5230_v29, %s4872_s8  ;;  %527 = vrot.lane.b32.xlu0 %v5232_v30, %s4872_s8 }
  0x55   : > { %465 = vst.msk [vmem:[#allocation4 + $0x50] sm:$0xff] %vm280_vm0, %v5244_v33  ;;  %8121 = vst [vmem:[#allocation7_spill] sm:$0xff] %v5254_v35  ;;  %v5296_v45 = vld [vmem:[#allocation2 + $0x108] sm:$0xff]  ;;  %v5302_v46 = vld [vmem:[#allocation2 + $0x110] sm:$0xff] }
  0x56   : > { %466 = vst.msk [vmem:[#allocation4 + $0x58] sm:$0xff] %vm280_vm0, %v5250_v34  ;;  %468 = vst.msk [vmem:[#allocation4 + $0x68] sm:$0xff] %vm280_vm0, %v5254_v35  ;;  %v5306_v47 = vld [vmem:[#allocation2 + $0x128] sm:$0xff]  ;;  %v5308_v48 = vld [vmem:[#allocation2 + $0x120] sm:$0xff] }
  0x57   : > { %467 = vst.msk [vmem:[#allocation4 + $0x60] sm:$0xff] %vm280_vm0, %v5256_v36  ;;  %8122 = vst [vmem:[#allocation8_spill] sm:$0xff] %v5264_v37  ;;  %v5512_v16 = vld [vmem:[#allocation2 + $0x28] sm:$0x3]  ;;  %v5526_v21 = vld [vmem:[#allocation2 + $0x40] sm:$0x3] }
  0x58   : > { %8123 = vst [vmem:[#allocation9_spill] sm:$0xff] %v5266_v38  ;;  %8124 = vst [vmem:[#allocation10_spill] sm:$0xff] %v5268_v39  ;;  %533 = vrot.lane.b32.xlu1 %v5240_v31, %s4872_s8  ;;  %531 = vrot.lane.b32.xlu0 %v5242_v32, %s4872_s8  ;;  %v5534_v24 = vld [vmem:[#allocation2 + $0x58] sm:$0x3] }
  0x59   : > { %470 = vst.msk [vmem:[#allocation4 + $0x78] sm:$0xff] %vm280_vm0, %v5264_v37  ;;  %469 = vst.msk [vmem:[#allocation4 + $0x70] sm:$0xff] %vm280_vm0, %v5266_v38 }
  0x5a   : > { %8125 = vst [vmem:[#allocation11_spill] sm:$0xff] %v5278_v40  ;;  %471 = vst.msk [vmem:[#allocation4 + $0x80] sm:$0xff] %vm280_vm0, %v5268_v39 }
  0x5b   : > { %8126 = vst [vmem:[#allocation12_spill] sm:$0xff] %v5282_v41  ;;  %8127 = vst [vmem:[#allocation13_spill] sm:$0xff] %v5284_v42 }
  0x5c   : > { %472 = vst.msk [vmem:[#allocation4 + $0x88] sm:$0xff] %vm280_vm0, %v5278_v40  ;;  %474 = vst.msk [vmem:[#allocation4 + $0x98] sm:$0xff] %vm280_vm0, %v5282_v41  ;;  %537 = vrot.lane.b32.xlu1 %v5250_v34, %s4872_s8  ;;  %535 = vrot.lane.b32.xlu0 %v5244_v33, %s4872_s8 }
  0x5d   : > { %473 = vst.msk [vmem:[#allocation4 + $0x90] sm:$0xff] %vm280_vm0, %v5284_v42  ;;  %8128 = vst [vmem:[#allocation14_spill] sm:$0xff] %v5292_v43 }
  0x5e   : > { %8129 = vst [vmem:[#allocation15_spill] sm:$0xff] %v5294_v44  ;;  %8130 = vst [vmem:[#allocation16_spill] sm:$0xff] %v5296_v45 }
  0x5f   : > { %476 = vst.msk [vmem:[#allocation4 + $0xa8] sm:$0xff] %vm280_vm0, %v5292_v43  ;;  %475 = vst.msk [vmem:[#allocation4 + $0xa0] sm:$0xff] %vm280_vm0, %v5294_v44 }
  0x60   : > { %8131 = vst [vmem:[#allocation17_spill] sm:$0xff] %v5302_v46  ;;  %477 = vst.msk [vmem:[#allocation4 + $0xb0] sm:$0xff] %vm280_vm0, %v5296_v45  ;;  %541 = vrot.lane.b32.xlu1 %v5254_v35, %s4872_s8  ;;  %539 = vrot.lane.b32.xlu0 %v5256_v36, %s4872_s8 }
  0x61   : > { %8132 = vst [vmem:[#allocation18_spill] sm:$0xff] %v5306_v47  ;;  %8133 = vst [vmem:[#allocation19_spill] sm:$0xff] %v5308_v48 }
  0x62   : > { %478 = vst.msk [vmem:[#allocation4 + $0xb8] sm:$0xff] %vm280_vm0, %v5302_v46  ;;  %480 = vst.msk [vmem:[#allocation4 + $0xc8] sm:$0xff] %vm280_vm0, %v5306_v47 }
  0x63   : > { %479 = vst.msk [vmem:[#allocation4 + $0xc0] sm:$0xff] %vm280_vm0, %v5308_v48  ;;  %393 = vst.msk [vmem:[#allocation2 + $0x139] sm:$0xff] %vm280_vm0, %v360_v49 }
  0x64   : > { %394 = vst.msk [vmem:[#allocation2 + $0x141] sm:$0xff] %vm280_vm0, %v361_v50  ;;  %395 = vst.msk [vmem:[#allocation2 + $0x151] sm:$0xff] %vm280_vm0, %v362_v51  ;;  %545 = vrot.lane.b32.xlu1 %v5264_v37, %s4872_s8  ;;  %543 = vrot.lane.b32.xlu0 %v5266_v38, %s4872_s8 }
  0x65   : > { %396 = vst.msk [vmem:[#allocation2 + $0x159] sm:$0xff] %vm280_vm0, %v363_v52  ;;  %397 = vst.msk [vmem:[#allocation2 + $0x169] sm:$0xff] %vm280_vm0, %v364_v53  ;;  %v5548_v53 = vld [vmem:[#allocation2 + $0x70] sm:$0x3] }
  0x66   : > { %455 = vst.msk [vmem:[#allocation4] sm:$0xff] %vm280_vm0, %v5328_v54  ;;  %398 = vst.msk [vmem:[#allocation2 + $0x171] sm:$0xff] %vm280_vm0, %v365_v55 }
  0x67   : > { %399 = vst.msk [vmem:[#allocation2 + $0x181] sm:$0xff] %vm280_vm0, %v366_v56  ;;  %400 = vst.msk [vmem:[#allocation2 + $0x189] sm:$0xff] %vm280_vm0, %v367_v57  ;;  %v5556_v57 = vld [vmem:[#allocation2 + $0x88] sm:$0x3] }
  0x68   : > { %456 = vst.msk [vmem:[#allocation4 + $0x8] sm:$0xff] %vm280_vm0, %v5340_v58  ;;  %549 = vrot.lane.b32.xlu1 %v5278_v40, %s4872_s8  ;;  %547 = vrot.lane.b32.xlu0 %v5268_v39, %s4872_s8 }
  0x6a   : > { %v5350_v60 = vld [vmem:[#allocation2 + $0x138] sm:$0xff] }
  0x6b   : > { %v5348_v59 = vld [vmem:[#allocation2 + $0x140] sm:$0xff]  ;;  %8135 = vst [vmem:[#allocation21_spill] sm:$0xff] %v5350_v60  ;;  %v5352_v61 = vld [vmem:[#allocation2 + $0x150] sm:$0xff]  ;;  %481 = vst.msk [vmem:[#allocation4 + $0xd0] sm:$0xff] %vm280_vm0, %v5350_v60 }
  0x6c   : > { %8134 = vst [vmem:[#allocation20_spill] sm:$0xff] %v5348_v59  ;;  %8136 = vst [vmem:[#allocation22_spill] sm:$0xff] %v5352_v61  ;;  %v5362_v62 = vld [vmem:[#allocation2 + $0x158] sm:$0xff]  ;;  %v5366_v63 = vld [vmem:[#allocation2 + $0x168] sm:$0xff]  ;;  %553 = vrot.lane.b32.xlu1 %v5282_v41, %s4872_s8  ;;  %551 = vrot.lane.b32.xlu0 %v5284_v42, %s4872_s8 }
  0x6d   : > { %482 = vst.msk [vmem:[#allocation4 + $0xd8] sm:$0xff] %vm280_vm0, %v5348_v59  ;;  %8137 = vst [vmem:[#allocation23_spill] sm:$0xff] %v5362_v62  ;;  %v5370_v0 = vld [vmem:[#allocation2 + $0x170] sm:$0xff] }
  0x6e   : > { %483 = vst.msk [vmem:[#allocation4 + $0xe0] sm:$0xff] %vm280_vm0, %v5352_v61  ;;  %8138 = vst [vmem:[#allocation24_spill] sm:$0xff] %v5366_v63  ;;  %v5416_v1 = vld [vmem:[#allocation2 + $0x188] sm:$0xff]  ;;  %v5418_v2 = vld [vmem:[#allocation2 + $0x180] sm:$0xff] }
  0x6f   : > { %484 = vst.msk [vmem:[#allocation4 + $0xe8] sm:$0xff] %vm280_vm0, %v5362_v62  ;;  %8139 = vst [vmem:[#allocation25_spill] sm:$0xff] %v5370_v0 }
  0x70   : > { %485 = vst.msk [vmem:[#allocation4 + $0xf0] sm:$0xff] %vm280_vm0, %v5366_v63  ;;  %486 = vst.msk [vmem:[#allocation4 + $0xf8] sm:$0xff] %vm280_vm0, %v5370_v0  ;;  %557 = vrot.lane.b32.xlu1 %v5292_v43, %s4872_s8  ;;  %555 = vrot.lane.b32.xlu0 %v5294_v44, %s4872_s8 }
  0x74   : > { %561 = vrot.lane.b32.xlu1 %v5302_v46, %s4872_s8  ;;  %559 = vrot.lane.b32.xlu0 %v5296_v45, %s4872_s8 }
  0x78   : > { %565 = vrot.lane.b32.xlu1 %v5306_v47, %s4872_s8  ;;  %563 = vrot.lane.b32.xlu0 %v5308_v48, %s4872_s8 }
  0x7c   : > { %569 = vrot.lane.b32.xlu1 %v5348_v59, %s4872_s8  ;;  %567 = vrot.lane.b32.xlu0 %v5350_v60, %s4872_s8 }
  0x80   : > { %573 = vrot.lane.b32.xlu1 %v5362_v62, %s4872_s8  ;;  %571 = vrot.lane.b32.xlu0 %v5352_v61, %s4872_s8 }
  0x84   : > { %577 = vrot.lane.b32.xlu1 %v5370_v0, %s4872_s8  ;;  %575 = vrot.lane.b32.xlu0 %v5366_v63, %s4872_s8 }
  0x88   : > { %581 = vrot.lane.b32.xlu1 %v5416_v1, %s4872_s8  ;;  %579 = vrot.lane.b32.xlu0 %v5418_v2, %s4872_s8 }
  0x8c   : > { %652 = vrot.lane.b32.xlu1 %v5213_v27, %s4873_s9  ;;  %650 = vrot.lane.b32.xlu0 %v5209_v25, %s4873_s9 }
  0x90   : > { %656 = vrot.lane.b32.xlu1 %v5230_v29, %s4873_s9  ;;  %654 = vrot.lane.b32.xlu0 %v5232_v30, %s4873_s9 }
  0x94   : > { %660 = vrot.lane.b32.xlu1 %v5240_v31, %s4873_s9  ;;  %658 = vrot.lane.b32.xlu0 %v5242_v32, %s4873_s9 }
  0x98   : > { %664 = vrot.lane.b32.xlu1 %v5250_v34, %s4873_s9  ;;  %662 = vrot.lane.b32.xlu0 %v5244_v33, %s4873_s9 }
  0x9c   : > { %668 = vrot.lane.b32.xlu1 %v5254_v35, %s4873_s9  ;;  %666 = vrot.lane.b32.xlu0 %v5256_v36, %s4873_s9 }
  0xa0   : > { %672 = vrot.lane.b32.xlu1 %v5264_v37, %s4873_s9  ;;  %670 = vrot.lane.b32.xlu0 %v5266_v38, %s4873_s9 }
  0xa4   : > { %676 = vrot.lane.b32.xlu1 %v5278_v40, %s4873_s9  ;;  %674 = vrot.lane.b32.xlu0 %v5268_v39, %s4873_s9 }
  0xa8   : > { %680 = vrot.lane.b32.xlu1 %v5282_v41, %s4873_s9  ;;  %678 = vrot.lane.b32.xlu0 %v5284_v42, %s4873_s9 }
  0xac   : > { %684 = vrot.lane.b32.xlu1 %v5292_v43, %s4873_s9  ;;  %682 = vrot.lane.b32.xlu0 %v5294_v44, %s4873_s9 }
  0xb0   : > { %688 = vrot.lane.b32.xlu1 %v5302_v46, %s4873_s9  ;;  %686 = vrot.lane.b32.xlu0 %v5296_v45, %s4873_s9 }
  0xb4   : > { %692 = vrot.lane.b32.xlu1 %v5306_v47, %s4873_s9  ;;  %690 = vrot.lane.b32.xlu0 %v5308_v48, %s4873_s9 }
  0xb8   : > { %696 = vrot.lane.b32.xlu1 %v5348_v59, %s4873_s9  ;;  %694 = vrot.lane.b32.xlu0 %v5350_v60, %s4873_s9 }
  0xbc   : > { %700 = vrot.lane.b32.xlu1 %v5362_v62, %s4873_s9  ;;  %698 = vrot.lane.b32.xlu0 %v5352_v61, %s4873_s9 }
  0xbe   : > { %v524_v3 = vpop.permute.xlu1 %523  ;;  %v520_v4 = vpop.permute.xlu0 %519 }
  0xbf   : > { %618 = vst.msk [vmem:[#allocation4 + $0x10] sm:$0xff] %vm615_vm2, %v524_v3  ;;  %616 = vst.msk [vmem:[#allocation4] sm:$0xff] %vm615_vm2, %v520_v4 }
  0xc0   : > { %704 = vrot.lane.b32.xlu1 %v5370_v0, %s4873_s9  ;;  %702 = vrot.lane.b32.xlu0 %v5366_v63, %s4873_s9 }
  0xc2   : > { %v526_v5 = vpop.permute.xlu1 %525  ;;  %v522_v6 = vpop.permute.xlu0 %521 }
  0xc3   : > { %619 = vst.msk [vmem:[#allocation4 + $0x18] sm:$0xff] %vm615_vm2, %v526_v5  ;;  %617 = vst.msk [vmem:[#allocation4 + $0x8] sm:$0xff] %vm615_vm2, %v522_v6 }
  0xc4   : > { %708 = vrot.lane.b32.xlu1 %v5416_v1, %s4873_s9  ;;  %706 = vrot.lane.b32.xlu0 %v5418_v2, %s4873_s9 }
  0xc6   : > { %v530_v9 = vpop.permute.xlu1 %529  ;;  %v528_v10 = vpop.permute.xlu0 %527 }
  0xc7   : > { %621 = vst.msk [vmem:[#allocation4 + $0x28] sm:$0xff] %vm615_vm2, %v530_v9  ;;  %620 = vst.msk [vmem:[#allocation4 + $0x20] sm:$0xff] %vm615_vm2, %v528_v10  ;;  %v5570_v9 = vld [vmem:[#allocation2 + $0xa0] sm:$0x3] }
  0xc8   : > { %712 = vrot.lane.b32.xlu1 %v5488_v7, %s4873_s9  ;;  %710 = vrot.lane.b32.xlu0 %v5490_v8, %s4873_s9 }
  0xca   : > { %v534_v11 = vpop.permute.xlu1 %533  ;;  %v532_v12 = vpop.permute.xlu0 %531 }
  0xcb   : > { %623 = vst.msk [vmem:[#allocation4 + $0x38] sm:$0xff] %vm615_vm2, %v534_v11  ;;  %622 = vst.msk [vmem:[#allocation4 + $0x30] sm:$0xff] %vm615_vm2, %v532_v12  ;;  %v5578_v12 = vld [vmem:[#allocation2 + $0xb8] sm:$0x3] }
  0xcc   : > { %799 = vrot.lane.b32.xlu1 %v5340_v58, %s4874_s10  ;;  %797 = vrot.lane.b32.xlu0 %v5328_v54, %s4874_s10 }
  0xce   : > { %v538_v14 = vpop.permute.xlu1 %537  ;;  %v536_v15 = vpop.permute.xlu0 %535 }
  0xcf   : > { %625 = vst.msk [vmem:[#allocation4 + $0x48] sm:$0xff] %vm615_vm2, %v538_v14  ;;  %624 = vst.msk [vmem:[#allocation4 + $0x40] sm:$0xff] %vm615_vm2, %v536_v15 }
  0xd0   : > { %803 = vrot.lane.b32.xlu1 %v5211_v26, %s4874_s10  ;;  %801 = vrot.lane.b32.xlu0 %v5504_v13, %s4874_s10 }
  0xd2   : > { %v542_v17 = vpop.permute.xlu1 %541  ;;  %v540_v18 = vpop.permute.xlu0 %539 }
  0xd3   : > { %627 = vst.msk [vmem:[#allocation4 + $0x58] sm:$0xff] %vm615_vm2, %v542_v17  ;;  %626 = vst.msk [vmem:[#allocation4 + $0x50] sm:$0xff] %vm615_vm2, %v540_v18 }
  0xd4   : > { %807 = vrot.lane.b32.xlu1 %v5512_v16, %s4874_s10  ;;  %805 = vrot.lane.b32.xlu0 %v5228_v28, %s4874_s10 }
  0xd6   : > { %v546_v19 = vpop.permute.xlu1 %545  ;;  %v544_v20 = vpop.permute.xlu0 %543 }
  0xd7   : > { %629 = vst.msk [vmem:[#allocation4 + $0x68] sm:$0xff] %vm615_vm2, %v546_v19  ;;  %628 = vst.msk [vmem:[#allocation4 + $0x60] sm:$0xff] %vm615_vm2, %v544_v20  ;;  %v5592_v19 = vld [vmem:[#allocation2 + $0xd0] sm:$0x3] }
  0xd8   : > { %811 = vrot.lane.b32.xlu1 %v5213_v27, %s4874_s10  ;;  %809 = vrot.lane.b32.xlu0 %v5209_v25, %s4874_s10 }
  0xda   : > { %v550_v22 = vpop.permute.xlu1 %549  ;;  %v548_v23 = vpop.permute.xlu0 %547 }
  0xdb   : > { %631 = vst.msk [vmem:[#allocation4 + $0x78] sm:$0xff] %vm615_vm2, %v550_v22  ;;  %630 = vst.msk [vmem:[#allocation4 + $0x70] sm:$0xff] %vm615_vm2, %v548_v23  ;;  %v5600_v23 = vld [vmem:[#allocation2 + $0xe8] sm:$0x3] }
  0xdc   : > { %815 = vrot.lane.b32.xlu1 %v5232_v30, %s4874_s10  ;;  %813 = vrot.lane.b32.xlu0 %v5526_v21, %s4874_s10 }
  0xde   : > { %v554_v49 = vpop.permute.xlu1 %553  ;;  %v552_v50 = vpop.permute.xlu0 %551 }
  0xdf   : > { %633 = vst.msk [vmem:[#allocation4 + $0x88] sm:$0xff] %vm615_vm2, %v554_v49  ;;  %632 = vst.msk [vmem:[#allocation4 + $0x80] sm:$0xff] %vm615_vm2, %v552_v50 }
  0xe0   : > { %819 = vrot.lane.b32.xlu1 %v5534_v24, %s4874_s10  ;;  %817 = vrot.lane.b32.xlu0 %v5230_v29, %s4874_s10 }
  0xe2   : > { %v558_v51 = vpop.permute.xlu1 %557  ;;  %v556_v52 = vpop.permute.xlu0 %555 }
  0xe3   : > { %635 = vst.msk [vmem:[#allocation4 + $0x98] sm:$0xff] %vm615_vm2, %v558_v51  ;;  %634 = vst.msk [vmem:[#allocation4 + $0x90] sm:$0xff] %vm615_vm2, %v556_v52 }
  0xe4   : > { %823 = vrot.lane.b32.xlu1 %v5240_v31, %s4874_s10  ;;  %821 = vrot.lane.b32.xlu0 %v5242_v32, %s4874_s10 }
  0xe6   : > { %v562_v55 = vpop.permute.xlu1 %561  ;;  %v560_v56 = vpop.permute.xlu0 %559 }
  0xe7   : > { %637 = vst.msk [vmem:[#allocation4 + $0xa8] sm:$0xff] %vm615_vm2, %v562_v55  ;;  %636 = vst.msk [vmem:[#allocation4 + $0xa0] sm:$0xff] %vm615_vm2, %v560_v56  ;;  %v5614_v55 = vld [vmem:[#allocation2 + $0x100] sm:$0x3] }
  0xe8   : > { %827 = vrot.lane.b32.xlu1 %v5244_v33, %s4874_s10  ;;  %825 = vrot.lane.b32.xlu0 %v5548_v53, %s4874_s10 }
  0xea   : > { %v566_v3 = vpop.permute.xlu1 %565  ;;  %v564_v4 = vpop.permute.xlu0 %563 }
  0xeb   : > { %639 = vst.msk [vmem:[#allocation4 + $0xb8] sm:$0xff] %vm615_vm2, %v566_v3  ;;  %638 = vst.msk [vmem:[#allocation4 + $0xb0] sm:$0xff] %vm615_vm2, %v564_v4  ;;  %v5622_v4 = vld [vmem:[#allocation2 + $0x118] sm:$0x3] }
  0xec   : > { %831 = vrot.lane.b32.xlu1 %v5556_v57, %s4874_s10  ;;  %829 = vrot.lane.b32.xlu0 %v5250_v34, %s4874_s10 }
  0xee   : > { %v570_v5 = vpop.permute.xlu1 %569  ;;  %v568_v6 = vpop.permute.xlu0 %567 }
  0xef   : > { %641 = vst.msk [vmem:[#allocation4 + $0xc8] sm:$0xff] %vm615_vm2, %v570_v5  ;;  %640 = vst.msk [vmem:[#allocation4 + $0xc0] sm:$0xff] %vm615_vm2, %v568_v6 }
  0xf0   : > { %835 = vrot.lane.b32.xlu1 %v5254_v35, %s4874_s10  ;;  %833 = vrot.lane.b32.xlu0 %v5256_v36, %s4874_s10 }
  0xf2   : > { %v574_v10 = vpop.permute.xlu1 %573  ;;  %v572_v11 = vpop.permute.xlu0 %571 }
  0xf3   : > { %643 = vst.msk [vmem:[#allocation4 + $0xd8] sm:$0xff] %vm615_vm2, %v574_v10  ;;  %642 = vst.msk [vmem:[#allocation4 + $0xd0] sm:$0xff] %vm615_vm2, %v572_v11 }
  0xf4   : > { %839 = vrot.lane.b32.xlu1 %v5266_v38, %s4874_s10  ;;  %837 = vrot.lane.b32.xlu0 %v5570_v9, %s4874_s10 }
  0xf6   : > { %v578_v14 = vpop.permute.xlu1 %577  ;;  %v576_v15 = vpop.permute.xlu0 %575 }
  0xf7   : > { %645 = vst.msk [vmem:[#allocation4 + $0xe8] sm:$0xff] %vm615_vm2, %v578_v14  ;;  %644 = vst.msk [vmem:[#allocation4 + $0xe0] sm:$0xff] %vm615_vm2, %v576_v15  ;;  %v5636_v14 = vld [vmem:[#allocation2 + $0x130] sm:$0x3] }
  0xf8   : > { %843 = vrot.lane.b32.xlu1 %v5578_v12, %s4874_s10  ;;  %841 = vrot.lane.b32.xlu0 %v5264_v37, %s4874_s10 }
  0xfa   : > { %v582_v17 = vpop.permute.xlu1 %581  ;;  %v580_v18 = vpop.permute.xlu0 %579 }
  0xfb   : > { %647 = vst.msk [vmem:[#allocation4 + $0xf8] sm:$0xff] %vm615_vm2, %v582_v17  ;;  %646 = vst.msk [vmem:[#allocation4 + $0xf0] sm:$0xff] %vm615_vm2, %v580_v18  ;;  %v5644_v18 = vld [vmem:[#allocation2 + $0x148] sm:$0x3] }
  0xfc   : > { %847 = vrot.lane.b32.xlu1 %v5278_v40, %s4874_s10  ;;  %845 = vrot.lane.b32.xlu0 %v5268_v39, %s4874_s10 }
  0xfe   : > { %v653_v20 = vpop.permute.xlu1 %652  ;;  %v651_v22 = vpop.permute.xlu0 %650 }
  0xff   : > { %748 = vst.msk [vmem:[#allocation4 + $0x8] sm:$0xff] %vm746_vm3, %v653_v20  ;;  %747 = vst.msk [vmem:[#allocation4] sm:$0xff] %vm746_vm3, %v651_v22 }
 0x100   : > { %851 = vrot.lane.b32.xlu1 %v5284_v42, %s4874_s10  ;;  %849 = vrot.lane.b32.xlu0 %v5592_v19, %s4874_s10 }
 0x102   : > { %v657_v49 = vpop.permute.xlu1 %656  ;;  %v655_v50 = vpop.permute.xlu0 %654 }
 0x103   : > { %750 = vst.msk [vmem:[#allocation4 + $0x18] sm:$0xff] %vm746_vm3, %v657_v49  ;;  %749 = vst.msk [vmem:[#allocation4 + $0x10] sm:$0xff] %vm746_vm3, %v655_v50 }
 0x104   : > { %855 = vrot.lane.b32.xlu1 %v5600_v23, %s4874_s10  ;;  %853 = vrot.lane.b32.xlu0 %v5282_v41, %s4874_s10 }
 0x106   : > { %v661_v51 = vpop.permute.xlu1 %660  ;;  %v659_v52 = vpop.permute.xlu0 %658 }
 0x107   : > { %752 = vst.msk [vmem:[#allocation4 + $0x28] sm:$0xff] %vm746_vm3, %v661_v51  ;;  %751 = vst.msk [vmem:[#allocation4 + $0x20] sm:$0xff] %vm746_vm3, %v659_v52  ;;  %v5658_v51 = vld [vmem:[#allocation2 + $0x160] sm:$0x3] }
 0x108   : > { %859 = vrot.lane.b32.xlu1 %v5292_v43, %s4874_s10  ;;  %857 = vrot.lane.b32.xlu0 %v5294_v44, %s4874_s10 }
 0x10a   : > { %v665_v56 = vpop.permute.xlu1 %664  ;;  %v663_v3 = vpop.permute.xlu0 %662 }
 0x10b   : > { %754 = vst.msk [vmem:[#allocation4 + $0x38] sm:$0xff] %vm746_vm3, %v665_v56  ;;  %753 = vst.msk [vmem:[#allocation4 + $0x30] sm:$0xff] %vm746_vm3, %v663_v3  ;;  %v5666_v3 = vld [vmem:[#allocation2 + $0x178] sm:$0x3] }
 0x10c   : > { %863 = vrot.lane.b32.xlu1 %v5296_v45, %s4874_s10  ;;  %861 = vrot.lane.b32.xlu0 %v5614_v55, %s4874_s10 }
 0x10e   : > { %v669_v5 = vpop.permute.xlu1 %668  ;;  %v667_v6 = vpop.permute.xlu0 %666 }
 0x10f   : > { %756 = vst.msk [vmem:[#allocation4 + $0x48] sm:$0xff] %vm746_vm3, %v669_v5  ;;  %755 = vst.msk [vmem:[#allocation4 + $0x40] sm:$0xff] %vm746_vm3, %v667_v6 }
 0x110   : > { %867 = vrot.lane.b32.xlu1 %v5622_v4, %s4874_s10  ;;  %865 = vrot.lane.b32.xlu0 %v5302_v46, %s4874_s10 }
 0x112   : > { %v673_v10 = vpop.permute.xlu1 %672  ;;  %v671_v11 = vpop.permute.xlu0 %670 }
 0x113   : > { %758 = vst.msk [vmem:[#allocation4 + $0x58] sm:$0xff] %vm746_vm3, %v673_v10  ;;  %757 = vst.msk [vmem:[#allocation4 + $0x50] sm:$0xff] %vm746_vm3, %v671_v11 }
 0x114   : > { %871 = vrot.lane.b32.xlu1 %v5306_v47, %s4874_s10  ;;  %869 = vrot.lane.b32.xlu0 %v5308_v48, %s4874_s10 }
 0x116   : > { %v677_v15 = vpop.permute.xlu1 %676  ;;  %v675_v17 = vpop.permute.xlu0 %674 }
 0x117   : > { %760 = vst.msk [vmem:[#allocation4 + $0x68] sm:$0xff] %vm746_vm3, %v677_v15  ;;  %759 = vst.msk [vmem:[#allocation4 + $0x60] sm:$0xff] %vm746_vm3, %v675_v17 }
 0x118   : > { %875 = vrot.lane.b32.xlu1 %v5350_v60, %s4874_s10  ;;  %873 = vrot.lane.b32.xlu0 %v5636_v14, %s4874_s10 }
 0x11a   : > { %v681_v20 = vpop.permute.xlu1 %680  ;;  %v679_v22 = vpop.permute.xlu0 %678 }
 0x11b   : > { %762 = vst.msk [vmem:[#allocation4 + $0x78] sm:$0xff] %vm746_vm3, %v681_v20  ;;  %761 = vst.msk [vmem:[#allocation4 + $0x70] sm:$0xff] %vm746_vm3, %v679_v22 }
 0x11c   : > { %879 = vrot.lane.b32.xlu1 %v5644_v18, %s4874_s10  ;;  %877 = vrot.lane.b32.xlu0 %v5348_v59, %s4874_s10 }
 0x11e   : > { %v685_v49 = vpop.permute.xlu1 %684  ;;  %v683_v50 = vpop.permute.xlu0 %682 }
 0x11f   : > { %764 = vst.msk [vmem:[#allocation4 + $0x88] sm:$0xff] %vm746_vm3, %v685_v49  ;;  %763 = vst.msk [vmem:[#allocation4 + $0x80] sm:$0xff] %vm746_vm3, %v683_v50 }
 0x120   : > { %883 = vrot.lane.b32.xlu1 %v5362_v62, %s4874_s10  ;;  %881 = vrot.lane.b32.xlu0 %v5352_v61, %s4874_s10 }
 0x122   : > { %v689_v52 = vpop.permute.xlu1 %688  ;;  %v687_v56 = vpop.permute.xlu0 %686 }
 0x123   : > { %766 = vst.msk [vmem:[#allocation4 + $0x98] sm:$0xff] %vm746_vm3, %v689_v52  ;;  %765 = vst.msk [vmem:[#allocation4 + $0x90] sm:$0xff] %vm746_vm3, %v687_v56 }
 0x124   : > { %887 = vrot.lane.b32.xlu1 %v5366_v63, %s4874_s10  ;;  %885 = vrot.lane.b32.xlu0 %v5658_v51, %s4874_s10 }
 0x126   : > { %v693_v5 = vpop.permute.xlu1 %692  ;;  %v691_v6 = vpop.permute.xlu0 %690 }
 0x127   : > { %768 = vst.msk [vmem:[#allocation4 + $0xa8] sm:$0xff] %vm746_vm3, %v693_v5  ;;  %767 = vst.msk [vmem:[#allocation4 + $0xa0] sm:$0xff] %vm746_vm3, %v691_v6 }
 0x128   : > { %891 = vrot.lane.b32.xlu1 %v5666_v3, %s4874_s10  ;;  %889 = vrot.lane.b32.xlu0 %v5370_v0, %s4874_s10 }
 0x12a   : > { %v697_v10 = vpop.permute.xlu1 %696  ;;  %v695_v11 = vpop.permute.xlu0 %694 }
 0x12b   : > { %770 = vst.msk [vmem:[#allocation4 + $0xb8] sm:$0xff] %vm746_vm3, %v697_v10  ;;  %769 = vst.msk [vmem:[#allocation4 + $0xb0] sm:$0xff] %vm746_vm3, %v695_v11 }
 0x12c   : > { %995 = vrot.lane.b32.xlu1 %v5228_v28, %s4875_s11  ;;  %993 = vrot.lane.b32.xlu0 %v5211_v26, %s4875_s11 }
 0x12e   : > { %v701_v15 = vpop.permute.xlu1 %700  ;;  %v699_v17 = vpop.permute.xlu0 %698 }
 0x12f   : > { %772 = vst.msk [vmem:[#allocation4 + $0xc8] sm:$0xff] %vm746_vm3, %v701_v15  ;;  %771 = vst.msk [vmem:[#allocation4 + $0xc0] sm:$0xff] %vm746_vm3, %v699_v17 }
 0x130   : > { %999 = vrot.lane.b32.xlu1 %v5209_v25, %s4875_s11  ;;  %997 = vrot.lane.b32.xlu0 %v5512_v16, %s4875_s11 }
 0x132   : > { %v705_v20 = vpop.permute.xlu1 %704  ;;  %v703_v22 = vpop.permute.xlu0 %702 }
 0x133   : > { %774 = vst.msk [vmem:[#allocation4 + $0xd8] sm:$0xff] %vm746_vm3, %v705_v20  ;;  %773 = vst.msk [vmem:[#allocation4 + $0xd0] sm:$0xff] %vm746_vm3, %v703_v22 }
 0x134   : > { %1003 = vrot.lane.b32.xlu1 %v5526_v21, %s4875_s11  ;;  %1001 = vrot.lane.b32.xlu0 %v5213_v27, %s4875_s11 }
 0x136   : > { %v709_v49 = vpop.permute.xlu1 %708  ;;  %v707_v50 = vpop.permute.xlu0 %706 }
 0x137   : > { %776 = vst.msk [vmem:[#allocation4 + $0xe8] sm:$0xff] %vm746_vm3, %v709_v49  ;;  %775 = vst.msk [vmem:[#allocation4 + $0xe0] sm:$0xff] %vm746_vm3, %v707_v50 }
 0x138   : > { %1007 = vrot.lane.b32.xlu1 %v5230_v29, %s4875_s11  ;;  %1005 = vrot.lane.b32.xlu0 %v5232_v30, %s4875_s11 }
 0x13a   : > { %v713_v52 = vpop.permute.xlu1 %712  ;;  %v711_v56 = vpop.permute.xlu0 %710 }
 0x13b   : > { %778 = vst.msk [vmem:[#allocation4 + $0xf8] sm:$0xff] %vm746_vm3, %v713_v52  ;;  %777 = vst.msk [vmem:[#allocation4 + $0xf0] sm:$0xff] %vm746_vm3, %v711_v56 }
 0x13c   : > { %1011 = vrot.lane.b32.xlu1 %v5242_v32, %s4875_s11  ;;  %1009 = vrot.lane.b32.xlu0 %v5534_v24, %s4875_s11 }
 0x13e   : > { %v800_v5 = vpop.permute.xlu1 %799  ;;  %v798_v6 = vpop.permute.xlu0 %797 }
 0x13f   : > { %944 = vst.msk [vmem:[#allocation4 + $0x7] sm:$0xff] %vm943_vm4, %v800_v5 }
 0x140   : > { %942 = vst.msk [vmem:[#allocation4 - $0x1] sm:$0xfe] %vm941_vm5, %v798_v6  ;;  %1015 = vrot.lane.b32.xlu1 %v5548_v53, %s4875_s11  ;;  %1013 = vrot.lane.b32.xlu0 %v5240_v31, %s4875_s11 }
 0x142   : > { %v804_v10 = vpop.permute.xlu1 %803  ;;  %v802_v11 = vpop.permute.xlu0 %801 }
 0x143   : > { %947 = vst.msk [vmem:[#allocation4 + $0xf] sm:$0xfe] %vm941_vm5, %v804_v10 }
 0x144   : > { %946 = vst.msk [vmem:[#allocation4 + $0xf] sm:$0x1] %vm945_vm6, %v802_v11  ;;  %1019 = vrot.lane.b32.xlu1 %v5250_v34, %s4875_s11  ;;  %1017 = vrot.lane.b32.xlu0 %v5244_v33, %s4875_s11 }
 0x146   : > { %v808_v15 = vpop.permute.xlu1 %807  ;;  %v806_v17 = vpop.permute.xlu0 %805 }
 0x147   : > { %949 = vst.msk [vmem:[#allocation4 + $0x1f] sm:$0x1] %vm945_vm6, %v808_v15 }
 0x148   : > { %948 = vst.msk [vmem:[#allocation4 + $0x17] sm:$0xff] %vm943_vm4, %v806_v17  ;;  %1023 = vrot.lane.b32.xlu1 %v5256_v36, %s4875_s11  ;;  %1021 = vrot.lane.b32.xlu0 %v5556_v57, %s4875_s11 }
 0x14a   : > { %v812_v20 = vpop.permute.xlu1 %811  ;;  %v810_v22 = vpop.permute.xlu0 %809 }
 0x14b   : > { %951 = vst.msk [vmem:[#allocation4 + $0x27] sm:$0xff] %vm943_vm4, %v812_v20 }
 0x14c   : > { %950 = vst.msk [vmem:[#allocation4 + $0x1f] sm:$0xfe] %vm941_vm5, %v810_v22  ;;  %1027 = vrot.lane.b32.xlu1 %v5570_v9, %s4875_s11  ;;  %1025 = vrot.lane.b32.xlu0 %v5254_v35, %s4875_s11 }
 0x14e   : > { %v816_v49 = vpop.permute.xlu1 %815  ;;  %v814_v50 = vpop.permute.xlu0 %813 }
 0x14f   : > { %953 = vst.msk [vmem:[#allocation4 + $0x2f] sm:$0xfe] %vm941_vm5, %v816_v49 }
 0x150   : > { %952 = vst.msk [vmem:[#allocation4 + $0x2f] sm:$0x1] %vm945_vm6, %v814_v50  ;;  %1031 = vrot.lane.b32.xlu1 %v5264_v37, %s4875_s11  ;;  %1029 = vrot.lane.b32.xlu0 %v5266_v38, %s4875_s11 }
 0x152   : > { %v820_v52 = vpop.permute.xlu1 %819  ;;  %v818_v56 = vpop.permute.xlu0 %817 }
 0x153   : > { %955 = vst.msk [vmem:[#allocation4 + $0x3f] sm:$0x1] %vm945_vm6, %v820_v52 }
 0x154   : > { %954 = vst.msk [vmem:[#allocation4 + $0x37] sm:$0xff] %vm943_vm4, %v818_v56  ;;  %1035 = vrot.lane.b32.xlu1 %v5268_v39, %s4875_s11  ;;  %1033 = vrot.lane.b32.xlu0 %v5578_v12, %s4875_s11 }
 0x156   : > { %v824_v5 = vpop.permute.xlu1 %823  ;;  %v822_v6 = vpop.permute.xlu0 %821 }
 0x157   : > { %957 = vst.msk [vmem:[#allocation4 + $0x47] sm:$0xff] %vm943_vm4, %v824_v5 }
 0x158   : > { %956 = vst.msk [vmem:[#allocation4 + $0x3f] sm:$0xfe] %vm941_vm5, %v822_v6  ;;  %1039 = vrot.lane.b32.xlu1 %v5592_v19, %s4875_s11  ;;  %1037 = vrot.lane.b32.xlu0 %v5278_v40, %s4875_s11 }
 0x15a   : > { %v828_v10 = vpop.permute.xlu1 %827  ;;  %v826_v11 = vpop.permute.xlu0 %825 }
 0x15b   : > { %959 = vst.msk [vmem:[#allocation4 + $0x4f] sm:$0xfe] %vm941_vm5, %v828_v10 }
 0x15c   : > { %958 = vst.msk [vmem:[#allocation4 + $0x4f] sm:$0x1] %vm945_vm6, %v826_v11  ;;  %1043 = vrot.lane.b32.xlu1 %v5282_v41, %s4875_s11  ;;  %1041 = vrot.lane.b32.xlu0 %v5284_v42, %s4875_s11 }
 0x15e   : > { %v832_v15 = vpop.permute.xlu1 %831  ;;  %v830_v17 = vpop.permute.xlu0 %829 }
 0x15f   : > { %961 = vst.msk [vmem:[#allocation4 + $0x5f] sm:$0x1] %vm945_vm6, %v832_v15 }
 0x160   : > { %960 = vst.msk [vmem:[#allocation4 + $0x57] sm:$0xff] %vm943_vm4, %v830_v17  ;;  %1047 = vrot.lane.b32.xlu1 %v5294_v44, %s4875_s11  ;;  %1045 = vrot.lane.b32.xlu0 %v5600_v23, %s4875_s11 }
 0x162   : > { %v836_v20 = vpop.permute.xlu1 %835  ;;  %v834_v22 = vpop.permute.xlu0 %833 }
 0x163   : > { %963 = vst.msk [vmem:[#allocation4 + $0x67] sm:$0xff] %vm943_vm4, %v836_v20 }
 0x164   : > { %962 = vst.msk [vmem:[#allocation4 + $0x5f] sm:$0xfe] %vm941_vm5, %v834_v22  ;;  %1051 = vrot.lane.b32.xlu1 %v5614_v55, %s4875_s11  ;;  %1049 = vrot.lane.b32.xlu0 %v5292_v43, %s4875_s11 }
 0x166   : > { %v840_v49 = vpop.permute.xlu1 %839  ;;  %v838_v50 = vpop.permute.xlu0 %837 }
 0x167   : > { %965 = vst.msk [vmem:[#allocation4 + $0x6f] sm:$0xfe] %vm941_vm5, %v840_v49 }
 0x168   : > { %964 = vst.msk [vmem:[#allocation4 + $0x6f] sm:$0x1] %vm945_vm6, %v838_v50  ;;  %1055 = vrot.lane.b32.xlu1 %v5302_v46, %s4875_s11  ;;  %1053 = vrot.lane.b32.xlu0 %v5296_v45, %s4875_s11 }
 0x16a   : > { %v844_v52 = vpop.permute.xlu1 %843  ;;  %v842_v56 = vpop.permute.xlu0 %841 }
 0x16b   : > { %967 = vst.msk [vmem:[#allocation4 + $0x7f] sm:$0x1] %vm945_vm6, %v844_v52 }
 0x16c   : > { %966 = vst.msk [vmem:[#allocation4 + $0x77] sm:$0xff] %vm943_vm4, %v842_v56  ;;  %1059 = vrot.lane.b32.xlu1 %v5308_v48, %s4875_s11  ;;  %1057 = vrot.lane.b32.xlu0 %v5622_v4, %s4875_s11 }
 0x16e   : > { %v848_v5 = vpop.permute.xlu1 %847  ;;  %v846_v6 = vpop.permute.xlu0 %845 }
 0x16f   : > { %969 = vst.msk [vmem:[#allocation4 + $0x87] sm:$0xff] %vm943_vm4, %v848_v5  ;;  %v5812_v5 = vld [vmem:[#allocation2 + $0x190] sm:$0x3] }
 0x170   : > { %968 = vst.msk [vmem:[#allocation4 + $0x7f] sm:$0xfe] %vm941_vm5, %v846_v6  ;;  %1063 = vrot.lane.b32.xlu1 %v5636_v14, %s4875_s11  ;;  %1061 = vrot.lane.b32.xlu0 %v5306_v47, %s4875_s11 }
 0x172   : > { %v852_v10 = vpop.permute.xlu1 %851  ;;  %v850_v11 = vpop.permute.xlu0 %849 }
 0x173   : > { %971 = vst.msk [vmem:[#allocation4 + $0x8f] sm:$0xfe] %vm941_vm5, %v852_v10 }
 0x174   : > { %970 = vst.msk [vmem:[#allocation4 + $0x8f] sm:$0x1] %vm945_vm6, %v850_v11  ;;  %1067 = vrot.lane.b32.xlu1 %v5348_v59, %s4875_s11  ;;  %1065 = vrot.lane.b32.xlu0 %v5350_v60, %s4875_s11 }
 0x176   : > { %v856_v15 = vpop.permute.xlu1 %855  ;;  %v854_v17 = vpop.permute.xlu0 %853 }
 0x177   : > { %973 = vst.msk [vmem:[#allocation4 + $0x9f] sm:$0x1] %vm945_vm6, %v856_v15 }
 0x178   : > { %972 = vst.msk [vmem:[#allocation4 + $0x97] sm:$0xff] %vm943_vm4, %v854_v17  ;;  %1071 = vrot.lane.b32.xlu1 %v5352_v61, %s4875_s11  ;;  %1069 = vrot.lane.b32.xlu0 %v5644_v18, %s4875_s11 }
 0x17a   : > { %v860_v20 = vpop.permute.xlu1 %859  ;;  %v858_v22 = vpop.permute.xlu0 %857 }
 0x17b   : > { %975 = vst.msk [vmem:[#allocation4 + $0xa7] sm:$0xff] %vm943_vm4, %v860_v20 }
 0x17c   : > { %974 = vst.msk [vmem:[#allocation4 + $0x9f] sm:$0xfe] %vm941_vm5, %v858_v22  ;;  %1075 = vrot.lane.b32.xlu1 %v5658_v51, %s4875_s11  ;;  %1073 = vrot.lane.b32.xlu0 %v5362_v62, %s4875_s11 }
 0x17e   : > { %v864_v49 = vpop.permute.xlu1 %863  ;;  %v862_v50 = vpop.permute.xlu0 %861 }
 0x17f   : > { %977 = vst.msk [vmem:[#allocation4 + $0xaf] sm:$0xfe] %vm941_vm5, %v864_v49 }
 0x180   : > { %976 = vst.msk [vmem:[#allocation4 + $0xaf] sm:$0x1] %vm945_vm6, %v862_v50  ;;  %1079 = vrot.lane.b32.xlu1 %v5370_v0, %s4875_s11  ;;  %1077 = vrot.lane.b32.xlu0 %v5366_v63, %s4875_s11 }
 0x182   : > { %v868_v52 = vpop.permute.xlu1 %867  ;;  %v866_v56 = vpop.permute.xlu0 %865 }
 0x183   : > { %979 = vst.msk [vmem:[#allocation4 + $0xbf] sm:$0x1] %vm945_vm6, %v868_v52 }
 0x184   : > { %978 = vst.msk [vmem:[#allocation4 + $0xb7] sm:$0xff] %vm943_vm4, %v866_v56  ;;  %1083 = vrot.lane.b32.xlu1 %v5418_v2, %s4875_s11  ;;  %1081 = vrot.lane.b32.xlu0 %v5666_v3, %s4875_s11 }
 0x186   : > { %v872_v6 = vpop.permute.xlu1 %871  ;;  %v870_v10 = vpop.permute.xlu0 %869 }
 0x187   : > { %981 = vst.msk [vmem:[#allocation4 + $0xc7] sm:$0xff] %vm943_vm4, %v872_v6 }
 0x188   : > { %980 = vst.msk [vmem:[#allocation4 + $0xbf] sm:$0xfe] %vm941_vm5, %v870_v10  ;;  %1087 = vrot.lane.b32.xlu1 %v5812_v5, %s4875_s11  ;;  %1085 = vrot.lane.b32.xlu0 %v5416_v1, %s4875_s11 }
 0x18a   : > { %v876_v11 = vpop.permute.xlu1 %875  ;;  %v874_v15 = vpop.permute.xlu0 %873 }
 0x18b   : > { %983 = vst.msk [vmem:[#allocation4 + $0xcf] sm:$0xfe] %vm941_vm5, %v876_v11 }
 0x18c   : > { %982 = vst.msk [vmem:[#allocation4 + $0xcf] sm:$0x1] %vm945_vm6, %v874_v15  ;;  %1191 = vrot.lane.b32.xlu1 %v5213_v27, %s4876_s12  ;;  %1189 = vrot.lane.b32.xlu0 %v5209_v25, %s4876_s12 }
 0x18e   : > { %v880_v17 = vpop.permute.xlu1 %879  ;;  %v878_v20 = vpop.permute.xlu0 %877 }
 0x18f   : > { %985 = vst.msk [vmem:[#allocation4 + $0xdf] sm:$0x1] %vm945_vm6, %v880_v17 }
 0x190   : > { %984 = vst.msk [vmem:[#allocation4 + $0xd7] sm:$0xff] %vm943_vm4, %v878_v20  ;;  %1195 = vrot.lane.b32.xlu1 %v5232_v30, %s4876_s12  ;;  %1193 = vrot.lane.b32.xlu0 %v5526_v21, %s4876_s12 }
 0x192   : > { %v884_v22 = vpop.permute.xlu1 %883  ;;  %v882_v49 = vpop.permute.xlu0 %881 }
 0x193   : > { %987 = vst.msk [vmem:[#allocation4 + $0xe7] sm:$0xff] %vm943_vm4, %v884_v22 }
 0x194   : > { %986 = vst.msk [vmem:[#allocation4 + $0xdf] sm:$0xfe] %vm941_vm5, %v882_v49  ;;  %1199 = vrot.lane.b32.xlu1 %v5534_v24, %s4876_s12  ;;  %1197 = vrot.lane.b32.xlu0 %v5230_v29, %s4876_s12 }
 0x196   : > { %v888_v50 = vpop.permute.xlu1 %887  ;;  %v886_v52 = vpop.permute.xlu0 %885 }
 0x197   : > { %989 = vst.msk [vmem:[#allocation4 + $0xef] sm:$0xfe] %vm941_vm5, %v888_v50 }
 0x198   : > { %988 = vst.msk [vmem:[#allocation4 + $0xef] sm:$0x1] %vm945_vm6, %v886_v52  ;;  %1203 = vrot.lane.b32.xlu1 %v5240_v31, %s4876_s12  ;;  %1201 = vrot.lane.b32.xlu0 %v5242_v32, %s4876_s12 }
 0x19a   : > { %v892_v56 = vpop.permute.xlu1 %891  ;;  %v890_v6 = vpop.permute.xlu0 %889 }
 0x19b   : > { %991 = vst.msk [vmem:[#allocation4 + $0xff] sm:$0x1] %vm945_vm6, %v892_v56 }
 0x19c   : > { %990 = vst.msk [vmem:[#allocation4 + $0xf7] sm:$0xff] %vm943_vm4, %v890_v6  ;;  %1207 = vrot.lane.b32.xlu1 %v5244_v33, %s4876_s12  ;;  %1205 = vrot.lane.b32.xlu0 %v5548_v53, %s4876_s12 }
 0x19e   : > { %v996_v10 = vpop.permute.xlu1 %995  ;;  %v994_v11 = vpop.permute.xlu0 %993 }
 0x19f   : > { %1140 = vst.msk [vmem:[#allocation4 + $0x7] sm:$0xff] %vm1139_vm7, %v996_v10 }
 0x1a0   : > { %1138 = vst.msk [vmem:[#allocation4 - $0x1] sm:$0xfe] %vm1137_vm8, %v994_v11  ;;  %1211 = vrot.lane.b32.xlu1 %v5556_v57, %s4876_s12  ;;  %1209 = vrot.lane.b32.xlu0 %v5250_v34, %s4876_s12 }
 0x1a2   : > { %v1000_v15 = vpop.permute.xlu1 %999  ;;  %v998_v17 = vpop.permute.xlu0 %997 }
 0x1a3   : > { %1143 = vst.msk [vmem:[#allocation4 + $0xf] sm:$0xfe] %vm1137_vm8, %v1000_v15 }
 0x1a4   : > { %1142 = vst.msk [vmem:[#allocation4 + $0xf] sm:$0x1] %vm1141_vm9, %v998_v17  ;;  %1215 = vrot.lane.b32.xlu1 %v5254_v35, %s4876_s12  ;;  %1213 = vrot.lane.b32.xlu0 %v5256_v36, %s4876_s12 }
 0x1a6   : > { %v1004_v20 = vpop.permute.xlu1 %1003  ;;  %v1002_v22 = vpop.permute.xlu0 %1001 }
 0x1a7   : > { %1145 = vst.msk [vmem:[#allocation4 + $0x1f] sm:$0x1] %vm1141_vm9, %v1004_v20 }
 0x1a8   : > { %1144 = vst.msk [vmem:[#allocation4 + $0x17] sm:$0xff] %vm1139_vm7, %v1002_v22  ;;  %1219 = vrot.lane.b32.xlu1 %v5266_v38, %s4876_s12  ;;  %1217 = vrot.lane.b32.xlu0 %v5570_v9, %s4876_s12 }
 0x1aa   : > { %v1008_v49 = vpop.permute.xlu1 %1007  ;;  %v1006_v50 = vpop.permute.xlu0 %1005 }
 0x1ab   : > { %1147 = vst.msk [vmem:[#allocation4 + $0x27] sm:$0xff] %vm1139_vm7, %v1008_v49 }
 0x1ac   : > { %1146 = vst.msk [vmem:[#allocation4 + $0x1f] sm:$0xfe] %vm1137_vm8, %v1006_v50  ;;  %1223 = vrot.lane.b32.xlu1 %v5578_v12, %s4876_s12  ;;  %1221 = vrot.lane.b32.xlu0 %v5264_v37, %s4876_s12 }
 0x1ae   : > { %v1012_v52 = vpop.permute.xlu1 %1011  ;;  %v1010_v56 = vpop.permute.xlu0 %1009 }
 0x1af   : > { %1149 = vst.msk [vmem:[#allocation4 + $0x2f] sm:$0xfe] %vm1137_vm8, %v1012_v52 }
 0x1b0   : > { %1148 = vst.msk [vmem:[#allocation4 + $0x2f] sm:$0x1] %vm1141_vm9, %v1010_v56  ;;  %1227 = vrot.lane.b32.xlu1 %v5278_v40, %s4876_s12  ;;  %1225 = vrot.lane.b32.xlu0 %v5268_v39, %s4876_s12 }
 0x1b2   : > { %v1016_v6 = vpop.permute.xlu1 %1015  ;;  %v1014_v10 = vpop.permute.xlu0 %1013 }
 0x1b3   : > { %1151 = vst.msk [vmem:[#allocation4 + $0x3f] sm:$0x1] %vm1141_vm9, %v1016_v6 }
 0x1b4   : > { %1150 = vst.msk [vmem:[#allocation4 + $0x37] sm:$0xff] %vm1139_vm7, %v1014_v10  ;;  %1231 = vrot.lane.b32.xlu1 %v5284_v42, %s4876_s12  ;;  %1229 = vrot.lane.b32.xlu0 %v5592_v19, %s4876_s12 }
 0x1b6   : > { %v1020_v11 = vpop.permute.xlu1 %1019  ;;  %v1018_v15 = vpop.permute.xlu0 %1017 }
 0x1b7   : > { %1153 = vst.msk [vmem:[#allocation4 + $0x47] sm:$0xff] %vm1139_vm7, %v1020_v11 }
 0x1b8   : > { %1152 = vst.msk [vmem:[#allocation4 + $0x3f] sm:$0xfe] %vm1137_vm8, %v1018_v15  ;;  %1235 = vrot.lane.b32.xlu1 %v5600_v23, %s4876_s12  ;;  %1233 = vrot.lane.b32.xlu0 %v5282_v41, %s4876_s12 }
 0x1ba   : > { %v1024_v17 = vpop.permute.xlu1 %1023  ;;  %v1022_v20 = vpop.permute.xlu0 %1021 }
 0x1bb   : > { %1155 = vst.msk [vmem:[#allocation4 + $0x4f] sm:$0xfe] %vm1137_vm8, %v1024_v17 }
 0x1bc   : > { %1154 = vst.msk [vmem:[#allocation4 + $0x4f] sm:$0x1] %vm1141_vm9, %v1022_v20  ;;  %1239 = vrot.lane.b32.xlu1 %v5292_v43, %s4876_s12  ;;  %1237 = vrot.lane.b32.xlu0 %v5294_v44, %s4876_s12 }
 0x1be   : > { %v1028_v22 = vpop.permute.xlu1 %1027  ;;  %v1026_v49 = vpop.permute.xlu0 %1025 }
 0x1bf   : > { %1157 = vst.msk [vmem:[#allocation4 + $0x5f] sm:$0x1] %vm1141_vm9, %v1028_v22 }
 0x1c0   : > { %1156 = vst.msk [vmem:[#allocation4 + $0x57] sm:$0xff] %vm1139_vm7, %v1026_v49  ;;  %1243 = vrot.lane.b32.xlu1 %v5296_v45, %s4876_s12  ;;  %1241 = vrot.lane.b32.xlu0 %v5614_v55, %s4876_s12 }
 0x1c2   : > { %v1032_v50 = vpop.permute.xlu1 %1031  ;;  %v1030_v52 = vpop.permute.xlu0 %1029 }
 0x1c3   : > { %1159 = vst.msk [vmem:[#allocation4 + $0x67] sm:$0xff] %vm1139_vm7, %v1032_v50 }
 0x1c4   : > { %1158 = vst.msk [vmem:[#allocation4 + $0x5f] sm:$0xfe] %vm1137_vm8, %v1030_v52  ;;  %1247 = vrot.lane.b32.xlu1 %v5622_v4, %s4876_s12  ;;  %1245 = vrot.lane.b32.xlu0 %v5302_v46, %s4876_s12 }
 0x1c6   : > { %v1036_v56 = vpop.permute.xlu1 %1035  ;;  %v1034_v6 = vpop.permute.xlu0 %1033 }
 0x1c7   : > { %1161 = vst.msk [vmem:[#allocation4 + $0x6f] sm:$0xfe] %vm1137_vm8, %v1036_v56 }
 0x1c8   : > { %1160 = vst.msk [vmem:[#allocation4 + $0x6f] sm:$0x1] %vm1141_vm9, %v1034_v6  ;;  %1251 = vrot.lane.b32.xlu1 %v5306_v47, %s4876_s12  ;;  %1249 = vrot.lane.b32.xlu0 %v5308_v48, %s4876_s12 }
 0x1ca   : > { %v1040_v10 = vpop.permute.xlu1 %1039  ;;  %v1038_v11 = vpop.permute.xlu0 %1037 }
 0x1cb   : > { %1163 = vst.msk [vmem:[#allocation4 + $0x7f] sm:$0x1] %vm1141_vm9, %v1040_v10 }
 0x1cc   : > { %1162 = vst.msk [vmem:[#allocation4 + $0x77] sm:$0xff] %vm1139_vm7, %v1038_v11  ;;  %1255 = vrot.lane.b32.xlu1 %v5350_v60, %s4876_s12  ;;  %1253 = vrot.lane.b32.xlu0 %v5636_v14, %s4876_s12 }
 0x1ce   : > { %v1044_v15 = vpop.permute.xlu1 %1043  ;;  %v1042_v17 = vpop.permute.xlu0 %1041 }
 0x1cf   : > { %1165 = vst.msk [vmem:[#allocation4 + $0x87] sm:$0xff] %vm1139_vm7, %v1044_v15 }
 0x1d0   : > { %1164 = vst.msk [vmem:[#allocation4 + $0x7f] sm:$0xfe] %vm1137_vm8, %v1042_v17  ;;  %1259 = vrot.lane.b32.xlu1 %v5644_v18, %s4876_s12  ;;  %1257 = vrot.lane.b32.xlu0 %v5348_v59, %s4876_s12  ;;  %v5958_v17 = vld [vmem:[#allocation2 + $0x1a8] sm:$0x3] }
 0x1d2   : > { %v1048_v20 = vpop.permute.xlu1 %1047  ;;  %v1046_v22 = vpop.permute.xlu0 %1045 }
 0x1d3   : > { %1167 = vst.msk [vmem:[#allocation4 + $0x8f] sm:$0xfe] %vm1137_vm8, %v1048_v20 }
 0x1d4   : > { %1166 = vst.msk [vmem:[#allocation4 + $0x8f] sm:$0x1] %vm1141_vm9, %v1046_v22  ;;  %1263 = vrot.lane.b32.xlu1 %v5362_v62, %s4876_s12  ;;  %1261 = vrot.lane.b32.xlu0 %v5352_v61, %s4876_s12 }
 0x1d6   : > { %v1052_v49 = vpop.permute.xlu1 %1051  ;;  %v1050_v50 = vpop.permute.xlu0 %1049 }
 0x1d7   : > { %1169 = vst.msk [vmem:[#allocation4 + $0x9f] sm:$0x1] %vm1141_vm9, %v1052_v49 }
 0x1d8   : > { %1168 = vst.msk [vmem:[#allocation4 + $0x97] sm:$0xff] %vm1139_vm7, %v1050_v50  ;;  %1267 = vrot.lane.b32.xlu1 %v5366_v63, %s4876_s12  ;;  %1265 = vrot.lane.b32.xlu0 %v5658_v51, %s4876_s12 }
 0x1da   : > { %v1056_v52 = vpop.permute.xlu1 %1055  ;;  %v1054_v56 = vpop.permute.xlu0 %1053 }
 0x1db   : > { %1171 = vst.msk [vmem:[#allocation4 + $0xa7] sm:$0xff] %vm1139_vm7, %v1056_v52 }
 0x1dc   : > { %1170 = vst.msk [vmem:[#allocation4 + $0x9f] sm:$0xfe] %vm1137_vm8, %v1054_v56  ;;  %1271 = vrot.lane.b32.xlu1 %v5666_v3, %s4876_s12  ;;  %1269 = vrot.lane.b32.xlu0 %v5370_v0, %s4876_s12 }
 0x1de   : > { %v1060_v6 = vpop.permute.xlu1 %1059  ;;  %v1058_v10 = vpop.permute.xlu0 %1057 }
 0x1df   : > { %1173 = vst.msk [vmem:[#allocation4 + $0xaf] sm:$0xfe] %vm1137_vm8, %v1060_v6 }
 0x1e0   : > { %1172 = vst.msk [vmem:[#allocation4 + $0xaf] sm:$0x1] %vm1141_vm9, %v1058_v10  ;;  %1275 = vrot.lane.b32.xlu1 %v5416_v1, %s4876_s12  ;;  %1273 = vrot.lane.b32.xlu0 %v5418_v2, %s4876_s12 }
 0x1e2   : > { %v1064_v11 = vpop.permute.xlu1 %1063  ;;  %v1062_v15 = vpop.permute.xlu0 %1061 }
 0x1e3   : > { %1175 = vst.msk [vmem:[#allocation4 + $0xbf] sm:$0x1] %vm1141_vm9, %v1064_v11 }
 0x1e4   : > { %1174 = vst.msk [vmem:[#allocation4 + $0xb7] sm:$0xff] %vm1139_vm7, %v1062_v15  ;;  %1279 = vrot.lane.b32.xlu1 %v5490_v8, %s4876_s12  ;;  %1277 = vrot.lane.b32.xlu0 %v5812_v5, %s4876_s12 }
 0x1e6   : > { %v1068_v20 = vpop.permute.xlu1 %1067  ;;  %v1066_v22 = vpop.permute.xlu0 %1065 }
 0x1e7   : > { %1177 = vst.msk [vmem:[#allocation4 + $0xc7] sm:$0xff] %vm1139_vm7, %v1068_v20 }
 0x1e8   : > { %1176 = vst.msk [vmem:[#allocation4 + $0xbf] sm:$0xfe] %vm1137_vm8, %v1066_v22  ;;  %1283 = vrot.lane.b32.xlu1 %v5958_v17, %s4876_s12  ;;  %1281 = vrot.lane.b32.xlu0 %v5488_v7, %s4876_s12 }
 0x1ea   : > { %v1072_v1 = vpop.permute.xlu1 %1071  ;;  %v1070_v2 = vpop.permute.xlu0 %1069 }
 0x1eb   : > { %1179 = vst.msk [vmem:[#allocation4 + $0xcf] sm:$0xfe] %vm1137_vm8, %v1072_v1 }
 0x1ec   : > { %1178 = vst.msk [vmem:[#allocation4 + $0xcf] sm:$0x1] %vm1141_vm9, %v1070_v2  ;;  %1386 = vrot.lane.b32.xlu1 %v5340_v58, %s4877_s13  ;;  %1384 = vrot.lane.b32.xlu0 %v5328_v54, %s4877_s13 }
 0x1ee   : > { %v1076_v8 = vpop.permute.xlu1 %1075  ;;  %v1074_v49 = vpop.permute.xlu0 %1073 }
 0x1ef   : > { %1181 = vst.msk [vmem:[#allocation4 + $0xdf] sm:$0x1] %vm1141_vm9, %v1076_v8 }
 0x1f0   : > { %1180 = vst.msk [vmem:[#allocation4 + $0xd7] sm:$0xff] %vm1139_vm7, %v1074_v49  ;;  %1390 = vrot.lane.b32.xlu1 %v5211_v26, %s4877_s13  ;;  %1388 = vrot.lane.b32.xlu0 %v5504_v13, %s4877_s13 }
 0x1f2   : > { %v1080_v7 = vpop.permute.xlu1 %1079  ;;  %v1078_v50 = vpop.permute.xlu0 %1077 }
 0x1f3   : > { %1183 = vst.msk [vmem:[#allocation4 + $0xe7] sm:$0xff] %vm1139_vm7, %v1080_v7 }
 0x1f4   : > { %1182 = vst.msk [vmem:[#allocation4 + $0xdf] sm:$0xfe] %vm1137_vm8, %v1078_v50  ;;  %1394 = vrot.lane.b32.xlu1 %v5512_v16, %s4877_s13  ;;  %1392 = vrot.lane.b32.xlu0 %v5228_v28, %s4877_s13 }
 0x1f6   : > { %v1084_v54 = vpop.permute.xlu1 %1083  ;;  %v1082_v58 = vpop.permute.xlu0 %1081 }
 0x1f7   : > { %1185 = vst.msk [vmem:[#allocation4 + $0xef] sm:$0xfe] %vm1137_vm8, %v1084_v54 }
 0x1f8   : > { %1184 = vst.msk [vmem:[#allocation4 + $0xef] sm:$0x1] %vm1141_vm9, %v1082_v58  ;;  %1398 = vrot.lane.b32.xlu1 %v5213_v27, %s4877_s13  ;;  %1396 = vrot.lane.b32.xlu0 %v5209_v25, %s4877_s13 }
 0x1fa   : > { %v1088_v13 = vpop.permute.xlu1 %1087  ;;  %v1086_v52 = vpop.permute.xlu0 %1085 }
 0x1fb   : > { %1187 = vst.msk [vmem:[#allocation4 + $0xff] sm:$0x1] %vm1141_vm9, %v1088_v13 }
 0x1fc   : > { %1186 = vst.msk [vmem:[#allocation4 + $0xf7] sm:$0xff] %vm1139_vm7, %v1086_v52  ;;  %1402 = vrot.lane.b32.xlu1 %v5232_v30, %s4877_s13  ;;  %1400 = vrot.lane.b32.xlu0 %v5526_v21, %s4877_s13 }
 0x1fe   : > { %v1192_v16 = vpop.permute.xlu1 %1191  ;;  %v1190_v56 = vpop.permute.xlu0 %1189 }
 0x1ff   : > { %1336 = vst.msk [vmem:[#allocation4 + $0x7] sm:$0xff] %vm8094_vm10, %v1192_v16 }
 0x200   : > { %1334 = vst.msk [vmem:[#allocation4 - $0x1] sm:$0xfe] %vm8095_vm11, %v1190_v56  ;;  %1406 = vrot.lane.b32.xlu1 %v5534_v24, %s4877_s13  ;;  %1404 = vrot.lane.b32.xlu0 %v5230_v29, %s4877_s13 }
 0x202   : > { %v1196_v6 = vpop.permute.xlu1 %1195  ;;  %v1194_v10 = vpop.permute.xlu0 %1193 }
 0x203   : > { %1339 = vst.msk [vmem:[#allocation4 + $0xf] sm:$0xfe] %vm8095_vm11, %v1196_v6 }
 0x204   : > { %1338 = vst.msk [vmem:[#allocation4 + $0xf] sm:$0x1] %vm8091_vm12, %v1194_v10  ;;  %1410 = vrot.lane.b32.xlu1 %v5240_v31, %s4877_s13  ;;  %1408 = vrot.lane.b32.xlu0 %v5242_v32, %s4877_s13 }
 0x206   : > { %v1200_v21 = vpop.permute.xlu1 %1199  ;;  %v1198_v11 = vpop.permute.xlu0 %1197 }
 0x207   : > { %1341 = vst.msk [vmem:[#allocation4 + $0x1f] sm:$0x1] %vm8091_vm12, %v1200_v21 }
 0x208   : > { %1340 = vst.msk [vmem:[#allocation4 + $0x17] sm:$0xff] %vm8094_vm10, %v1198_v11  ;;  %1414 = vrot.lane.b32.xlu1 %v5244_v33, %s4877_s13  ;;  %1412 = vrot.lane.b32.xlu0 %v5548_v53, %s4877_s13 }
 0x20a   : > { %v1204_v24 = vpop.permute.xlu1 %1203  ;;  %v1202_v15 = vpop.permute.xlu0 %1201 }
 0x20b   : > { %1343 = vst.msk [vmem:[#allocation4 + $0x27] sm:$0xff] %vm8094_vm10, %v1204_v24 }
 0x20c   : > { %1342 = vst.msk [vmem:[#allocation4 + $0x1f] sm:$0xfe] %vm8095_vm11, %v1202_v15  ;;  %1418 = vrot.lane.b32.xlu1 %v5556_v57, %s4877_s13  ;;  %1416 = vrot.lane.b32.xlu0 %v5250_v34, %s4877_s13 }
 0x20e   : > { %v1208_v20 = vpop.permute.xlu1 %1207  ;;  %v1206_v22 = vpop.permute.xlu0 %1205 }
 0x20f   : > { %1345 = vst.msk [vmem:[#allocation4 + $0x2f] sm:$0xfe] %vm8095_vm11, %v1208_v20 }
 0x210   : > { %1344 = vst.msk [vmem:[#allocation4 + $0x2f] sm:$0x1] %vm8091_vm12, %v1206_v22  ;;  %1422 = vrot.lane.b32.xlu1 %v5254_v35, %s4877_s13  ;;  %1420 = vrot.lane.b32.xlu0 %v5256_v36, %s4877_s13 }
 0x212   : > { %v1212_v53 = vpop.permute.xlu1 %1211  ;;  %v1210_v1 = vpop.permute.xlu0 %1209 }
 0x213   : > { %1347 = vst.msk [vmem:[#allocation4 + $0x3f] sm:$0x1] %vm8091_vm12, %v1212_v53 }
 0x214   : > { %1346 = vst.msk [vmem:[#allocation4 + $0x37] sm:$0xff] %vm8094_vm10, %v1210_v1  ;;  %1426 = vrot.lane.b32.xlu1 %v5266_v38, %s4877_s13  ;;  %1424 = vrot.lane.b32.xlu0 %v5570_v9, %s4877_s13 }
 0x216   : > { %v1216_v57 = vpop.permute.xlu1 %1215  ;;  %v1214_v2 = vpop.permute.xlu0 %1213 }
 0x217   : > { %1349 = vst.msk [vmem:[#allocation4 + $0x47] sm:$0xff] %vm8094_vm10, %v1216_v57 }
 0x218   : > { %1348 = vst.msk [vmem:[#allocation4 + $0x3f] sm:$0xfe] %vm8095_vm11, %v1214_v2  ;;  %1430 = vrot.lane.b32.xlu1 %v5578_v12, %s4877_s13  ;;  %1428 = vrot.lane.b32.xlu0 %v5264_v37, %s4877_s13  ;;  %v6123_v2 = vld [vmem:[#allocation2 + $0x40] sm:$0x3] }
 0x21a   : > { %v1220_v8 = vpop.permute.xlu1 %1219  ;;  %v1218_v49 = vpop.permute.xlu0 %1217 }
 0x21b   : > { %1351 = vst.msk [vmem:[#allocation4 + $0x4f] sm:$0xfe] %vm8095_vm11, %v1220_v8 }
 0x21c   : > { %1350 = vst.msk [vmem:[#allocation4 + $0x4f] sm:$0x1] %vm8091_vm12, %v1218_v49  ;;  %1434 = vrot.lane.b32.xlu1 %v5278_v40, %s4877_s13  ;;  %1432 = vrot.lane.b32.xlu0 %v5268_v39, %s4877_s13 }
 0x21e   : > { %v1224_v9 = vpop.permute.xlu1 %1223  ;;  %v1222_v7 = vpop.permute.xlu0 %1221 }
 0x21f   : > { %1353 = vst.msk [vmem:[#allocation4 + $0x5f] sm:$0x1] %vm8091_vm12, %v1224_v9 }
 0x220   : > { %1352 = vst.msk [vmem:[#allocation4 + $0x57] sm:$0xff] %vm8094_vm10, %v1222_v7  ;;  %1438 = vrot.lane.b32.xlu1 %v5284_v42, %s4877_s13  ;;  %1436 = vrot.lane.b32.xlu0 %v5592_v19, %s4877_s13 }
 0x222   : > { %v1228_v12 = vpop.permute.xlu1 %1227  ;;  %v1226_v50 = vpop.permute.xlu0 %1225 }
 0x223   : > { %1355 = vst.msk [vmem:[#allocation4 + $0x67] sm:$0xff] %vm8094_vm10, %v1228_v12  ;;  %v6139_v12 = vld [vmem:[#allocation2 + $0x58] sm:$0x3] }
 0x224   : > { %1354 = vst.msk [vmem:[#allocation4 + $0x5f] sm:$0xfe] %vm8095_vm11, %v1226_v50  ;;  %1442 = vrot.lane.b32.xlu1 %v5600_v23, %s4877_s13  ;;  %1440 = vrot.lane.b32.xlu0 %v5282_v41, %s4877_s13 }
 0x226   : > { %v1232_v54 = vpop.permute.xlu1 %1231  ;;  %v1230_v58 = vpop.permute.xlu0 %1229 }
 0x227   : > { %1357 = vst.msk [vmem:[#allocation4 + $0x6f] sm:$0xfe] %vm8095_vm11, %v1232_v54 }
 0x228   : > { %1356 = vst.msk [vmem:[#allocation4 + $0x6f] sm:$0x1] %vm8091_vm12, %v1230_v58  ;;  %1446 = vrot.lane.b32.xlu1 %v5292_v43, %s4877_s13  ;;  %1444 = vrot.lane.b32.xlu0 %v5294_v44, %s4877_s13  ;;  %v6145_v58 = vld [vmem:[#allocation2 + $0x70] sm:$0x3] }
 0x22a   : > { %v1236_v19 = vpop.permute.xlu1 %1235  ;;  %v1234_v13 = vpop.permute.xlu0 %1233 }
 0x22b   : > { %1359 = vst.msk [vmem:[#allocation4 + $0x7f] sm:$0x1] %vm8091_vm12, %v1236_v19 }
 0x22c   : > { %1358 = vst.msk [vmem:[#allocation4 + $0x77] sm:$0xff] %vm8094_vm10, %v1234_v13  ;;  %1450 = vrot.lane.b32.xlu1 %v5296_v45, %s4877_s13  ;;  %1448 = vrot.lane.b32.xlu0 %v5614_v55, %s4877_s13 }
 0x22e   : > { %v1240_v23 = vpop.permute.xlu1 %1239  ;;  %v1238_v52 = vpop.permute.xlu0 %1237 }
 0x22f   : > { %1361 = vst.msk [vmem:[#allocation4 + $0x87] sm:$0xff] %vm8094_vm10, %v1240_v23 }
 0x230   : > { %1360 = vst.msk [vmem:[#allocation4 + $0x7f] sm:$0xfe] %vm8095_vm11, %v1238_v52  ;;  %1454 = vrot.lane.b32.xlu1 %v5622_v4, %s4877_s13  ;;  %1452 = vrot.lane.b32.xlu0 %v5302_v46, %s4877_s13 }
 0x232   : > { %v1244_v16 = vpop.permute.xlu1 %1243  ;;  %v1242_v56 = vpop.permute.xlu0 %1241 }
 0x233   : > { %1363 = vst.msk [vmem:[#allocation4 + $0x8f] sm:$0xfe] %vm8095_vm11, %v1244_v16  ;;  %v6161_v16 = vld [vmem:[#allocation2 + $0x88] sm:$0x3] }
 0x234   : > { %1362 = vst.msk [vmem:[#allocation4 + $0x8f] sm:$0x1] %vm8091_vm12, %v1242_v56  ;;  %1458 = vrot.lane.b32.xlu1 %v5306_v47, %s4877_s13  ;;  %1456 = vrot.lane.b32.xlu0 %v5308_v48, %s4877_s13 }
 0x236   : > { %v1248_v55 = vpop.permute.xlu1 %1247  ;;  %v1246_v6 = vpop.permute.xlu0 %1245 }
 0x237   : > { %1365 = vst.msk [vmem:[#allocation4 + $0x9f] sm:$0x1] %vm8091_vm12, %v1248_v55 }
 0x238   : > { %1364 = vst.msk [vmem:[#allocation4 + $0x97] sm:$0xff] %vm8094_vm10, %v1246_v6  ;;  %1462 = vrot.lane.b32.xlu1 %v5350_v60, %s4877_s13  ;;  %1460 = vrot.lane.b32.xlu0 %v5636_v14, %s4877_s13  ;;  %v6167_v6 = vld [vmem:[#allocation2 + $0xa0] sm:$0x3] }
 0x23a   : > { %v1252_v4 = vpop.permute.xlu1 %1251  ;;  %v1250_v10 = vpop.permute.xlu0 %1249 }
 0x23b   : > { %1367 = vst.msk [vmem:[#allocation4 + $0xa7] sm:$0xff] %vm8094_vm10, %v1252_v4 }
 0x23c   : > { %1366 = vst.msk [vmem:[#allocation4 + $0x9f] sm:$0xfe] %vm8095_vm11, %v1250_v10  ;;  %1466 = vrot.lane.b32.xlu1 %v5644_v18, %s4877_s13  ;;  %1464 = vrot.lane.b32.xlu0 %v5348_v59, %s4877_s13 }
 0x23e   : > { %v1256_v21 = vpop.permute.xlu1 %1255  ;;  %v1254_v11 = vpop.permute.xlu0 %1253 }
 0x23f   : > { %1369 = vst.msk [vmem:[#allocation4 + $0xaf] sm:$0xfe] %vm8095_vm11, %v1256_v21 }
 0x240   : > { %1368 = vst.msk [vmem:[#allocation4 + $0xaf] sm:$0x1] %vm8091_vm12, %v1254_v11  ;;  %1470 = vrot.lane.b32.xlu1 %v5362_v62, %s4877_s13  ;;  %1468 = vrot.lane.b32.xlu0 %v5352_v61, %s4877_s13 }
 0x242   : > { %v1260_v14 = vpop.permute.xlu1 %1259  ;;  %v1258_v24 = vpop.permute.xlu0 %1257 }
 0x243   : > { %1371 = vst.msk [vmem:[#allocation4 + $0xbf] sm:$0x1] %vm8091_vm12, %v1260_v14  ;;  %v6183_v14 = vld [vmem:[#allocation2 + $0xb8] sm:$0x3] }
 0x244   : > { %1370 = vst.msk [vmem:[#allocation4 + $0xb7] sm:$0xff] %vm8094_vm10, %v1258_v24  ;;  %1474 = vrot.lane.b32.xlu1 %v5366_v63, %s4877_s13  ;;  %1472 = vrot.lane.b32.xlu0 %v5658_v51, %s4877_s13 }
 0x246   : > { %v1264_v18 = vpop.permute.xlu1 %1263  ;;  %v1262_v15 = vpop.permute.xlu0 %1261 }
 0x247   : > { %1373 = vst.msk [vmem:[#allocation4 + $0xc7] sm:$0xff] %vm8094_vm10, %v1264_v18 }
 0x248   : > { %1372 = vst.msk [vmem:[#allocation4 + $0xbf] sm:$0xfe] %vm8095_vm11, %v1262_v15  ;;  %1478 = vrot.lane.b32.xlu1 %v5666_v3, %s4877_s13  ;;  %1476 = vrot.lane.b32.xlu0 %v5370_v0, %s4877_s13  ;;  %v4812_v3 = vld [vmem:[#allocation2 + $0x28] sm:$0x3]  ;;  %v6189_v15 = vld [vmem:[#allocation2 + $0xd0] sm:$0x3] }
 0x24a   : > { %v1268_v20 = vpop.permute.xlu1 %1267  ;;  %v1266_v22 = vpop.permute.xlu0 %1265 }
 0x24b   : > { %1375 = vst.msk [vmem:[#allocation4 + $0xcf] sm:$0xfe] %vm8095_vm11, %v1268_v20 }
 0x24c   : > { %1374 = vst.msk [vmem:[#allocation4 + $0xcf] sm:$0x1] %vm8091_vm12, %v1266_v22  ;;  %1581 = vrot.lane.b32.xlu1 %v5228_v28, %s4878_s14  ;;  %1579 = vrot.lane.b32.xlu0 %v5211_v26, %s4878_s14 }
 0x24e   : > { %v1272_v51 = vpop.permute.xlu1 %1271  ;;  %v1270_v53 = vpop.permute.xlu0 %1269 }
 0x24f   : > { %1377 = vst.msk [vmem:[#allocation4 + $0xdf] sm:$0x1] %vm8091_vm12, %v1272_v51 }
 0x250   : > { %1376 = vst.msk [vmem:[#allocation4 + $0xd7] sm:$0xff] %vm8094_vm10, %v1270_v53  ;;  %1585 = vrot.lane.b32.xlu1 %v5209_v25, %s4878_s14  ;;  %1583 = vrot.lane.b32.xlu0 %v4812_v3, %s4878_s14  ;;  %v6205_v3 = vld [vmem:[#allocation2 + $0xe8] sm:$0x3] }
 0x252   : > { %v1276_v1 = vpop.permute.xlu1 %1275  ;;  %v1274_v57 = vpop.permute.xlu0 %1273 }
 0x253   : > { %1379 = vst.msk [vmem:[#allocation4 + $0xe7] sm:$0xff] %vm8094_vm10, %v1276_v1 }
 0x254   : > { %1378 = vst.msk [vmem:[#allocation4 + $0xdf] sm:$0xfe] %vm8095_vm11, %v1274_v57  ;;  %1589 = vrot.lane.b32.xlu1 %v6123_v2, %s4878_s14  ;;  %1587 = vrot.lane.b32.xlu0 %v5213_v27, %s4878_s14 }
 0x256   : > { %v1280_v8 = vpop.permute.xlu1 %1279  ;;  %v1278_v49 = vpop.permute.xlu0 %1277 }
 0x257   : > { %1381 = vst.msk [vmem:[#allocation4 + $0xef] sm:$0xfe] %vm8095_vm11, %v1280_v8  ;;  %v6211_v8 = vld [vmem:[#allocation2 + $0x100] sm:$0x3]  ;;  %vm1922_vm11 = vcmask 288000  }
 0x258   : > { %1380 = vst.msk [vmem:[#allocation4 + $0xef] sm:$0x1] %vm8091_vm12, %v1278_v49  ;;  %1593 = vrot.lane.b32.xlu1 %v5230_v29, %s4878_s14  ;;  %1591 = vrot.lane.b32.xlu0 %v5232_v30, %s4878_s14 }
 0x25a   : > { %v1284_v9 = vpop.permute.xlu1 %1283  ;;  %v1282_v7 = vpop.permute.xlu0 %1281 }
 0x25b   : > { %1383 = vst.msk [vmem:[#allocation4 + $0xff] sm:$0x1] %vm8091_vm12, %v1284_v9  ;;  %vm1723_vm12 = vcmask 261346  }
 0x25c   : > { %1382 = vst.msk [vmem:[#allocation4 + $0xf7] sm:$0xff] %vm8094_vm10, %v1282_v7  ;;  %1597 = vrot.lane.b32.xlu1 %v5242_v32, %s4878_s14  ;;  %1595 = vrot.lane.b32.xlu0 %v6139_v12, %s4878_s14  ;;  %vm1918_vm10 = vcmask 294146  }
 0x25e   : > { %v1387_v50 = vpop.permute.xlu1 %1386  ;;  %v1385_v54 = vpop.permute.xlu0 %1384 }
 0x25f   : > { %1531 = vst.msk [vmem:[#allocation4 + $0x6] sm:$0xff] %vm8093_vm13, %v1387_v50 }
 0x260   : > { %1529 = vst.msk [vmem:[#allocation4 - $0x2] sm:$0xfc] %vm8090_vm14, %v1385_v54  ;;  %1601 = vrot.lane.b32.xlu1 %v6145_v58, %s4878_s14  ;;  %1599 = vrot.lane.b32.xlu0 %v5240_v31, %s4878_s14  ;;  %v6227_v54 = vld [vmem:[#allocation2 + $0x118] sm:$0x3] }
 0x262   : > { %v1391_v19 = vpop.permute.xlu1 %1390  ;;  %v1389_v13 = vpop.permute.xlu0 %1388 }
 0x263   : > { %1534 = vst.msk [vmem:[#allocation4 + $0xe] sm:$0xfc] %vm8090_vm14, %v1391_v19 }
 0x264   : > { %1533 = vst.msk [vmem:[#allocation4 + $0xe] sm:$0x3] %vm8092_vm15, %v1389_v13  ;;  %1605 = vrot.lane.b32.xlu1 %v5250_v34, %s4878_s14  ;;  %1603 = vrot.lane.b32.xlu0 %v5244_v33, %s4878_s14 }
 0x266   : > { %v1395_v23 = vpop.permute.xlu1 %1394  ;;  %v1393_v52 = vpop.permute.xlu0 %1392 }
 0x267   : > { %1536 = vst.msk [vmem:[#allocation4 + $0x1e] sm:$0x3] %vm8092_vm15, %v1395_v23  ;;  %v6233_v23 = vld [vmem:[#allocation2 + $0x130] sm:$0x3] }
 0x268   : > { %1535 = vst.msk [vmem:[#allocation4 + $0x16] sm:$0xff] %vm8093_vm13, %v1393_v52  ;;  %1609 = vrot.lane.b32.xlu1 %v5256_v36, %s4878_s14  ;;  %1607 = vrot.lane.b32.xlu0 %v6161_v16, %s4878_s14 }
 0x26a   : > { %v1399_v56 = vpop.permute.xlu1 %1398  ;;  %v1397_v55 = vpop.permute.xlu0 %1396 }
 0x26b   : > { %1538 = vst.msk [vmem:[#allocation4 + $0x26] sm:$0xff] %vm8093_vm13, %v1399_v56 }
 0x26c   : > { %1537 = vst.msk [vmem:[#allocation4 + $0x1e] sm:$0xfc] %vm8090_vm14, %v1397_v55  ;;  %1613 = vrot.lane.b32.xlu1 %v6167_v6, %s4878_s14  ;;  %1611 = vrot.lane.b32.xlu0 %v5254_v35, %s4878_s14 }
 0x26e   : > { %v1403_v4 = vpop.permute.xlu1 %1402  ;;  %v1401_v10 = vpop.permute.xlu0 %1400 }
 0x26f   : > { %1540 = vst.msk [vmem:[#allocation4 + $0x2e] sm:$0xfc] %vm8090_vm14, %v1403_v4 }
 0x270   : > { %1539 = vst.msk [vmem:[#allocation4 + $0x2e] sm:$0x3] %vm8092_vm15, %v1401_v10  ;;  %1617 = vrot.lane.b32.xlu1 %v5264_v37, %s4878_s14  ;;  %1615 = vrot.lane.b32.xlu0 %v5266_v38, %s4878_s14  ;;  %v6249_v10 = vld [vmem:[#allocation2 + $0x148] sm:$0x3] }
 0x272   : > { %v1407_v21 = vpop.permute.xlu1 %1406  ;;  %v1405_v11 = vpop.permute.xlu0 %1404 }
 0x273   : > { %1542 = vst.msk [vmem:[#allocation4 + $0x3e] sm:$0x3] %vm8092_vm15, %v1407_v21 }
 0x274   : > { %1541 = vst.msk [vmem:[#allocation4 + $0x36] sm:$0xff] %vm8093_vm13, %v1405_v11  ;;  %1621 = vrot.lane.b32.xlu1 %v5268_v39, %s4878_s14  ;;  %1619 = vrot.lane.b32.xlu0 %v6183_v14, %s4878_s14 }
 0x276   : > { %v1411_v24 = vpop.permute.xlu1 %1410  ;;  %v1409_v18 = vpop.permute.xlu0 %1408 }
 0x277   : > { %1544 = vst.msk [vmem:[#allocation4 + $0x46] sm:$0xff] %vm8093_vm13, %v1411_v24  ;;  %v6255_v24 = vld [vmem:[#allocation2 + $0x160] sm:$0x3] }
 0x278   : > { %1543 = vst.msk [vmem:[#allocation4 + $0x3e] sm:$0xfc] %vm8090_vm14, %v1409_v18  ;;  %1625 = vrot.lane.b32.xlu1 %v6189_v15, %s4878_s14  ;;  %1623 = vrot.lane.b32.xlu0 %v5278_v40, %s4878_s14 }
 0x27a   : > { %v1415_v20 = vpop.permute.xlu1 %1414  ;;  %v1413_v22 = vpop.permute.xlu0 %1412 }
 0x27b   : > { %1546 = vst.msk [vmem:[#allocation4 + $0x4e] sm:$0xfc] %vm8090_vm14, %v1415_v20 }
 0x27c   : > { %1545 = vst.msk [vmem:[#allocation4 + $0x4e] sm:$0x3] %vm8092_vm15, %v1413_v22  ;;  %1629 = vrot.lane.b32.xlu1 %v5282_v41, %s4878_s14  ;;  %1627 = vrot.lane.b32.xlu0 %v5284_v42, %s4878_s14 }
 0x27e   : > { %v1419_v51 = vpop.permute.xlu1 %1418  ;;  %v1417_v53 = vpop.permute.xlu0 %1416 }
 0x27f   : > { %1548 = vst.msk [vmem:[#allocation4 + $0x5e] sm:$0x3] %vm8092_vm15, %v1419_v51 }
 0x280   : > { %1547 = vst.msk [vmem:[#allocation4 + $0x56] sm:$0xff] %vm8093_vm13, %v1417_v53  ;;  %1633 = vrot.lane.b32.xlu1 %v5294_v44, %s4878_s14  ;;  %1631 = vrot.lane.b32.xlu0 %v6205_v3, %s4878_s14  ;;  %v4806_v53 = vld [vmem:[%s8083_s1] sm:$0xff]  }
 0x281   : > { %4711 = vmatprep.subr.bf16.mxu0 %v4806_v53 }
 0x282   : > { %v1423_v1 = vpop.permute.xlu1 %1422  ;;  %v1421_v57 = vpop.permute.xlu0 %1420  ;;  %4712 = vmatpush3.bf16.msra.mxu0 %v4806_v53 }
 0x283   : > { %1550 = vst.msk [vmem:[#allocation4 + $0x66] sm:$0xff] %vm8093_vm13, %v1423_v1  ;;  %v6272_v1 = vld [vmem:[#allocation2 + $0x180] sm:$0xff] }
 0x284   : > { %1549 = vst.msk [vmem:[#allocation4 + $0x5e] sm:$0xfc] %vm8090_vm14, %v1421_v57  ;;  %1637 = vrot.lane.b32.xlu1 %v6211_v8, %s4878_s14  ;;  %1635 = vrot.lane.b32.xlu0 %v5292_v43, %s4878_s14  ;;  %v6276_v57 = vld [vmem:[#allocation2 + $0x178] sm:$0x3] }
 0x286   : > { %v1427_v49 = vpop.permute.xlu1 %1426  ;;  %v1425_v9 = vpop.permute.xlu0 %1424 }
 0x287   : > { %1552 = vst.msk [vmem:[#allocation4 + $0x6e] sm:$0xfc] %vm8090_vm14, %v1427_v49 }
 0x288   : > { %1551 = vst.msk [vmem:[#allocation4 + $0x6e] sm:$0x3] %vm8092_vm15, %v1425_v9  ;;  %1641 = vrot.lane.b32.xlu1 %v5302_v46, %s4878_s14  ;;  %1639 = vrot.lane.b32.xlu0 %v5296_v45, %s4878_s14 }
 0x28a   : > { %v1431_v7 = vpop.permute.xlu1 %1430  ;;  %v1429_v50 = vpop.permute.xlu0 %1428 }
 0x28b   : > { %1554 = vst.msk [vmem:[#allocation4 + $0x7e] sm:$0x3] %vm8092_vm15, %v1431_v7  ;;  %v4807_v7 = vld [vmem:[%s8083_s1 + $0x8] sm:$0xff]  }
 0x28c   : > { %1553 = vst.msk [vmem:[#allocation4 + $0x76] sm:$0xff] %vm8093_vm13, %v1429_v50  ;;  %1645 = vrot.lane.b32.xlu1 %v5308_v48, %s4878_s14  ;;  %1643 = vrot.lane.b32.xlu0 %v6227_v54, %s4878_s14  ;;  %v6287_v50 = vld [vmem:[#allocation2 + $0x188] sm:$0xff] }
 0x28d   : > { %4713 = vmatprep.subr.bf16.mxu0 %v4807_v7 }
 0x28e   : > { %v1435_v19 = vpop.permute.xlu1 %1434  ;;  %v1433_v13 = vpop.permute.xlu0 %1432  ;;  %4714 = vmatpush3.bf16.msra.mxu0 %v4807_v7 }
 0x28f   : > { %1556 = vst.msk [vmem:[#allocation4 + $0x86] sm:$0xff] %vm8093_vm13, %v1435_v19 }
 0x290   : > { %1555 = vst.msk [vmem:[#allocation4 + $0x7e] sm:$0xfc] %vm8090_vm14, %v1433_v13  ;;  %1649 = vrot.lane.b32.xlu1 %v6233_v23, %s4878_s14  ;;  %1647 = vrot.lane.b32.xlu0 %v5306_v47, %s4878_s14 }
 0x292   : > { %v1439_v52 = vpop.permute.xlu1 %1438  ;;  %v1437_v56 = vpop.permute.xlu0 %1436 }
 0x293   : > { %1558 = vst.msk [vmem:[#allocation4 + $0x8e] sm:$0xfc] %vm8090_vm14, %v1439_v52  ;;  %v4808_v52 = vld [vmem:[%s8083_s1 + $0x10] ss:$0 sps:$4 sm:$0x33]  }
 0x294   : > { %1557 = vst.msk [vmem:[#allocation4 + $0x8e] sm:$0x3] %vm8092_vm15, %v1437_v56  ;;  %1653 = vrot.lane.b32.xlu1 %v5348_v59, %s4878_s14  ;;  %1651 = vrot.lane.b32.xlu0 %v5350_v60, %s4878_s14 }
 0x295   : > { %4787 = vmatprep.subr.msk.bf16.mxu0 %vm2086_vm1, %v4808_v52 }
 0x296   : > { %v1443_v55 = vpop.permute.xlu1 %1442  ;;  %v1441_v4 = vpop.permute.xlu0 %1440 }
 0x297   : > { %1560 = vst.msk [vmem:[#allocation4 + $0x9e] sm:$0x3] %vm8092_vm15, %v1443_v55 }
 0x298   : > { %1559 = vst.msk [vmem:[#allocation4 + $0x96] sm:$0xff] %vm8093_vm13, %v1441_v4  ;;  %1657 = vrot.lane.b32.xlu1 %v5352_v61, %s4878_s14  ;;  %1655 = vrot.lane.b32.xlu0 %v6249_v10, %s4878_s14 }
 0x29a   : > { %v1447_v21 = vpop.permute.xlu1 %1446  ;;  %v1445_v11 = vpop.permute.xlu0 %1444 }
 0x29b   : > { %1562 = vst.msk [vmem:[#allocation4 + $0xa6] sm:$0xff] %vm8093_vm13, %v1447_v21 }
 0x29c   : > { %1561 = vst.msk [vmem:[#allocation4 + $0x9e] sm:$0xfc] %vm8090_vm14, %v1445_v11  ;;  %1661 = vrot.lane.b32.xlu1 %v6255_v24, %s4878_s14  ;;  %1659 = vrot.lane.b32.xlu0 %v5362_v62, %s4878_s14 }
 0x29e   : > { %v1451_v18 = vpop.permute.xlu1 %1450  ;;  %v1449_v20 = vpop.permute.xlu0 %1448 }
 0x29f   : > { %1564 = vst.msk [vmem:[#allocation4 + $0xae] sm:$0xfc] %vm8090_vm14, %v1451_v18 }
 0x2a0   : > { %1563 = vst.msk [vmem:[#allocation4 + $0xae] sm:$0x3] %vm8092_vm15, %v1449_v20  ;;  %1665 = vrot.lane.b32.xlu1 %v5370_v0, %s4878_s14  ;;  %1663 = vrot.lane.b32.xlu0 %v5366_v63, %s4878_s14 }
 0x2a2   : > { %v1455_v22 = vpop.permute.xlu1 %1454  ;;  %v1453_v51 = vpop.permute.xlu0 %1452 }
 0x2a3   : > { %1566 = vst.msk [vmem:[#allocation4 + $0xbe] sm:$0x3] %vm8092_vm15, %v1455_v22 }
 0x2a4   : > { %1565 = vst.msk [vmem:[#allocation4 + $0xb6] sm:$0xff] %vm8093_vm13, %v1453_v51  ;;  %1669 = vrot.lane.b32.xlu1 %v6272_v1, %s4878_s14  ;;  %1667 = vrot.lane.b32.xlu0 %v6276_v57, %s4878_s14 }
 0x2a6   : > { %v1459_v49 = vpop.permute.xlu1 %1458  ;;  %v1457_v9 = vpop.permute.xlu0 %1456 }
 0x2a7   : > { %1568 = vst.msk [vmem:[#allocation4 + $0xc6] sm:$0xff] %vm8093_vm13, %v1459_v49 }
 0x2a8   : > { %1567 = vst.msk [vmem:[#allocation4 + $0xbe] sm:$0xfc] %vm8090_vm14, %v1457_v9  ;;  %1673 = vrot.lane.b32.xlu1 %v5812_v5, %s4878_s14  ;;  %1671 = vrot.lane.b32.xlu0 %v6287_v50, %s4878_s14  ;;  %v2088_v5 = vsel %vm2086_vm1, %v4808_v52, 0 }
 0x2a9   : > { %4716 = vmatpush3.bf16.msra.mxu0 %v2088_v5 }
 0x2aa   : > { %v1463_v19 = vpop.permute.xlu1 %1462  ;;  %v1461_v13 = vpop.permute.xlu0 %1460 }
 0x2ab   : > { %1570 = vst.msk [vmem:[#allocation4 + $0xce] sm:$0xfc] %vm8090_vm14, %v1463_v19 }
 0x2ac   : > { %1569 = vst.msk [vmem:[#allocation4 + $0xce] sm:$0x3] %vm8092_vm15, %v1461_v13  ;;  %1776 = vrot.lane.b32.xlu1 %v5213_v27, %s4879_s21  ;;  %1774 = vrot.lane.b32.xlu0 %v5209_v25, %s4879_s21 }
 0x2ae   : > { %v1467_v56 = vpop.permute.xlu1 %1466  ;;  %v1465_v55 = vpop.permute.xlu0 %1464 }
 0x2af   : > { %1572 = vst.msk [vmem:[#allocation4 + $0xde] sm:$0x3] %vm8092_vm15, %v1467_v56 }
 0x2b0   : > { %1571 = vst.msk [vmem:[#allocation4 + $0xd6] sm:$0xff] %vm8093_vm13, %v1465_v55  ;;  %1780 = vrot.lane.b32.xlu1 %v5232_v30, %s4879_s21  ;;  %1778 = vrot.lane.b32.xlu0 %v6123_v2, %s4879_s21 }
 0x2b2   : > { %v1471_v4 = vpop.permute.xlu1 %1470  ;;  %v1469_v21 = vpop.permute.xlu0 %1468 }
 0x2b3   : > { %1574 = vst.msk [vmem:[#allocation4 + $0xe6] sm:$0xff] %vm8093_vm13, %v1471_v4 }
 0x2b4   : > { %1573 = vst.msk [vmem:[#allocation4 + $0xde] sm:$0xfc] %vm8090_vm14, %v1469_v21  ;;  %1784 = vrot.lane.b32.xlu1 %v6139_v12, %s4879_s21  ;;  %1782 = vrot.lane.b32.xlu0 %v5230_v29, %s4879_s21 }
 0x2b6   : > { %v1475_v11 = vpop.permute.xlu1 %1474  ;;  %v1473_v18 = vpop.permute.xlu0 %1472 }
 0x2b7   : > { %1576 = vst.msk [vmem:[#allocation4 + $0xee] sm:$0xfc] %vm8090_vm14, %v1475_v11  ;;  %vm1725_vm14 = vcmask 261344  }
 0x2b8   : > { %1575 = vst.msk [vmem:[#allocation4 + $0xee] sm:$0x3] %vm8092_vm15, %v1473_v18  ;;  %1788 = vrot.lane.b32.xlu1 %v5240_v31, %s4879_s21  ;;  %1786 = vrot.lane.b32.xlu0 %v5242_v32, %s4879_s21 }
 0x2ba   : > { %v1479_v2 = vpop.permute.xlu1 %1478  ;;  %v1477_v20 = vpop.permute.xlu0 %1476 }
 0x2bb   : > { %1578 = vst.msk [vmem:[#allocation4 + $0xfe] sm:$0x3] %vm8092_vm15, %v1479_v2  ;;  %vm8096_vm15 = vcmask 255200  }
 0x2bc   : > { %1577 = vst.msk [vmem:[#allocation4 + $0xf6] sm:$0xff] %vm8093_vm13, %v1477_v20  ;;  %1792 = vrot.lane.b32.xlu1 %v5244_v33, %s4879_s21  ;;  %1790 = vrot.lane.b32.xlu0 %v6145_v58, %s4879_s21  ;;  %vm1920_vm13 = vcmask 294144  }
 0x2be   : > { %v1582_v12 = vpop.permute.xlu1 %1581  ;;  %v1580_v22 = vpop.permute.xlu0 %1579 }
 0x2bf   : > { %1726 = vst.msk [vmem:[#allocation4 + $0x6] sm:$0xff] %vm1725_vm14, %v1582_v12 }
 0x2c0   : > { %1724 = vst.msk [vmem:[#allocation4 - $0x2] sm:$0xfc] %vm1723_vm12, %v1580_v22  ;;  %1796 = vrot.lane.b32.xlu1 %v6161_v16, %s4879_s21  ;;  %1794 = vrot.lane.b32.xlu0 %v5250_v34, %s4879_s21 }
 0x2c2   : > { %v1586_v51 = vpop.permute.xlu1 %1585  ;;  %v1584_v53 = vpop.permute.xlu0 %1583 }
 0x2c3   : > { %1729 = vst.msk [vmem:[#allocation4 + $0xe] sm:$0xfc] %vm1723_vm12, %v1586_v51 }
 0x2c4   : > { %1728 = vst.msk [vmem:[#allocation4 + $0xe] sm:$0x3] %vm8096_vm15, %v1584_v53  ;;  %1800 = vrot.lane.b32.xlu1 %v5254_v35, %s4879_s21  ;;  %1798 = vrot.lane.b32.xlu0 %v5256_v36, %s4879_s21 }
 0x2c6   : > { %v1590_v58 = vpop.permute.xlu1 %1589  ;;  %v1588_v49 = vpop.permute.xlu0 %1587 }
 0x2c7   : > { %1731 = vst.msk [vmem:[#allocation4 + $0x1e] sm:$0x3] %vm8096_vm15, %v1590_v58 }
 0x2c8   : > { %1730 = vst.msk [vmem:[#allocation4 + $0x16] sm:$0xff] %vm1725_vm14, %v1588_v49  ;;  %1804 = vrot.lane.b32.xlu1 %v5266_v38, %s4879_s21  ;;  %1802 = vrot.lane.b32.xlu0 %v6167_v6, %s4879_s21 }
 0x2ca   : > { %v1594_v16 = vpop.permute.xlu1 %1593  ;;  %v1592_v9 = vpop.permute.xlu0 %1591 }
 0x2cb   : > { %1733 = vst.msk [vmem:[#allocation4 + $0x26] sm:$0xff] %vm1725_vm14, %v1594_v16  ;;  %v4830_v16 = vld [vmem:[#allocation2 + $0x190] sm:$0x3] }
 0x2cc   : > { %1732 = vst.msk [vmem:[#allocation4 + $0x1e] sm:$0xfc] %vm1723_vm12, %v1592_v9  ;;  %1808 = vrot.lane.b32.xlu1 %v6183_v14, %s4879_s21  ;;  %1806 = vrot.lane.b32.xlu0 %v5264_v37, %s4879_s21 }
 0x2ce   : > { %v1598_v7 = vpop.permute.xlu1 %1597  ;;  %v1596_v19 = vpop.permute.xlu0 %1595 }
 0x2cf   : > { %1735 = vst.msk [vmem:[#allocation4 + $0x2e] sm:$0xfc] %vm1723_vm12, %v1598_v7 }
 0x2d0   : > { %1734 = vst.msk [vmem:[#allocation4 + $0x2e] sm:$0x3] %vm8096_vm15, %v1596_v19  ;;  %1812 = vrot.lane.b32.xlu1 %v5278_v40, %s4879_s21  ;;  %1810 = vrot.lane.b32.xlu0 %v5268_v39, %s4879_s21 }
 0x2d2   : > { %v1602_v6 = vpop.permute.xlu1 %1601  ;;  %v1600_v13 = vpop.permute.xlu0 %1599 }
 0x2d3   : > { %1737 = vst.msk [vmem:[#allocation4 + $0x3e] sm:$0x3] %vm8096_vm15, %v1602_v6 }
 0x2d4   : > { %1736 = vst.msk [vmem:[#allocation4 + $0x36] sm:$0xff] %vm1725_vm14, %v1600_v13  ;;  %1816 = vrot.lane.b32.xlu1 %v5284_v42, %s4879_s21  ;;  %1814 = vrot.lane.b32.xlu0 %v6189_v15, %s4879_s21 }
 0x2d6   : > { %v1606_v14 = vpop.permute.xlu1 %1605  ;;  %v1604_v52 = vpop.permute.xlu0 %1603 }
 0x2d7   : > { %1739 = vst.msk [vmem:[#allocation4 + $0x46] sm:$0xff] %vm1725_vm14, %v1606_v14 }
 0x2d8   : > { %1738 = vst.msk [vmem:[#allocation4 + $0x3e] sm:$0xfc] %vm1723_vm12, %v1604_v52  ;;  %1820 = vrot.lane.b32.xlu1 %v6205_v3, %s4879_s21  ;;  %1818 = vrot.lane.b32.xlu0 %v5282_v41, %s4879_s21 }
 0x2da   : > { %v1610_v5 = vpop.permute.xlu1 %1609  ;;  %v1608_v56 = vpop.permute.xlu0 %1607 }
 0x2db   : > { %1741 = vst.msk [vmem:[#allocation4 + $0x4e] sm:$0xfc] %vm1723_vm12, %v1610_v5 }
 0x2dc   : > { %1740 = vst.msk [vmem:[#allocation4 + $0x4e] sm:$0x3] %vm8096_vm15, %v1608_v56  ;;  %1824 = vrot.lane.b32.xlu1 %v5292_v43, %s4879_s21  ;;  %1822 = vrot.lane.b32.xlu0 %v5294_v44, %s4879_s21 }
 0x2de   : > { %v1614_v15 = vpop.permute.xlu1 %1613  ;;  %v1612_v55 = vpop.permute.xlu0 %1611 }
 0x2df   : > { %1743 = vst.msk [vmem:[#allocation4 + $0x5e] sm:$0x3] %vm8096_vm15, %v1614_v15 }
 0x2e0   : > { %1742 = vst.msk [vmem:[#allocation4 + $0x56] sm:$0xff] %vm1725_vm14, %v1612_v55  ;;  %1828 = vrot.lane.b32.xlu1 %v5296_v45, %s4879_s21  ;;  %1826 = vrot.lane.b32.xlu0 %v6211_v8, %s4879_s21 }
 0x2e2   : > { %v1618_v3 = vpop.permute.xlu1 %1617  ;;  %v1616_v4 = vpop.permute.xlu0 %1615 }
 0x2e3   : > { %1745 = vst.msk [vmem:[#allocation4 + $0x66] sm:$0xff] %vm1725_vm14, %v1618_v3 }
 0x2e4   : > { %1744 = vst.msk [vmem:[#allocation4 + $0x5e] sm:$0xfc] %vm1723_vm12, %v1616_v4  ;;  %1832 = vrot.lane.b32.xlu1 %v6227_v54, %s4879_s21  ;;  %1830 = vrot.lane.b32.xlu0 %v5302_v46, %s4879_s21 }
 0x2e6   : > { %v1622_v21 = vpop.permute.xlu1 %1621  ;;  %v1620_v11 = vpop.permute.xlu0 %1619 }
 0x2e7   : > { %1747 = vst.msk [vmem:[#allocation4 + $0x6e] sm:$0xfc] %vm1723_vm12, %v1622_v21 }
 0x2e8   : > { %1746 = vst.msk [vmem:[#allocation4 + $0x6e] sm:$0x3] %vm8096_vm15, %v1620_v11  ;;  %1836 = vrot.lane.b32.xlu1 %v5306_v47, %s4879_s21  ;;  %1834 = vrot.lane.b32.xlu0 %v5308_v48, %s4879_s21 }
 0x2ea   : > { %v1626_v8 = vpop.permute.xlu1 %1625  ;;  %v1624_v18 = vpop.permute.xlu0 %1623 }
 0x2eb   : > { %1749 = vst.msk [vmem:[#allocation4 + $0x7e] sm:$0x3] %vm8096_vm15, %v1626_v8 }
 0x2ec   : > { %1748 = vst.msk [vmem:[#allocation4 + $0x76] sm:$0xff] %vm1725_vm14, %v1624_v18  ;;  %1840 = vrot.lane.b32.xlu1 %v5350_v60, %s4879_s21  ;;  %1838 = vrot.lane.b32.xlu0 %v6233_v23, %s4879_s21 }
 0x2ee   : > { %v1630_v54 = vpop.permute.xlu1 %1629  ;;  %v1628_v2 = vpop.permute.xlu0 %1627 }
 0x2ef   : > { %1751 = vst.msk [vmem:[#allocation4 + $0x86] sm:$0xff] %vm1725_vm14, %v1630_v54 }
 0x2f0   : > { %1750 = vst.msk [vmem:[#allocation4 + $0x7e] sm:$0xfc] %vm1723_vm12, %v1628_v2  ;;  %1844 = vrot.lane.b32.xlu1 %v6249_v10, %s4879_s21  ;;  %1842 = vrot.lane.b32.xlu0 %v5348_v59, %s4879_s21 }
 0x2f2   : > { %v1634_v20 = vpop.permute.xlu1 %1633  ;;  %v1632_v12 = vpop.permute.xlu0 %1631 }
 0x2f3   : > { %1753 = vst.msk [vmem:[#allocation4 + $0x8e] sm:$0xfc] %vm1723_vm12, %v1634_v20 }
 0x2f4   : > { %1752 = vst.msk [vmem:[#allocation4 + $0x8e] sm:$0x3] %vm8096_vm15, %v1632_v12  ;;  %1848 = vrot.lane.b32.xlu1 %v5362_v62, %s4879_s21  ;;  %1846 = vrot.lane.b32.xlu0 %v5352_v61, %s4879_s21 }
 0x2f6   : > { %v1638_v23 = vpop.permute.xlu1 %1637  ;;  %v1636_v22 = vpop.permute.xlu0 %1635 }
 0x2f7   : > { %1755 = vst.msk [vmem:[#allocation4 + $0x9e] sm:$0x3] %vm8096_vm15, %v1638_v23 }
 0x2f8   : > { %1754 = vst.msk [vmem:[#allocation4 + $0x96] sm:$0xff] %vm1725_vm14, %v1636_v22  ;;  %1852 = vrot.lane.b32.xlu1 %v5366_v63, %s4879_s21  ;;  %1850 = vrot.lane.b32.xlu0 %v6255_v24, %s4879_s21 }
 0x2fa   : > { %v1642_v10 = vpop.permute.xlu1 %1641  ;;  %v1640_v51 = vpop.permute.xlu0 %1639 }
 0x2fb   : > { %1757 = vst.msk [vmem:[#allocation4 + $0xa6] sm:$0xff] %vm1725_vm14, %v1642_v10 }
 0x2fc   : > { %1756 = vst.msk [vmem:[#allocation4 + $0x9e] sm:$0xfc] %vm1723_vm12, %v1640_v51  ;;  %1856 = vrot.lane.b32.xlu1 %v6276_v57, %s4879_s21  ;;  %1854 = vrot.lane.b32.xlu0 %v5370_v0, %s4879_s21  ;;  %v4829_v57 = vld [vmem:[#allocation2 + $0x198] sm:$0xff] }
 0x2fe   : > { %v1646_v53 = vpop.permute.xlu1 %1645  ;;  %v1644_v58 = vpop.permute.xlu0 %1643 }
 0x2ff   : > { %1759 = vst.msk [vmem:[#allocation4 + $0xae] sm:$0xfc] %vm1723_vm12, %v1646_v53 }
 0x300   : > { %1758 = vst.msk [vmem:[#allocation4 + $0xae] sm:$0x3] %vm8096_vm15, %v1644_v58  ;;  %1860 = vrot.lane.b32.xlu1 %v6287_v50, %s4879_s21  ;;  %1858 = vrot.lane.b32.xlu0 %v6272_v1, %s4879_s21  ;;  %v4831_v1 = vld [vmem:[#allocation2 + $0x1a0] sm:$0xff] }
 0x302   : > { %v1650_v24 = vpop.permute.xlu1 %1649  ;;  %v1648_v49 = vpop.permute.xlu0 %1647 }
 0x303   : > { %1761 = vst.msk [vmem:[#allocation4 + $0xbe] sm:$0x3] %vm8096_vm15, %v1650_v24 }
 0x304   : > { %1760 = vst.msk [vmem:[#allocation4 + $0xb6] sm:$0xff] %vm1725_vm14, %v1648_v49  ;;  %1864 = vrot.lane.b32.xlu1 %v4829_v57, %s4879_s21  ;;  %1862 = vrot.lane.b32.xlu0 %v4830_v16, %s4879_s21 }
 0x306   : > { %v1654_v9 = vpop.permute.xlu1 %1653  ;;  %v1652_v7 = vpop.permute.xlu0 %1651 }
 0x307   : > { %1763 = vst.msk [vmem:[#allocation4 + $0xc6] sm:$0xff] %vm1725_vm14, %v1654_v9 }
 0x308   : > { %1762 = vst.msk [vmem:[#allocation4 + $0xbe] sm:$0xfc] %vm1723_vm12, %v1652_v7  ;;  %1868 = vrot.lane.b32.xlu1 %v5958_v17, %s4879_s21  ;;  %1866 = vrot.lane.b32.xlu0 %v4831_v1, %s4879_s21 }
 0x30a   : > { %v1658_v50 = vpop.permute.xlu1 %1657  ;;  %v1656_v19 = vpop.permute.xlu0 %1655 }
 0x30b   : > { %1765 = vst.msk [vmem:[#allocation4 + $0xce] sm:$0xfc] %vm1723_vm12, %v1658_v50 }
 0x30c   : > { %1764 = vst.msk [vmem:[#allocation4 + $0xce] sm:$0x3] %vm8096_vm15, %v1656_v19 }
 0x30e   : > { %v1662_v6 = vpop.permute.xlu1 %1661  ;;  %v1660_v13 = vpop.permute.xlu0 %1659 }
 0x30f   : > { %1767 = vst.msk [vmem:[#allocation4 + $0xde] sm:$0x3] %vm8096_vm15, %v1662_v6 }
 0x310   : > { %1766 = vst.msk [vmem:[#allocation4 + $0xd6] sm:$0xff] %vm1725_vm14, %v1660_v13 }
 0x312   : > { %v1666_v14 = vpop.permute.xlu1 %1665  ;;  %v1664_v52 = vpop.permute.xlu0 %1663 }
 0x313   : > { %1769 = vst.msk [vmem:[#allocation4 + $0xe6] sm:$0xff] %vm1725_vm14, %v1666_v14 }
 0x314   : > { %1768 = vst.msk [vmem:[#allocation4 + $0xde] sm:$0xfc] %vm1723_vm12, %v1664_v52 }
 0x316   : > { %v1670_v17 = vpop.permute.xlu1 %1669  ;;  %v1668_v5 = vpop.permute.xlu0 %1667 }
 0x317   : > { %1771 = vst.msk [vmem:[#allocation4 + $0xee] sm:$0xfc] %vm1723_vm12, %v1670_v17 }
 0x318   : > { %1770 = vst.msk [vmem:[#allocation4 + $0xee] sm:$0x3] %vm8096_vm15, %v1668_v5 }
 0x31a   : > { %v1674_v56 = vpop.permute.xlu1 %1673  ;;  %v1672_v15 = vpop.permute.xlu0 %1671 }
 0x31b   : > { %1773 = vst.msk [vmem:[#allocation4 + $0xfe] sm:$0x3] %vm8096_vm15, %v1674_v56  ;;  %vm2037_vm15 = vcmask 293888  }
 0x31c   : > { %1772 = vst.msk [vmem:[#allocation4 + $0xf6] sm:$0xff] %vm1725_vm14, %v1672_v15 }
 0x31e   : > { %v1777_v55 = vpop.permute.xlu1 %1776  ;;  %v1775_v3 = vpop.permute.xlu0 %1774 }
 0x31f   : > { %1921 = vst.msk [vmem:[#allocation4 + $0x6] sm:$0xff] %vm1920_vm13, %v1777_v55 }
 0x320   : > { %1919 = vst.msk [vmem:[#allocation4 - $0x2] sm:$0xfc] %vm1918_vm10, %v1775_v3 }
 0x322   : > { %v1781_v4 = vpop.permute.xlu1 %1780  ;;  %v1779_v21 = vpop.permute.xlu0 %1778 }
 0x323   : > { %1924 = vst.msk [vmem:[#allocation4 + $0xe] sm:$0xfc] %vm1918_vm10, %v1781_v4 }
 0x324   : > { %1923 = vst.msk [vmem:[#allocation4 + $0xe] sm:$0x3] %vm1922_vm11, %v1779_v21 }
 0x326   : > { %v1785_v11 = vpop.permute.xlu1 %1784  ;;  %v1783_v8 = vpop.permute.xlu0 %1782 }
 0x327   : > { %1926 = vst.msk [vmem:[#allocation4 + $0x1e] sm:$0x3] %vm1922_vm11, %v1785_v11  ;;  %v1969_v2 = vld [vmem:[#allocation4] sm:$0xff] }
 0x328   : > { %1925 = vst.msk [vmem:[#allocation4 + $0x16] sm:$0xff] %vm1920_vm13, %v1783_v8 }
 0x32a   : > { %v1789_v18 = vpop.permute.xlu1 %1788  ;;  %v1787_v54 = vpop.permute.xlu0 %1786 }
 0x32b   : > { %v1970_v20 = vld [vmem:[#allocation4 + $0x8] sm:$0xff]  ;;  %1928 = vst.msk [vmem:[#allocation4 + $0x26] sm:$0xff] %vm1920_vm13, %v1789_v18 }
 0x32c   : > { %1927 = vst.msk [vmem:[#allocation4 + $0x1e] sm:$0xfc] %vm1918_vm10, %v1787_v54  ;;  %v2001_v12 = vpack.c.bf16 %v1970_v20, %v1969_v2 }
 0x32e   : > { %4717 = vmatprep.mubr.msk.bf16.mxu0 %vm2037_vm15, %v2001_v12  ;;  %v1793_v23 = vpop.permute.xlu1 %1792  ;;  %v1791_v22 = vpop.permute.xlu0 %1790 }
 0x32f   : > { %v1971_v10 = vld [vmem:[#allocation4 + $0x10] sm:$0xff]  ;;  %v1972_v51 = vld [vmem:[#allocation4 + $0x18] sm:$0xff]  ;;  %1930 = vst.msk [vmem:[#allocation4 + $0x2e] sm:$0xfc] %vm1918_vm10, %v1793_v23 }
 0x330   : > { %1929 = vst.msk [vmem:[#allocation4 + $0x2e] sm:$0x3] %vm1922_vm11, %v1791_v22  ;;  %v2002_v53 = vpack.c.bf16 %v1972_v51, %v1971_v10 }
 0x332   : > { %4718 = vmatmul.mubr.msk.bf16.vlgmr.msra.gmra.mrb[0].mxu0 %vm2037_vm15, %v2002_v53  ;;  %v1797_v58 = vpop.permute.xlu1 %1796  ;;  %v1795_v24 = vpop.permute.xlu0 %1794 }
 0x333   : > { %1932 = vst.msk [vmem:[#allocation4 + $0x3e] sm:$0x3] %vm1922_vm11, %v1797_v58  ;;  %v1973_v16 = vld [vmem:[#allocation4 + $0x20] sm:$0xff] }
 0x334   : > { %1931 = vst.msk [vmem:[#allocation4 + $0x36] sm:$0xff] %vm1920_vm13, %v1795_v24 }
 0x336   : > { %v1801_v49 = vpop.permute.xlu1 %1800  ;;  %v1799_v57 = vpop.permute.xlu0 %1798 }
 0x337   : > { %v1974_v9 = vld [vmem:[#allocation4 + $0x28] sm:$0xff]  ;;  %1934 = vst.msk [vmem:[#allocation4 + $0x46] sm:$0xff] %vm1920_vm13, %v1801_v49 }
 0x338   : > { %1933 = vst.msk [vmem:[#allocation4 + $0x3e] sm:$0xfc] %vm1918_vm10, %v1799_v57  ;;  %v2003_v7 = vpack.c.bf16 %v1974_v9, %v1973_v16 }
 0x33a   : > { %4721 = vmatprep.mubr.msk.bf16.mxu0 %vm2037_vm15, %v2003_v7  ;;  %v1805_v1 = vpop.permute.xlu1 %1804  ;;  %v1803_v50 = vpop.permute.xlu0 %1802 }
 0x33b   : > { %v1975_v19 = vld [vmem:[#allocation4 + $0x30] sm:$0xff]  ;;  %v1976_v6 = vld [vmem:[#allocation4 + $0x38] sm:$0xff]  ;;  %1936 = vst.msk [vmem:[#allocation4 + $0x4e] sm:$0xfc] %vm1918_vm10, %v1805_v1 }
 0x33c   : > { %1935 = vst.msk [vmem:[#allocation4 + $0x4e] sm:$0x3] %vm1922_vm11, %v1803_v50  ;;  %v2004_v13 = vpack.c.bf16 %v1976_v6, %v1975_v19 }
 0x33e   : > { %4722 = vmatmul.mubr.msk.bf16.gmra.mrb[4].mxu0 %vm2037_vm15, %v2004_v13  ;;  %v1809_v14 = vpop.permute.xlu1 %1808  ;;  %v1807_v52 = vpop.permute.xlu0 %1806 }
 0x33f   : > { %1938 = vst.msk [vmem:[#allocation4 + $0x5e] sm:$0x3] %vm1922_vm11, %v1809_v14  ;;  %v1977_v56 = vld [vmem:[#allocation4 + $0x40] sm:$0xff] }
 0x340   : > { %1937 = vst.msk [vmem:[#allocation4 + $0x56] sm:$0xff] %vm1920_vm13, %v1807_v52 }
 0x342   : > { %v1813_v17 = vpop.permute.xlu1 %1812  ;;  %v1811_v5 = vpop.permute.xlu0 %1810 }
 0x343   : > { %v1978_v15 = vld [vmem:[#allocation4 + $0x48] sm:$0xff]  ;;  %1940 = vst.msk [vmem:[#allocation4 + $0x66] sm:$0xff] %vm1920_vm13, %v1813_v17 }
 0x344   : > { %1939 = vst.msk [vmem:[#allocation4 + $0x5e] sm:$0xfc] %vm1918_vm10, %v1811_v5  ;;  %v2005_v55 = vpack.c.bf16 %v1978_v15, %v1977_v56 }
 0x346   : > { %4725 = vmatprep.mubr.msk.bf16.mxu0 %vm2037_vm15, %v2005_v55  ;;  %v1817_v3 = vpop.permute.xlu1 %1816  ;;  %v1815_v4 = vpop.permute.xlu0 %1814 }
 0x347   : > { %v1979_v21 = vld [vmem:[#allocation4 + $0x50] sm:$0xff]  ;;  %v1980_v11 = vld [vmem:[#allocation4 + $0x58] sm:$0xff]  ;;  %1942 = vst.msk [vmem:[#allocation4 + $0x6e] sm:$0xfc] %vm1918_vm10, %v1817_v3 }
 0x348   : > { %1941 = vst.msk [vmem:[#allocation4 + $0x6e] sm:$0x3] %vm1922_vm11, %v1815_v4  ;;  %v2006_v8 = vpack.c.bf16 %v1980_v11, %v1979_v21 }
 0x34a   : > { %4726 = vmatmul.mubr.msk.bf16.gmra.mrb[8].mxu0 %vm2037_vm15, %v2006_v8  ;;  %v1821_v18 = vpop.permute.xlu1 %1820  ;;  %v1819_v54 = vpop.permute.xlu0 %1818 }
 0x34b   : > { %1944 = vst.msk [vmem:[#allocation4 + $0x7e] sm:$0x3] %vm1922_vm11, %v1821_v18  ;;  %v1981_v12 = vld [vmem:[#allocation4 + $0x60] sm:$0xff] }
 0x34c   : > { %1943 = vst.msk [vmem:[#allocation4 + $0x76] sm:$0xff] %vm1920_vm13, %v1819_v54 }
 0x34e   : > { %v1825_v2 = vpop.permute.xlu1 %1824  ;;  %v1823_v20 = vpop.permute.xlu0 %1822 }
 0x34f   : > { %v1982_v23 = vld [vmem:[#allocation4 + $0x68] sm:$0xff]  ;;  %1946 = vst.msk [vmem:[#allocation4 + $0x86] sm:$0xff] %vm1920_vm13, %v1825_v2 }
 0x350   : > { %1945 = vst.msk [vmem:[#allocation4 + $0x7e] sm:$0xfc] %vm1918_vm10, %v1823_v20  ;;  %v2007_v22 = vpack.c.bf16 %v1982_v23, %v1981_v12 }
 0x352   : > { %4729 = vmatprep.mubr.msk.bf16.mxu0 %vm2037_vm15, %v2007_v22  ;;  %v1829_v10 = vpop.permute.xlu1 %1828  ;;  %v1827_v51 = vpop.permute.xlu0 %1826 }
 0x353   : > { %v1983_v53 = vld [vmem:[#allocation4 + $0x70] sm:$0xff]  ;;  %v1984_v58 = vld [vmem:[#allocation4 + $0x78] sm:$0xff]  ;;  %1948 = vst.msk [vmem:[#allocation4 + $0x8e] sm:$0xfc] %vm1918_vm10, %v1829_v10 }
 0x354   : > { %1947 = vst.msk [vmem:[#allocation4 + $0x8e] sm:$0x3] %vm1922_vm11, %v1827_v51  ;;  %v2008_v24 = vpack.c.bf16 %v1984_v58, %v1983_v53 }
 0x356   : > { %4730 = vmatmul.mubr.msk.bf16.gmra.mrb[12].mxu0 %vm2037_vm15, %v2008_v24  ;;  %v1833_v49 = vpop.permute.xlu1 %1832  ;;  %v1831_v57 = vpop.permute.xlu0 %1830 }
 0x357   : > { %1950 = vst.msk [vmem:[#allocation4 + $0x9e] sm:$0x3] %vm1922_vm11, %v1833_v49  ;;  %v1985_v7 = vld [vmem:[#allocation4 + $0x80] sm:$0xff] }
 0x358   : > { %1949 = vst.msk [vmem:[#allocation4 + $0x96] sm:$0xff] %vm1920_vm13, %v1831_v57 }
 0x35a   : > { %v1837_v16 = vpop.permute.xlu1 %1836  ;;  %v1835_v9 = vpop.permute.xlu0 %1834 }
 0x35b   : > { %v1986_v1 = vld [vmem:[#allocation4 + $0x88] sm:$0xff]  ;;  %1952 = vst.msk [vmem:[#allocation4 + $0xa6] sm:$0xff] %vm1920_vm13, %v1837_v16 }
 0x35c   : > { %1951 = vst.msk [vmem:[#allocation4 + $0x9e] sm:$0xfc] %vm1918_vm10, %v1835_v9  ;;  %v2009_v50 = vpack.c.bf16 %v1986_v1, %v1985_v7 }
 0x35e   : > { %4733 = vmatprep.mubr.msk.bf16.mxu0 %vm2037_vm15, %v2009_v50  ;;  %v1841_v19 = vpop.permute.xlu1 %1840  ;;  %v1839_v6 = vpop.permute.xlu0 %1838 }
 0x35f   : > { %v1987_v13 = vld [vmem:[#allocation4 + $0x90] sm:$0xff]  ;;  %v1988_v14 = vld [vmem:[#allocation4 + $0x98] sm:$0xff]  ;;  %1954 = vst.msk [vmem:[#allocation4 + $0xae] sm:$0xfc] %vm1918_vm10, %v1841_v19 }
 0x360   : > { %1953 = vst.msk [vmem:[#allocation4 + $0xae] sm:$0x3] %vm1922_vm11, %v1839_v6  ;;  %v2010_v52 = vpack.c.bf16 %v1988_v14, %v1987_v13  ;;  %v6514_v14 = vld [vmem:[%s8084_s2] ss:$0 sm:$0xff] }
 0x362   : > { %4734 = vmatmul.mubr.msk.bf16.gmra.mrb[16].mxu0 %vm2037_vm15, %v2010_v52  ;;  %v1845_v17 = vpop.permute.xlu1 %1844  ;;  %v1843_v5 = vpop.permute.xlu0 %1842 }
 0x363   : > { %1956 = vst.msk [vmem:[#allocation4 + $0xbe] sm:$0x3] %vm1922_vm11, %v1845_v17  ;;  %v1989_v55 = vld [vmem:[#allocation4 + $0xa0] sm:$0xff] }
 0x364   : > { %1955 = vst.msk [vmem:[#allocation4 + $0xb6] sm:$0xff] %vm1920_vm13, %v1843_v5  ;;  %v6519_v17 = vld [vmem:[%s8085_s3] ss:$0 sm:$0xff]  ;;  %v6521_v5 = vld [vmem:[#allocation3] sm:$0xff] }
 0x365   : > { %2502 = vst.msk [vmem:[#allocation4] sm:$0xff] %vm280_vm0, %v6521_v5 }
 0x366   : > { %v1849_v56 = vpop.permute.xlu1 %1848  ;;  %v1847_v15 = vpop.permute.xlu0 %1846 }
 0x367   : > { %v1990_v3 = vld [vmem:[#allocation4 + $0xa8] sm:$0xff]  ;;  %1958 = vst.msk [vmem:[#allocation4 + $0xc6] sm:$0xff] %vm1920_vm13, %v1849_v56 }
 0x368   : > { %1957 = vst.msk [vmem:[#allocation4 + $0xbe] sm:$0xfc] %vm1918_vm10, %v1847_v15  ;;  %v2011_v4 = vpack.c.bf16 %v1990_v3, %v1989_v55 }
 0x36a   : > { %4737 = vmatprep.mubr.msk.bf16.mxu0 %vm2037_vm15, %v2011_v4  ;;  %v1853_v21 = vpop.permute.xlu1 %1852  ;;  %v1851_v11 = vpop.permute.xlu0 %1850 }
 0x36b   : > { %v1991_v8 = vld [vmem:[#allocation4 + $0xb0] sm:$0xff]  ;;  %v1992_v18 = vld [vmem:[#allocation4 + $0xb8] sm:$0xff]  ;;  %1960 = vst.msk [vmem:[#allocation4 + $0xce] sm:$0xfc] %vm1918_vm10, %v1853_v21 }
 0x36c   : > { %1959 = vst.msk [vmem:[#allocation4 + $0xce] sm:$0x3] %vm1922_vm11, %v1851_v11  ;;  %v2012_v54 = vpack.c.bf16 %v1992_v18, %v1991_v8  ;;  %v6529_v8 = vld [vmem:[#allocation3 + $0x8] sm:$0xff] }
 0x36d   : > { %2503 = vst.msk [vmem:[#allocation4 + $0x8] sm:$0xff] %vm280_vm0, %v6529_v8 }
 0x36e   : > { %4738 = vmatmul.mubr.msk.bf16.gmra.mrb[20].mxu0 %vm2037_vm15, %v2012_v54  ;;  %v1857_v2 = vpop.permute.xlu1 %1856  ;;  %v1855_v20 = vpop.permute.xlu0 %1854 }
 0x36f   : > { %1962 = vst.msk [vmem:[#allocation4 + $0xde] sm:$0x3] %vm1922_vm11, %v1857_v2  ;;  %v1993_v22 = vld [vmem:[#allocation4 + $0xc0] sm:$0xff] }
 0x370   : > { %1961 = vst.msk [vmem:[#allocation4 + $0xd6] sm:$0xff] %vm1920_vm13, %v1855_v20 }
 0x372   : > { %v1861_v12 = vpop.permute.xlu1 %1860  ;;  %v1859_v23 = vpop.permute.xlu0 %1858 }
 0x373   : > { %v1994_v10 = vld [vmem:[#allocation4 + $0xc8] sm:$0xff]  ;;  %1964 = vst.msk [vmem:[#allocation4 + $0xe6] sm:$0xff] %vm1920_vm13, %v1861_v12 }
 0x374   : > { %1963 = vst.msk [vmem:[#allocation4 + $0xde] sm:$0xfc] %vm1918_vm10, %v1859_v23  ;;  %v2013_v51 = vpack.c.bf16 %v1994_v10, %v1993_v22 }
 0x376   : > { %4741 = vmatprep.mubr.msk.bf16.mxu0 %vm2037_vm15, %v2013_v51  ;;  %v1865_v53 = vpop.permute.xlu1 %1864  ;;  %v1863_v58 = vpop.permute.xlu0 %1862 }
 0x377   : > { %v1995_v24 = vld [vmem:[#allocation4 + $0xd0] sm:$0xff]  ;;  %v1996_v49 = vld [vmem:[#allocation4 + $0xd8] sm:$0xff]  ;;  %1966 = vst.msk [vmem:[#allocation4 + $0xee] sm:$0xfc] %vm1918_vm10, %v1865_v53 }
 0x378   : > { %1965 = vst.msk [vmem:[#allocation4 + $0xee] sm:$0x3] %vm1922_vm11, %v1863_v58  ;;  %v2014_v57 = vpack.c.bf16 %v1996_v49, %v1995_v24 }
 0x37a   : > { %4742 = vmatmul.mubr.msk.bf16.gmra.mrb[24].mxu0 %vm2037_vm15, %v2014_v57  ;;  %v1869_v16 = vpop.permute.xlu1 %1868  ;;  %v1867_v9 = vpop.permute.xlu0 %1866 }
 0x37b   : > { %1968 = vst.msk [vmem:[#allocation4 + $0xfe] sm:$0x3] %vm1922_vm11, %v1869_v16  ;;  %v1997_v7 = vld [vmem:[#allocation4 + $0xe0] sm:$0xff] }
 0x37c   : > { %1967 = vst.msk [vmem:[#allocation4 + $0xf6] sm:$0xff] %vm1920_vm13, %v1867_v9 }
 0x37f   : > { %v1998_v1 = vld [vmem:[#allocation4 + $0xe8] sm:$0xff] }
 0x380   : > { %v2015_v50 = vpack.c.bf16 %v1998_v1, %v1997_v7 }
 0x382   : > { %4745 = vmatprep.mubr.msk.bf16.mxu0 %vm2037_vm15, %v2015_v50 }
 0x383   : > { %v1999_v19 = vld [vmem:[#allocation4 + $0xf0] sm:$0xff]  ;;  %v2000_v6 = vld [vmem:[#allocation4 + $0xf8] sm:$0xff] }
 0x384   : > { %v2016_v13 = vpack.c.bf16 %v2000_v6, %v1999_v19 }
 0x386   : > { %4746 = vmatmul.mubr.msk.bf16.gmra.mrb[28].mxu0 %vm2037_vm15, %v2016_v13 }
 0x405   : > { %v4719_v52 = vpop.f32.mrb[0].mxu0 }
 0x406   : > { %v2260_v56 = vmul.f32 %v4719_v52, %v6514_v14  ;;  %v2124_v15 = vpop.f32.mrb[1].mxu0 }
 0x407   : > { %v2258_v55 = vmul.f32 %v6514_v14, %v2124_v15  ;;  %v4720_v3 = vpop.f32.mrb[2].mxu0 }
 0x408   : > { %v2299_v4 = vadd.f32 %v6519_v17, %v2260_v56  ;;  %v2261_v21 = vmul.f32 %v4720_v3, %v6514_v14  ;;  %v2127_v11 = vpop.f32.mrb[3].mxu0 }
 0x409   : > { %v2297_v18 = vadd.f32 %v6519_v17, %v2258_v55  ;;  %v2259_v54 = vmul.f32 %v6514_v14, %v2127_v11 }
 0x40a   : > { %v2331_v2 = vmax.f32 %v2299_v4, 0.0  ;;  %v2300_v20 = vadd.f32 %v6519_v17, %v2261_v21 }
 0x40b   : > { %v2329_v12 = vmax.f32 %v2297_v18, 0.0  ;;  %v2298_v23 = vadd.f32 %v6519_v17, %v2259_v54 }
 0x40c   : > { %2418 = vst.msk [vmem:[#allocation3 + $0x31] sm:$0xff] %vm280_vm0, %v2331_v2  ;;  %v2332_v22 = vmax.f32 %v2300_v20, 0.0 }
 0x40d   : > { %2416 = vst.msk [vmem:[#allocation3 + $0x19] sm:$0xff] %vm280_vm0, %v2329_v12  ;;  %v2330_v10 = vmax.f32 %v2298_v23, 0.0 }
 0x40e   : > { %2419 = vst.msk [vmem:[#allocation3 + $0x39] sm:$0xff] %vm280_vm0, %v2332_v22 }
 0x40f   : > { %2417 = vst.msk [vmem:[#allocation3 + $0x21] sm:$0xff] %vm280_vm0, %v2330_v10 }
 0x411   : > { %v4723_v51 = vpop.f32.mrb[4].mxu0 }
 0x412   : > { %v2264_v53 = vmul.f32 %v4723_v51, %v6514_v14  ;;  %v2140_v58 = vpop.f32.mrb[5].mxu0 }
 0x413   : > { %v2262_v24 = vmul.f32 %v6514_v14, %v2140_v58  ;;  %v4724_v49 = vpop.f32.mrb[6].mxu0  ;;  %v6543_v57 = vld [vmem:[#allocation3 + $0x30] sm:$0xff] }
 0x414   : > { %v2303_v16 = vadd.f32 %v6519_v17, %v2264_v53  ;;  %v2265_v9 = vmul.f32 %v4724_v49, %v6514_v14  ;;  %v2143_v7 = vpop.f32.mrb[7].mxu0  ;;  %v6547_v1 = vld [vmem:[#allocation3 + $0x18] sm:$0xff]  ;;  %2506 = vst.msk [vmem:[#allocation4 + $0x20] sm:$0xff] %vm280_vm0, %v6543_v57 }
 0x415   : > { %v2301_v50 = vadd.f32 %v6519_v17, %v2262_v24  ;;  %v2263_v19 = vmul.f32 %v6514_v14, %v2143_v7  ;;  %2566 = vrot.lane.b32.xlu0 %v6547_v1, %s4872_s8  ;;  %2504 = vst.msk [vmem:[#allocation4 + $0x10] sm:$0xff] %vm280_vm0, %v6547_v1  ;;  %v6557_v6 = vld [vmem:[#allocation3 + $0x38] sm:$0xff] }
 0x416   : > { %v2335_v13 = vmax.f32 %v2303_v16, 0.0  ;;  %v2304_v52 = vadd.f32 %v6519_v17, %v2265_v9  ;;  %v6560_v56 = vld [vmem:[#allocation3 + $0x20] sm:$0xff]  ;;  %2507 = vst.msk [vmem:[#allocation4 + $0x28] sm:$0xff] %vm280_vm0, %v6557_v6 }
 0x417   : > { %v2333_v15 = vmax.f32 %v2301_v50, 0.0  ;;  %v2302_v55 = vadd.f32 %v6519_v17, %v2263_v19  ;;  %2568 = vrot.lane.b32.xlu1 %v6560_v56, %s4872_s8  ;;  %2505 = vst.msk [vmem:[#allocation4 + $0x18] sm:$0xff] %vm280_vm0, %v6560_v56 }
 0x418   : > { %2422 = vst.msk [vmem:[#allocation3 + $0x61] sm:$0xff] %vm280_vm0, %v2335_v13  ;;  %v2336_v3 = vmax.f32 %v2304_v52, 0.0 }
 0x419   : > { %2420 = vst.msk [vmem:[#allocation3 + $0x49] sm:$0xff] %vm280_vm0, %v2333_v15  ;;  %v2334_v4 = vmax.f32 %v2302_v55, 0.0  ;;  %2570 = vrot.lane.b32.xlu0 %v6543_v57, %s4872_s8 }
 0x41a   : > { %2423 = vst.msk [vmem:[#allocation3 + $0x69] sm:$0xff] %vm280_vm0, %v2336_v3 }
 0x41b   : > { %2421 = vst.msk [vmem:[#allocation3 + $0x51] sm:$0xff] %vm280_vm0, %v2334_v4  ;;  %2572 = vrot.lane.b32.xlu1 %v6557_v6, %s4872_s8 }
 0x41d   : > { %v4727_v21 = vpop.f32.mrb[8].mxu0 }
 0x41e   : > { %v2268_v11 = vmul.f32 %v4727_v21, %v6514_v14  ;;  %v2156_v18 = vpop.f32.mrb[9].mxu0 }
 0x41f   : > { %v2266_v54 = vmul.f32 %v6514_v14, %v2156_v18  ;;  %v4728_v2 = vpop.f32.mrb[10].mxu0  ;;  %v6579_v20 = vld [vmem:[#allocation3 + $0x60] sm:$0xff] }
 0x420   : > { %v2307_v12 = vadd.f32 %v6519_v17, %v2268_v11  ;;  %v2269_v23 = vmul.f32 %v4728_v2, %v6514_v14  ;;  %v2159_v22 = vpop.f32.mrb[11].mxu0  ;;  %v6583_v10 = vld [vmem:[#allocation3 + $0x48] sm:$0xff]  ;;  %2510 = vst.msk [vmem:[#allocation4 + $0x40] sm:$0xff] %vm280_vm0, %v6579_v20 }
 0x421   : > { %v2305_v51 = vadd.f32 %v6519_v17, %v2266_v54  ;;  %v2267_v53 = vmul.f32 %v6514_v14, %v2159_v22  ;;  %2574 = vrot.lane.b32.xlu0 %v6583_v10, %s4872_s8  ;;  %2508 = vst.msk [vmem:[#allocation4 + $0x30] sm:$0xff] %vm280_vm0, %v6583_v10  ;;  %v6593_v58 = vld [vmem:[#allocation3 + $0x68] sm:$0xff] }
 0x422   : > { %v2339_v24 = vmax.f32 %v2307_v12, 0.0  ;;  %v2308_v49 = vadd.f32 %v6519_v17, %v2269_v23  ;;  %v6596_v16 = vld [vmem:[#allocation3 + $0x50] sm:$0xff]  ;;  %2511 = vst.msk [vmem:[#allocation4 + $0x48] sm:$0xff] %vm280_vm0, %v6593_v58 }
 0x423   : > { %v2337_v9 = vmax.f32 %v2305_v51, 0.0  ;;  %v2306_v7 = vadd.f32 %v6519_v17, %v2267_v53  ;;  %2576 = vrot.lane.b32.xlu1 %v6596_v16, %s4872_s8  ;;  %2509 = vst.msk [vmem:[#allocation4 + $0x38] sm:$0xff] %vm280_vm0, %v6596_v16 }
 0x424   : > { %2426 = vst.msk [vmem:[#allocation3 + $0x91] sm:$0xff] %vm280_vm0, %v2339_v24  ;;  %v2340_v50 = vmax.f32 %v2308_v49, 0.0 }
 0x425   : > { %2424 = vst.msk [vmem:[#allocation3 + $0x79] sm:$0xff] %vm280_vm0, %v2337_v9  ;;  %v2338_v19 = vmax.f32 %v2306_v7, 0.0  ;;  %2578 = vrot.lane.b32.xlu0 %v6579_v20, %s4872_s8 }
 0x426   : > { %2427 = vst.msk [vmem:[#allocation3 + $0x99] sm:$0xff] %vm280_vm0, %v2340_v50 }
 0x427   : > { %2425 = vst.msk [vmem:[#allocation3 + $0x81] sm:$0xff] %vm280_vm0, %v2338_v19  ;;  %2580 = vrot.lane.b32.xlu1 %v6593_v58, %s4872_s8 }
 0x429   : > { %v4731_v13 = vpop.f32.mrb[12].mxu0 }
 0x42a   : > { %v2272_v52 = vmul.f32 %v4731_v13, %v6514_v14  ;;  %v2172_v15 = vpop.f32.mrb[13].mxu0 }
 0x42b   : > { %v2270_v55 = vmul.f32 %v6514_v14, %v2172_v15  ;;  %v4732_v3 = vpop.f32.mrb[14].mxu0  ;;  %v6615_v4 = vld [vmem:[#allocation3 + $0x90] sm:$0xff] }
 0x42c   : > { %v2311_v21 = vadd.f32 %v6519_v17, %v2272_v52  ;;  %v2273_v11 = vmul.f32 %v4732_v3, %v6514_v14  ;;  %v2175_v18 = vpop.f32.mrb[15].mxu0  ;;  %v6619_v54 = vld [vmem:[#allocation3 + $0x78] sm:$0xff]  ;;  %2514 = vst.msk [vmem:[#allocation4 + $0x60] sm:$0xff] %vm280_vm0, %v6615_v4 }
 0x42d   : > { %v2309_v2 = vadd.f32 %v6519_v17, %v2270_v55  ;;  %v2271_v12 = vmul.f32 %v6514_v14, %v2175_v18  ;;  %2582 = vrot.lane.b32.xlu0 %v6619_v54, %s4872_s8  ;;  %2512 = vst.msk [vmem:[#allocation4 + $0x50] sm:$0xff] %vm280_vm0, %v6619_v54  ;;  %v6629_v23 = vld [vmem:[#allocation3 + $0x98] sm:$0xff] }
 0x42e   : > { %v2343_v22 = vmax.f32 %v2311_v21, 0.0  ;;  %v2312_v51 = vadd.f32 %v6519_v17, %v2273_v11  ;;  %v6632_v53 = vld [vmem:[#allocation3 + $0x80] sm:$0xff]  ;;  %2515 = vst.msk [vmem:[#allocation4 + $0x68] sm:$0xff] %vm280_vm0, %v6629_v23 }
 0x42f   : > { %v2341_v24 = vmax.f32 %v2309_v2, 0.0  ;;  %v2310_v49 = vadd.f32 %v6519_v17, %v2271_v12  ;;  %2584 = vrot.lane.b32.xlu1 %v6632_v53, %s4872_s8  ;;  %2513 = vst.msk [vmem:[#allocation4 + $0x58] sm:$0xff] %vm280_vm0, %v6632_v53 }
 0x430   : > { %2430 = vst.msk [vmem:[#allocation3 + $0xc1] sm:$0xff] %vm280_vm0, %v2343_v22  ;;  %v2344_v9 = vmax.f32 %v2312_v51, 0.0 }
 0x431   : > { %2428 = vst.msk [vmem:[#allocation3 + $0xa9] sm:$0xff] %vm280_vm0, %v2341_v24  ;;  %v2342_v7 = vmax.f32 %v2310_v49, 0.0  ;;  %2586 = vrot.lane.b32.xlu0 %v6615_v4, %s4872_s8 }
 0x432   : > { %2431 = vst.msk [vmem:[#allocation3 + $0xc9] sm:$0xff] %vm280_vm0, %v2344_v9 }
 0x433   : > { %2429 = vst.msk [vmem:[#allocation3 + $0xb1] sm:$0xff] %vm280_vm0, %v2342_v7  ;;  %2588 = vrot.lane.b32.xlu1 %v6629_v23, %s4872_s8 }
 0x435   : > { %v4735_v50 = vpop.f32.mrb[16].mxu0 }
 0x436   : > { %v2276_v19 = vmul.f32 %v4735_v50, %v6514_v14  ;;  %v2188_v13 = vpop.f32.mrb[17].mxu0 }
 0x437   : > { %v2274_v52 = vmul.f32 %v6514_v14, %v2188_v13  ;;  %v4736_v15 = vpop.f32.mrb[18].mxu0  ;;  %v6651_v55 = vld [vmem:[#allocation3 + $0xc0] sm:$0xff] }
 0x438   : > { %v2315_v3 = vadd.f32 %v6519_v17, %v2276_v19  ;;  %v2277_v21 = vmul.f32 %v4736_v15, %v6514_v14  ;;  %v2191_v11 = vpop.f32.mrb[19].mxu0  ;;  %v6655_v18 = vld [vmem:[#allocation3 + $0xa8] sm:$0xff]  ;;  %2518 = vst.msk [vmem:[#allocation4 + $0x80] sm:$0xff] %vm280_vm0, %v6651_v55 }
 0x439   : > { %v2313_v2 = vadd.f32 %v6519_v17, %v2274_v52  ;;  %v2275_v12 = vmul.f32 %v6514_v14, %v2191_v11  ;;  %2590 = vrot.lane.b32.xlu0 %v6655_v18, %s4872_s8  ;;  %2516 = vst.msk [vmem:[#allocation4 + $0x70] sm:$0xff] %vm280_vm0, %v6655_v18  ;;  %v6665_v22 = vld [vmem:[#allocation3 + $0xc8] sm:$0xff] }
 0x43a   : > { %v2347_v51 = vmax.f32 %v2315_v3, 0.0  ;;  %v2316_v24 = vadd.f32 %v6519_v17, %v2277_v21  ;;  %v6668_v49 = vld [vmem:[#allocation3 + $0xb0] sm:$0xff]  ;;  %2519 = vst.msk [vmem:[#allocation4 + $0x88] sm:$0xff] %vm280_vm0, %v6665_v22 }
 0x43b   : > { %v2345_v9 = vmax.f32 %v2313_v2, 0.0  ;;  %v2314_v7 = vadd.f32 %v6519_v17, %v2275_v12  ;;  %2592 = vrot.lane.b32.xlu1 %v6668_v49, %s4872_s8  ;;  %2517 = vst.msk [vmem:[#allocation4 + $0x78] sm:$0xff] %vm280_vm0, %v6668_v49 }
 0x43c   : > { %2434 = vst.msk [vmem:[#allocation3 + $0xf1] sm:$0xff] %vm280_vm0, %v2347_v51  ;;  %v2348_v50 = vmax.f32 %v2316_v24, 0.0 }
 0x43d   : > { %2432 = vst.msk [vmem:[#allocation3 + $0xd9] sm:$0xff] %vm280_vm0, %v2345_v9  ;;  %v2346_v19 = vmax.f32 %v2314_v7, 0.0  ;;  %2594 = vrot.lane.b32.xlu0 %v6651_v55, %s4872_s8 }
 0x43e   : > { %2435 = vst.msk [vmem:[#allocation3 + $0xf9] sm:$0xff] %vm280_vm0, %v2348_v50 }
 0x43f   : > { %2433 = vst.msk [vmem:[#allocation3 + $0xe1] sm:$0xff] %vm280_vm0, %v2346_v19  ;;  %2596 = vrot.lane.b32.xlu1 %v6665_v22, %s4872_s8 }
 0x441   : > { %v4739_v13 = vpop.f32.mrb[20].mxu0 }
 0x442   : > { %v2280_v52 = vmul.f32 %v4739_v13, %v6514_v14  ;;  %v2204_v15 = vpop.f32.mrb[21].mxu0 }
 0x443   : > { %v2278_v3 = vmul.f32 %v6514_v14, %v2204_v15  ;;  %v4740_v21 = vpop.f32.mrb[22].mxu0  ;;  %v6687_v11 = vld [vmem:[#allocation3 + $0xf0] sm:$0xff] }
 0x444   : > { %v2319_v2 = vadd.f32 %v6519_v17, %v2280_v52  ;;  %v2281_v12 = vmul.f32 %v4740_v21, %v6514_v14  ;;  %v2207_v51 = vpop.f32.mrb[23].mxu0  ;;  %v6691_v24 = vld [vmem:[#allocation3 + $0xd8] sm:$0xff]  ;;  %2522 = vst.msk [vmem:[#allocation4 + $0xa0] sm:$0xff] %vm280_vm0, %v6687_v11 }
 0x445   : > { %v2317_v9 = vadd.f32 %v6519_v17, %v2278_v3  ;;  %v2279_v7 = vmul.f32 %v6514_v14, %v2207_v51  ;;  %2598 = vrot.lane.b32.xlu0 %v6691_v24, %s4872_s8  ;;  %2520 = vst.msk [vmem:[#allocation4 + $0x90] sm:$0xff] %vm280_vm0, %v6691_v24  ;;  %v6701_v50 = vld [vmem:[#allocation3 + $0xf8] sm:$0xff] }
 0x446   : > { %v2351_v19 = vmax.f32 %v2319_v2, 0.0  ;;  %v2320_v13 = vadd.f32 %v6519_v17, %v2281_v12  ;;  %v6704_v52 = vld [vmem:[#allocation3 + $0xe0] sm:$0xff]  ;;  %2523 = vst.msk [vmem:[#allocation4 + $0xa8] sm:$0xff] %vm280_vm0, %v6701_v50 }
 0x447   : > { %v2349_v15 = vmax.f32 %v2317_v9, 0.0  ;;  %v2318_v3 = vadd.f32 %v6519_v17, %v2279_v7  ;;  %2600 = vrot.lane.b32.xlu1 %v6704_v52, %s4872_s8  ;;  %2521 = vst.msk [vmem:[#allocation4 + $0x98] sm:$0xff] %vm280_vm0, %v6704_v52 }
 0x448   : > { %2438 = vst.msk [vmem:[#allocation3 + $0x121] sm:$0xff] %vm280_vm0, %v2351_v19  ;;  %v2352_v21 = vmax.f32 %v2320_v13, 0.0 }
 0x449   : > { %2436 = vst.msk [vmem:[#allocation3 + $0x109] sm:$0xff] %vm280_vm0, %v2349_v15  ;;  %v2350_v2 = vmax.f32 %v2318_v3, 0.0  ;;  %2602 = vrot.lane.b32.xlu0 %v6687_v11, %s4872_s8 }
 0x44a   : > { %2439 = vst.msk [vmem:[#allocation3 + $0x129] sm:$0xff] %vm280_vm0, %v2352_v21 }
 0x44b   : > { %2437 = vst.msk [vmem:[#allocation3 + $0x111] sm:$0xff] %vm280_vm0, %v2350_v2  ;;  %2604 = vrot.lane.b32.xlu1 %v6701_v50, %s4872_s8 }
 0x44d   : > { %v4743_v12 = vpop.f32.mrb[24].mxu0 }
 0x44e   : > { %v2284_v51 = vmul.f32 %v4743_v12, %v6514_v14  ;;  %v2220_v9 = vpop.f32.mrb[25].mxu0 }
 0x44f   : > { %v2282_v7 = vmul.f32 %v6514_v14, %v2220_v9  ;;  %v4744_v19 = vpop.f32.mrb[26].mxu0  ;;  %v6723_v13 = vld [vmem:[#allocation3 + $0x120] sm:$0xff] }
 0x450   : > { %v2323_v15 = vadd.f32 %v6519_v17, %v2284_v51  ;;  %v2285_v3 = vmul.f32 %v4744_v19, %v6514_v14  ;;  %v2223_v0 = vpop.f32.mrb[27].mxu0  ;;  %v6727_v21 = vld [vmem:[#allocation3 + $0x108] sm:$0xff]  ;;  %2526 = vst.msk [vmem:[#allocation4 + $0xc0] sm:$0xff] %vm280_vm0, %v6723_v13 }
 0x451   : > { %v2321_v2 = vadd.f32 %v6519_v17, %v2282_v7  ;;  %v2283_v12 = vmul.f32 %v6514_v14, %v2223_v0  ;;  %2606 = vrot.lane.b32.xlu0 %v6727_v21, %s4872_s8  ;;  %2524 = vst.msk [vmem:[#allocation4 + $0xb0] sm:$0xff] %vm280_vm0, %v6727_v21  ;;  %v6737_v9 = vld [vmem:[#allocation3 + $0x128] sm:$0xff] }
 0x452   : > { %v2355_v51 = vmax.f32 %v2323_v15, 0.0  ;;  %v2324_v19 = vadd.f32 %v6519_v17, %v2285_v3  ;;  %v6740_v63 = vld [vmem:[#allocation3 + $0x110] sm:$0xff]  ;;  %2527 = vst.msk [vmem:[#allocation4 + $0xc8] sm:$0xff] %vm280_vm0, %v6737_v9 }
 0x453   : > { %v2353_v59 = vmax.f32 %v2321_v2, 0.0  ;;  %v2322_v7 = vadd.f32 %v6519_v17, %v2283_v12  ;;  %2608 = vrot.lane.b32.xlu1 %v6740_v63, %s4872_s8  ;;  %2525 = vst.msk [vmem:[#allocation4 + $0xb8] sm:$0xff] %vm280_vm0, %v6740_v63 }
 0x454   : > { %2442 = vst.msk [vmem:[#allocation3 + $0x151] sm:$0xff] %vm280_vm0, %v2355_v51  ;;  %v2356_v0 = vmax.f32 %v2324_v19, 0.0 }
 0x455   : > { %2440 = vst.msk [vmem:[#allocation3 + $0x139] sm:$0xff] %vm280_vm0, %v2353_v59  ;;  %v2354_v15 = vmax.f32 %v2322_v7, 0.0  ;;  %2610 = vrot.lane.b32.xlu0 %v6723_v13, %s4872_s8 }
 0x456   : > { %2443 = vst.msk [vmem:[#allocation3 + $0x159] sm:$0xff] %vm280_vm0, %v2356_v0 }
 0x457   : > { %2441 = vst.msk [vmem:[#allocation3 + $0x141] sm:$0xff] %vm280_vm0, %v2354_v15  ;;  %2612 = vrot.lane.b32.xlu1 %v6737_v9, %s4872_s8 }
 0x459   : > { %v4747_v3 = vpop.f32.mrb[28].mxu0 }
 0x45a   : > { %v2288_v2 = vmul.f32 %v4747_v3, %v6514_v14  ;;  %v2236_v12 = vpop.f32.mrb[29].mxu0 }
 0x45b   : > { %v2286_v51 = vmul.f32 %v6514_v14, %v2236_v12  ;;  %v4748_v19 = vpop.f32.mrb[30].mxu0  ;;  %v6759_v60 = vld [vmem:[#allocation3 + $0x150] sm:$0xff] }
 0x45c   : > { %v2327_v59 = vadd.f32 %v6519_v17, %v2288_v2  ;;  %v2289_v7 = vmul.f32 %v4748_v19, %v6514_v14  ;;  %v2239_v62 = vpop.f32.mrb[31].mxu0  ;;  %v6763_v0 = vld [vmem:[#allocation3 + $0x138] sm:$0xff]  ;;  %2530 = vst.msk [vmem:[#allocation4 + $0xe0] sm:$0xff] %vm280_vm0, %v6759_v60 }
 0x45d   : > { %v2325_v15 = vadd.f32 %v6519_v17, %v2286_v51  ;;  %v2287_v3 = vmul.f32 %v6514_v14, %v2239_v62  ;;  %2614 = vrot.lane.b32.xlu0 %v6763_v0, %s4872_s8  ;;  %2528 = vst.msk [vmem:[#allocation4 + $0xd0] sm:$0xff] %vm280_vm0, %v6763_v0  ;;  %v6773_v12 = vld [vmem:[#allocation3 + $0x158] sm:$0xff] }
 0x45e   : > { %v2359_v2 = vmax.f32 %v2327_v59, 0.0  ;;  %v2328_v19 = vadd.f32 %v6519_v17, %v2289_v7  ;;  %v6776_v61 = vld [vmem:[#allocation3 + $0x140] sm:$0xff]  ;;  %2531 = vst.msk [vmem:[#allocation4 + $0xe8] sm:$0xff] %vm280_vm0, %v6773_v12 }
 0x45f   : > { %v2357_v46 = vmax.f32 %v2325_v15, 0.0  ;;  %v2326_v51 = vadd.f32 %v6519_v17, %v2287_v3  ;;  %2616 = vrot.lane.b32.xlu1 %v6776_v61, %s4872_s8  ;;  %2529 = vst.msk [vmem:[#allocation4 + $0xd8] sm:$0xff] %vm280_vm0, %v6776_v61 }
 0x460   : > { %2446 = vst.msk [vmem:[#allocation3 + $0x181] sm:$0xff] %vm280_vm0, %v2359_v2  ;;  %v2360_v62 = vmax.f32 %v2328_v19, 0.0 }
 0x461   : > { %2444 = vst.msk [vmem:[#allocation3 + $0x169] sm:$0xff] %vm280_vm0, %v2357_v46  ;;  %v2358_v14 = vmax.f32 %v2326_v51, 0.0  ;;  %2618 = vrot.lane.b32.xlu0 %v6759_v60, %s4872_s8 }
 0x462   : > { %2447 = vst.msk [vmem:[#allocation3 + $0x189] sm:$0xff] %vm280_vm0, %v2360_v62 }
 0x463   : > { %2445 = vst.msk [vmem:[#allocation3 + $0x171] sm:$0xff] %vm280_vm0, %v2358_v14  ;;  %2620 = vrot.lane.b32.xlu1 %v6773_v12, %s4872_s8 }
 0x467   : > { %v6805_v59 = vld [vmem:[#allocation3 + $0x180] sm:$0xff] }
 0x468   : > { %v6793_v17 = vld [vmem:[#allocation3 + $0x168] sm:$0xff] }
 0x469   : > { %2622 = vrot.lane.b32.xlu0 %v6793_v17, %s4872_s8  ;;  %2532 = vst.msk [vmem:[#allocation4 + $0xf0] sm:$0xff] %vm280_vm0, %v6793_v17  ;;  %v6809_v7 = vld [vmem:[#allocation3 + $0x188] sm:$0xff] }
 0x46a   : > { %v6799_v46 = vld [vmem:[#allocation3 + $0x170] sm:$0xff] }
 0x46b   : > { %2624 = vrot.lane.b32.xlu1 %v6799_v46, %s4872_s8  ;;  %2533 = vst.msk [vmem:[#allocation4 + $0xf8] sm:$0xff] %vm280_vm0, %v6799_v46 }
 0x46d   : > { %2626 = vrot.lane.b32.xlu0 %v6805_v59, %s4872_s8 }
 0x46f   : > { %2628 = vrot.lane.b32.xlu1 %v6809_v7, %s4872_s8 }
 0x471   : > { %2696 = vrot.lane.b32.xlu0 %v6543_v57, %s4873_s9 }
 0x473   : > { %2698 = vrot.lane.b32.xlu1 %v6557_v6, %s4873_s9 }
 0x475   : > { %2700 = vrot.lane.b32.xlu0 %v6583_v10, %s4873_s9 }
 0x477   : > { %2702 = vrot.lane.b32.xlu1 %v6596_v16, %s4873_s9 }
 0x479   : > { %2704 = vrot.lane.b32.xlu0 %v6579_v20, %s4873_s9 }
 0x47b   : > { %2706 = vrot.lane.b32.xlu1 %v6593_v58, %s4873_s9 }
 0x47d   : > { %2708 = vrot.lane.b32.xlu0 %v6619_v54, %s4873_s9 }
 0x47f   : > { %2710 = vrot.lane.b32.xlu1 %v6632_v53, %s4873_s9 }
 0x481   : > { %2712 = vrot.lane.b32.xlu0 %v6615_v4, %s4873_s9 }
 0x483   : > { %2714 = vrot.lane.b32.xlu1 %v6629_v23, %s4873_s9 }
 0x485   : > { %2716 = vrot.lane.b32.xlu0 %v6655_v18, %s4873_s9 }
 0x487   : > { %v2567_v15 = vpop.permute.xlu0 %2566  ;;  %2718 = vrot.lane.b32.xlu1 %v6668_v49, %s4873_s9 }
 0x488   : > { %2662 = vst.msk [vmem:[#allocation4] sm:$0xff] %vm615_vm2, %v2567_v15 }
 0x489   : > { %v2569_v3 = vpop.permute.xlu1 %2568  ;;  %2720 = vrot.lane.b32.xlu0 %v6651_v55, %s4873_s9 }
 0x48a   : > { %2663 = vst.msk [vmem:[#allocation4 + $0x8] sm:$0xff] %vm615_vm2, %v2569_v3 }
 0x48b   : > { %v2571_v2 = vpop.permute.xlu0 %2570  ;;  %2722 = vrot.lane.b32.xlu1 %v6665_v22, %s4873_s9 }
 0x48c   : > { %2664 = vst.msk [vmem:[#allocation4 + $0x10] sm:$0xff] %vm615_vm2, %v2571_v2 }
 0x48d   : > { %v2573_v19 = vpop.permute.xlu1 %2572  ;;  %2724 = vrot.lane.b32.xlu0 %v6691_v24, %s4873_s9 }
 0x48e   : > { %2665 = vst.msk [vmem:[#allocation4 + $0x18] sm:$0xff] %vm615_vm2, %v2573_v19 }
 0x48f   : > { %2726 = vrot.lane.b32.xlu1 %v6704_v52, %s4873_s9 }
 0x491   : > { %2728 = vrot.lane.b32.xlu0 %v6687_v11, %s4873_s9 }
 0x493   : > { %v2575_v51 = vpop.permute.xlu0 %2574  ;;  %2730 = vrot.lane.b32.xlu1 %v6701_v50, %s4873_s9 }
 0x494   : > { %2666 = vst.msk [vmem:[#allocation4 + $0x20] sm:$0xff] %vm615_vm2, %v2575_v51 }
 0x495   : > { %v2577_v62 = vpop.permute.xlu1 %2576  ;;  %2732 = vrot.lane.b32.xlu0 %v6727_v21, %s4873_s9 }
 0x496   : > { %2667 = vst.msk [vmem:[#allocation4 + $0x28] sm:$0xff] %vm615_vm2, %v2577_v62  ;;  %v2499_v62 = vld [vmem:[#allocation3 + $0x198] sm:$0xff] }
 0x497   : > { %v2579_v14 = vpop.permute.xlu0 %2578  ;;  %2734 = vrot.lane.b32.xlu1 %v6740_v63, %s4873_s9 }
 0x498   : > { %2668 = vst.msk [vmem:[#allocation4 + $0x30] sm:$0xff] %vm615_vm2, %v2579_v14 }
 0x499   : > { %v2581_v15 = vpop.permute.xlu1 %2580  ;;  %2736 = vrot.lane.b32.xlu0 %v6723_v13, %s4873_s9 }
 0x49a   : > { %2669 = vst.msk [vmem:[#allocation4 + $0x38] sm:$0xff] %vm615_vm2, %v2581_v15  ;;  %v2500_v15 = vld [vmem:[#allocation3 + $0x1a0] sm:$0xff] }
 0x49b   : > { %2738 = vrot.lane.b32.xlu1 %v6737_v9, %s4873_s9 }
 0x49d   : > { %2740 = vrot.lane.b32.xlu0 %v6763_v0, %s4873_s9 }
 0x49f   : > { %v2583_v3 = vpop.permute.xlu0 %2582  ;;  %2742 = vrot.lane.b32.xlu1 %v6776_v61, %s4873_s9 }
 0x4a0   : > { %2670 = vst.msk [vmem:[#allocation4 + $0x40] sm:$0xff] %vm615_vm2, %v2583_v3 }
 0x4a1   : > { %v2585_v2 = vpop.permute.xlu1 %2584  ;;  %2744 = vrot.lane.b32.xlu0 %v6759_v60, %s4873_s9 }
 0x4a2   : > { %2671 = vst.msk [vmem:[#allocation4 + $0x48] sm:$0xff] %vm615_vm2, %v2585_v2 }
 0x4a3   : > { %v2587_v19 = vpop.permute.xlu0 %2586  ;;  %2746 = vrot.lane.b32.xlu1 %v6773_v12, %s4873_s9 }
 0x4a4   : > { %2672 = vst.msk [vmem:[#allocation4 + $0x50] sm:$0xff] %vm615_vm2, %v2587_v19 }
 0x4a5   : > { %v2589_v51 = vpop.permute.xlu1 %2588  ;;  %2748 = vrot.lane.b32.xlu0 %v6793_v17, %s4873_s9 }
 0x4a6   : > { %2673 = vst.msk [vmem:[#allocation4 + $0x58] sm:$0xff] %vm615_vm2, %v2589_v51  ;;  %v6893_v51 = vld [vmem:[#allocation3 + $0x10] sm:$0x3] }
 0x4a7   : > { %2750 = vrot.lane.b32.xlu1 %v6799_v46, %s4873_s9 }
 0x4a9   : > { %2752 = vrot.lane.b32.xlu0 %v6805_v59, %s4873_s9 }
 0x4ab   : > { %v2591_v14 = vpop.permute.xlu0 %2590  ;;  %2754 = vrot.lane.b32.xlu1 %v6809_v7, %s4873_s9 }
 0x4ac   : > { %2674 = vst.msk [vmem:[#allocation4 + $0x60] sm:$0xff] %vm615_vm2, %v2591_v14 }
 0x4ad   : > { %v2593_v3 = vpop.permute.xlu1 %2592  ;;  %2756 = vrot.lane.b32.xlu0 %v2499_v62, %s4873_s9 }
 0x4ae   : > { %2675 = vst.msk [vmem:[#allocation4 + $0x68] sm:$0xff] %vm615_vm2, %v2593_v3 }
 0x4af   : > { %v2595_v2 = vpop.permute.xlu0 %2594  ;;  %2758 = vrot.lane.b32.xlu1 %v2500_v15, %s4873_s9  ;;  %v6905_v15 = vld [vmem:[#allocation3 + $0x28] sm:$0x3] }
 0x4b0   : > { %2676 = vst.msk [vmem:[#allocation4 + $0x70] sm:$0xff] %vm615_vm2, %v2595_v2 }
 0x4b1   : > { %v2597_v19 = vpop.permute.xlu1 %2596  ;;  %2842 = vrot.lane.b32.xlu0 %v6521_v5, %s4874_s10 }
 0x4b2   : > { %2677 = vst.msk [vmem:[#allocation4 + $0x78] sm:$0xff] %vm615_vm2, %v2597_v19  ;;  %v6915_v19 = vld [vmem:[#allocation3 + $0x40] sm:$0x3] }
 0x4b3   : > { %2844 = vrot.lane.b32.xlu1 %v6529_v8, %s4874_s10 }
 0x4b5   : > { %2846 = vrot.lane.b32.xlu0 %v6893_v51, %s4874_s10 }
 0x4b7   : > { %v2599_v62 = vpop.permute.xlu0 %2598  ;;  %2848 = vrot.lane.b32.xlu1 %v6547_v1, %s4874_s10 }
 0x4b8   : > { %2678 = vst.msk [vmem:[#allocation4 + $0x80] sm:$0xff] %vm615_vm2, %v2599_v62 }
 0x4b9   : > { %v2601_v14 = vpop.permute.xlu1 %2600  ;;  %2850 = vrot.lane.b32.xlu0 %v6560_v56, %s4874_s10 }
 0x4ba   : > { %2679 = vst.msk [vmem:[#allocation4 + $0x88] sm:$0xff] %vm615_vm2, %v2601_v14 }
 0x4bb   : > { %v2603_v3 = vpop.permute.xlu0 %2602  ;;  %2852 = vrot.lane.b32.xlu1 %v6905_v15, %s4874_s10 }
 0x4bc   : > { %2680 = vst.msk [vmem:[#allocation4 + $0x90] sm:$0xff] %vm615_vm2, %v2603_v3  ;;  %v6925_v3 = vld [vmem:[#allocation3 + $0x58] sm:$0x3] }
 0x4bd   : > { %v2605_v2 = vpop.permute.xlu1 %2604  ;;  %2854 = vrot.lane.b32.xlu0 %v6543_v57, %s4874_s10 }
 0x4be   : > { %2681 = vst.msk [vmem:[#allocation4 + $0x98] sm:$0xff] %vm615_vm2, %v2605_v2 }
 0x4bf   : > { %2856 = vrot.lane.b32.xlu1 %v6557_v6, %s4874_s10 }
 0x4c1   : > { %2858 = vrot.lane.b32.xlu0 %v6915_v19, %s4874_s10 }
 0x4c3   : > { %v2607_v62 = vpop.permute.xlu0 %2606  ;;  %2860 = vrot.lane.b32.xlu1 %v6583_v10, %s4874_s10 }
 0x4c4   : > { %2682 = vst.msk [vmem:[#allocation4 + $0xa0] sm:$0xff] %vm615_vm2, %v2607_v62  ;;  %v6935_v62 = vld [vmem:[#allocation3 + $0x70] sm:$0x3] }
 0x4c5   : > { %v2609_v14 = vpop.permute.xlu1 %2608  ;;  %2862 = vrot.lane.b32.xlu0 %v6596_v16, %s4874_s10 }
 0x4c6   : > { %2683 = vst.msk [vmem:[#allocation4 + $0xa8] sm:$0xff] %vm615_vm2, %v2609_v14 }
 0x4c7   : > { %v2611_v2 = vpop.permute.xlu0 %2610  ;;  %2864 = vrot.lane.b32.xlu1 %v6925_v3, %s4874_s10 }
 0x4c8   : > { %2684 = vst.msk [vmem:[#allocation4 + $0xb0] sm:$0xff] %vm615_vm2, %v2611_v2 }
 0x4c9   : > { %v2613_v45 = vpop.permute.xlu1 %2612  ;;  %2866 = vrot.lane.b32.xlu0 %v6579_v20, %s4874_s10 }
 0x4ca   : > { %2685 = vst.msk [vmem:[#allocation4 + $0xb8] sm:$0xff] %vm615_vm2, %v2613_v45  ;;  %v6945_v45 = vld [vmem:[#allocation3 + $0x88] sm:$0x3] }
 0x4cb   : > { %2868 = vrot.lane.b32.xlu1 %v6593_v58, %s4874_s10 }
 0x4cd   : > { %2870 = vrot.lane.b32.xlu0 %v6935_v62, %s4874_s10 }
 0x4cf   : > { %v2615_v14 = vpop.permute.xlu0 %2614  ;;  %2872 = vrot.lane.b32.xlu1 %v6619_v54, %s4874_s10 }
 0x4d0   : > { %2686 = vst.msk [vmem:[#allocation4 + $0xc0] sm:$0xff] %vm615_vm2, %v2615_v14  ;;  %v6955_v14 = vld [vmem:[#allocation3 + $0xa0] sm:$0x3] }
 0x4d1   : > { %v2617_v2 = vpop.permute.xlu1 %2616  ;;  %2874 = vrot.lane.b32.xlu0 %v6632_v53, %s4874_s10 }
 0x4d2   : > { %2687 = vst.msk [vmem:[#allocation4 + $0xc8] sm:$0xff] %vm615_vm2, %v2617_v2 }
 0x4d3   : > { %v2619_v47 = vpop.permute.xlu0 %2618  ;;  %2876 = vrot.lane.b32.xlu1 %v6945_v45, %s4874_s10 }
 0x4d4   : > { %2688 = vst.msk [vmem:[#allocation4 + $0xd0] sm:$0xff] %vm615_vm2, %v2619_v47 }
 0x4d5   : > { %v2621_v48 = vpop.permute.xlu1 %2620  ;;  %2878 = vrot.lane.b32.xlu0 %v6615_v4, %s4874_s10 }
 0x4d6   : > { %2689 = vst.msk [vmem:[#allocation4 + $0xd8] sm:$0xff] %vm615_vm2, %v2621_v48  ;;  %v6965_v48 = vld [vmem:[#allocation3 + $0xb8] sm:$0x3] }
 0x4d7   : > { %2880 = vrot.lane.b32.xlu1 %v6629_v23, %s4874_s10 }
 0x4d9   : > { %2882 = vrot.lane.b32.xlu0 %v6955_v14, %s4874_s10 }
 0x4db   : > { %v2623_v2 = vpop.permute.xlu0 %2622  ;;  %2884 = vrot.lane.b32.xlu1 %v6655_v18, %s4874_s10 }
 0x4dc   : > { %2690 = vst.msk [vmem:[#allocation4 + $0xe0] sm:$0xff] %vm615_vm2, %v2623_v2 }
 0x4dd   : > { %2886 = vrot.lane.b32.xlu0 %v6668_v49, %s4874_s10  ;;  %v2625_v47 = vpop.permute.xlu1 %2624 }
 0x4de   : > { %2691 = vst.msk [vmem:[#allocation4 + $0xe8] sm:$0xff] %vm615_vm2, %v2625_v47  ;;  %v6976_v47 = vld [vmem:[#allocation3 + $0xd0] sm:$0x3] }
 0x4df   : > { %v2627_v41 = vpop.permute.xlu0 %2626  ;;  %2888 = vrot.lane.b32.xlu1 %v6965_v48, %s4874_s10 }
 0x4e0   : > { %2692 = vst.msk [vmem:[#allocation4 + $0xf0] sm:$0xff] %vm615_vm2, %v2627_v41 }
 0x4e1   : > { %2890 = vrot.lane.b32.xlu0 %v6651_v55, %s4874_s10  ;;  %v2629_v42 = vpop.permute.xlu1 %2628 }
 0x4e2   : > { %2693 = vst.msk [vmem:[#allocation4 + $0xf8] sm:$0xff] %vm615_vm2, %v2629_v42  ;;  %vm8140_vm2 = vcmask 195745  }
 0x4e3   : > { %v2697_v2 = vpop.permute.xlu0 %2696  ;;  %2892 = vrot.lane.b32.xlu1 %v6665_v22, %s4874_s10 }
 0x4e4   : > { %2792 = vst.msk [vmem:[#allocation4] sm:$0xff] %vm746_vm3, %v2697_v2  ;;  %v6987_v2 = vld [vmem:[#allocation3 + $0xe8] sm:$0x3] }
 0x4e5   : > { %2894 = vrot.lane.b32.xlu0 %v6976_v47, %s4874_s10  ;;  %v2699_v43 = vpop.permute.xlu1 %2698 }
 0x4e6   : > { %2793 = vst.msk [vmem:[#allocation4 + $0x8] sm:$0xff] %vm746_vm3, %v2699_v43 }
 0x4e7   : > { %v2701_v41 = vpop.permute.xlu0 %2700  ;;  %2896 = vrot.lane.b32.xlu1 %v6691_v24, %s4874_s10 }
 0x4e8   : > { %2794 = vst.msk [vmem:[#allocation4 + $0x10] sm:$0xff] %vm746_vm3, %v2701_v41 }
 0x4e9   : > { %2898 = vrot.lane.b32.xlu0 %v6704_v52, %s4874_s10  ;;  %v2703_v42 = vpop.permute.xlu1 %2702 }
 0x4ea   : > { %2795 = vst.msk [vmem:[#allocation4 + $0x18] sm:$0xff] %vm746_vm3, %v2703_v42  ;;  %v6998_v42 = vld [vmem:[#allocation3 + $0x100] sm:$0x3] }
 0x4eb   : > { %v2705_v44 = vpop.permute.xlu0 %2704  ;;  %2900 = vrot.lane.b32.xlu1 %v6987_v2, %s4874_s10 }
 0x4ec   : > { %2796 = vst.msk [vmem:[#allocation4 + $0x20] sm:$0xff] %vm746_vm3, %v2705_v44 }
 0x4ed   : > { %2902 = vrot.lane.b32.xlu0 %v6687_v11, %s4874_s10  ;;  %v2707_v43 = vpop.permute.xlu1 %2706 }
 0x4ee   : > { %2797 = vst.msk [vmem:[#allocation4 + $0x28] sm:$0xff] %vm746_vm3, %v2707_v43 }
 0x4ef   : > { %v2709_v41 = vpop.permute.xlu0 %2708  ;;  %2904 = vrot.lane.b32.xlu1 %v6701_v50, %s4874_s10 }
 0x4f0   : > { %2798 = vst.msk [vmem:[#allocation4 + $0x30] sm:$0xff] %vm746_vm3, %v2709_v41  ;;  %v7009_v41 = vld [vmem:[#allocation3 + $0x118] sm:$0x3] }
 0x4f1   : > { %2906 = vrot.lane.b32.xlu0 %v6998_v42, %s4874_s10  ;;  %v2711_v37 = vpop.permute.xlu1 %2710 }
 0x4f2   : > { %2799 = vst.msk [vmem:[#allocation4 + $0x38] sm:$0xff] %vm746_vm3, %v2711_v37 }
 0x4f3   : > { %v2713_v44 = vpop.permute.xlu0 %2712  ;;  %2908 = vrot.lane.b32.xlu1 %v6727_v21, %s4874_s10 }
 0x4f4   : > { %2800 = vst.msk [vmem:[#allocation4 + $0x40] sm:$0xff] %vm746_vm3, %v2713_v44 }
 0x4f5   : > { %2910 = vrot.lane.b32.xlu0 %v6740_v63, %s4874_s10  ;;  %v2715_v43 = vpop.permute.xlu1 %2714 }
 0x4f6   : > { %2801 = vst.msk [vmem:[#allocation4 + $0x48] sm:$0xff] %vm746_vm3, %v2715_v43  ;;  %v7020_v43 = vld [vmem:[#allocation3 + $0x130] sm:$0x3] }
 0x4f7   : > { %v2717_v38 = vpop.permute.xlu0 %2716  ;;  %2912 = vrot.lane.b32.xlu1 %v7009_v41, %s4874_s10 }
 0x4f8   : > { %2802 = vst.msk [vmem:[#allocation4 + $0x50] sm:$0xff] %vm746_vm3, %v2717_v38 }
 0x4f9   : > { %2914 = vrot.lane.b32.xlu0 %v6723_v13, %s4874_s10  ;;  %v2719_v37 = vpop.permute.xlu1 %2718 }
 0x4fa   : > { %2803 = vst.msk [vmem:[#allocation4 + $0x58] sm:$0xff] %vm746_vm3, %v2719_v37 }
 0x4fb   : > { %v2721_v44 = vpop.permute.xlu0 %2720  ;;  %2916 = vrot.lane.b32.xlu1 %v6737_v9, %s4874_s10 }
 0x4fc   : > { %2804 = vst.msk [vmem:[#allocation4 + $0x60] sm:$0xff] %vm746_vm3, %v2721_v44  ;;  %v7031_v44 = vld [vmem:[#allocation3 + $0x148] sm:$0x3] }
 0x4fd   : > { %2918 = vrot.lane.b32.xlu0 %v7020_v43, %s4874_s10  ;;  %v2723_v40 = vpop.permute.xlu1 %2722 }
 0x4fe   : > { %2805 = vst.msk [vmem:[#allocation4 + $0x68] sm:$0xff] %vm746_vm3, %v2723_v40 }
 0x4ff   : > { %v2725_v38 = vpop.permute.xlu0 %2724  ;;  %2920 = vrot.lane.b32.xlu1 %v6763_v0, %s4874_s10 }
 0x500   : > { %2806 = vst.msk [vmem:[#allocation4 + $0x70] sm:$0xff] %vm746_vm3, %v2725_v38 }
 0x501   : > { %2922 = vrot.lane.b32.xlu0 %v6776_v61, %s4874_s10  ;;  %v2727_v37 = vpop.permute.xlu1 %2726 }
 0x502   : > { %2807 = vst.msk [vmem:[#allocation4 + $0x78] sm:$0xff] %vm746_vm3, %v2727_v37  ;;  %v7042_v37 = vld [vmem:[#allocation3 + $0x160] sm:$0x3] }
 0x503   : > { %v2729_v39 = vpop.permute.xlu0 %2728  ;;  %2924 = vrot.lane.b32.xlu1 %v7031_v44, %s4874_s10 }
 0x504   : > { %2808 = vst.msk [vmem:[#allocation4 + $0x80] sm:$0xff] %vm746_vm3, %v2729_v39 }
 0x505   : > { %2926 = vrot.lane.b32.xlu0 %v6759_v60, %s4874_s10  ;;  %v2731_v40 = vpop.permute.xlu1 %2730 }
 0x506   : > { %2809 = vst.msk [vmem:[#allocation4 + $0x88] sm:$0xff] %vm746_vm3, %v2731_v40 }
 0x507   : > { %v2733_v38 = vpop.permute.xlu0 %2732  ;;  %2928 = vrot.lane.b32.xlu1 %v6773_v12, %s4874_s10 }
 0x508   : > { %2810 = vst.msk [vmem:[#allocation4 + $0x90] sm:$0xff] %vm746_vm3, %v2733_v38  ;;  %v7053_v38 = vld [vmem:[#allocation3 + $0x178] sm:$0x3] }
 0x509   : > { %2930 = vrot.lane.b32.xlu0 %v7042_v37, %s4874_s10  ;;  %v2735_v34 = vpop.permute.xlu1 %2734 }
 0x50a   : > { %2811 = vst.msk [vmem:[#allocation4 + $0x98] sm:$0xff] %vm746_vm3, %v2735_v34 }
 0x50b   : > { %v2737_v39 = vpop.permute.xlu0 %2736  ;;  %2932 = vrot.lane.b32.xlu1 %v6793_v17, %s4874_s10 }
 0x50c   : > { %2812 = vst.msk [vmem:[#allocation4 + $0xa0] sm:$0xff] %vm746_vm3, %v2737_v39 }
 0x50d   : > { %2934 = vrot.lane.b32.xlu0 %v6799_v46, %s4874_s10  ;;  %v2739_v40 = vpop.permute.xlu1 %2738 }
 0x50e   : > { %2813 = vst.msk [vmem:[#allocation4 + $0xa8] sm:$0xff] %vm746_vm3, %v2739_v40 }
 0x50f   : > { %v2741_v33 = vpop.permute.xlu0 %2740  ;;  %2936 = vrot.lane.b32.xlu1 %v7053_v38, %s4874_s10 }
 0x510   : > { %2814 = vst.msk [vmem:[#allocation4 + $0xb0] sm:$0xff] %vm746_vm3, %v2741_v33 }
 0x511   : > { %3035 = vrot.lane.b32.xlu0 %v6547_v1, %s4875_s11  ;;  %v2743_v34 = vpop.permute.xlu1 %2742 }
 0x512   : > { %2815 = vst.msk [vmem:[#allocation4 + $0xb8] sm:$0xff] %vm746_vm3, %v2743_v34 }
 0x513   : > { %v2745_v39 = vpop.permute.xlu0 %2744  ;;  %3037 = vrot.lane.b32.xlu1 %v6560_v56, %s4875_s11 }
 0x514   : > { %2816 = vst.msk [vmem:[#allocation4 + $0xc0] sm:$0xff] %vm746_vm3, %v2745_v39 }
 0x515   : > { %3039 = vrot.lane.b32.xlu0 %v6905_v15, %s4875_s11  ;;  %v2747_v40 = vpop.permute.xlu1 %2746 }
 0x516   : > { %2817 = vst.msk [vmem:[#allocation4 + $0xc8] sm:$0xff] %vm746_vm3, %v2747_v40 }
 0x517   : > { %v2749_v35 = vpop.permute.xlu0 %2748  ;;  %3041 = vrot.lane.b32.xlu1 %v6543_v57, %s4875_s11 }
 0x518   : > { %2818 = vst.msk [vmem:[#allocation4 + $0xd0] sm:$0xff] %vm746_vm3, %v2749_v35 }
 0x519   : > { %3043 = vrot.lane.b32.xlu0 %v6557_v6, %s4875_s11  ;;  %v2751_v33 = vpop.permute.xlu1 %2750 }
 0x51a   : > { %2819 = vst.msk [vmem:[#allocation4 + $0xd8] sm:$0xff] %vm746_vm3, %v2751_v33 }
 0x51b   : > { %v2753_v34 = vpop.permute.xlu0 %2752  ;;  %3045 = vrot.lane.b32.xlu1 %v6915_v19, %s4875_s11 }
 0x51c   : > { %2820 = vst.msk [vmem:[#allocation4 + $0xe0] sm:$0xff] %vm746_vm3, %v2753_v34 }
 0x51d   : > { %3047 = vrot.lane.b32.xlu0 %v6583_v10, %s4875_s11  ;;  %v2755_v39 = vpop.permute.xlu1 %2754 }
 0x51e   : > { %2821 = vst.msk [vmem:[#allocation4 + $0xe8] sm:$0xff] %vm746_vm3, %v2755_v39 }
 0x51f   : > { %v2757_v40 = vpop.permute.xlu0 %2756  ;;  %3049 = vrot.lane.b32.xlu1 %v6596_v16, %s4875_s11 }
 0x520   : > { %2822 = vst.msk [vmem:[#allocation4 + $0xf0] sm:$0xff] %vm746_vm3, %v2757_v40 }
 0x521   : > { %3051 = vrot.lane.b32.xlu0 %v6925_v3, %s4875_s11  ;;  %v2759_v35 = vpop.permute.xlu1 %2758 }
 0x522   : > { %2823 = vst.msk [vmem:[#allocation4 + $0xf8] sm:$0xff] %vm746_vm3, %v2759_v35  ;;  %vm8141_vm3 = vcmask 195744  }
 0x523   : > { %v2843_v33 = vpop.permute.xlu0 %2842  ;;  %3053 = vrot.lane.b32.xlu1 %v6579_v20, %s4875_s11 }
 0x524   : > { %2986 = vst.msk [vmem:[#allocation4 - $0x1] sm:$0xfe] %vm941_vm5, %v2843_v33 }
 0x525   : > { %3055 = vrot.lane.b32.xlu0 %v6593_v58, %s4875_s11  ;;  %v2845_v34 = vpop.permute.xlu1 %2844 }
 0x526   : > { %2987 = vst.msk [vmem:[#allocation4 + $0x7] sm:$0xff] %vm943_vm4, %v2845_v34 }
 0x527   : > { %v2847_v39 = vpop.permute.xlu0 %2846  ;;  %3057 = vrot.lane.b32.xlu1 %v6935_v62, %s4875_s11 }
 0x528   : > { %2988 = vst.msk [vmem:[#allocation4 + $0xf] sm:$0x1] %vm945_vm6, %v2847_v39 }
 0x529   : > { %3059 = vrot.lane.b32.xlu0 %v6619_v54, %s4875_s11  ;;  %v2849_v40 = vpop.permute.xlu1 %2848 }
 0x52a   : > { %2989 = vst.msk [vmem:[#allocation4 + $0xf] sm:$0xfe] %vm941_vm5, %v2849_v40 }
 0x52b   : > { %v2851_v35 = vpop.permute.xlu0 %2850  ;;  %3061 = vrot.lane.b32.xlu1 %v6632_v53, %s4875_s11 }
 0x52c   : > { %2990 = vst.msk [vmem:[#allocation4 + $0x17] sm:$0xff] %vm943_vm4, %v2851_v35 }
 0x52d   : > { %3063 = vrot.lane.b32.xlu0 %v6945_v45, %s4875_s11  ;;  %v2853_v33 = vpop.permute.xlu1 %2852 }
 0x52e   : > { %2991 = vst.msk [vmem:[#allocation4 + $0x1f] sm:$0x1] %vm945_vm6, %v2853_v33 }
 0x52f   : > { %v2855_v34 = vpop.permute.xlu0 %2854  ;;  %3065 = vrot.lane.b32.xlu1 %v6615_v4, %s4875_s11 }
 0x530   : > { %2992 = vst.msk [vmem:[#allocation4 + $0x1f] sm:$0xfe] %vm941_vm5, %v2855_v34 }
 0x531   : > { %3067 = vrot.lane.b32.xlu0 %v6629_v23, %s4875_s11  ;;  %v2857_v39 = vpop.permute.xlu1 %2856 }
 0x532   : > { %2993 = vst.msk [vmem:[#allocation4 + $0x27] sm:$0xff] %vm943_vm4, %v2857_v39 }
 0x533   : > { %v2859_v40 = vpop.permute.xlu0 %2858  ;;  %3069 = vrot.lane.b32.xlu1 %v6955_v14, %s4875_s11 }
 0x534   : > { %2994 = vst.msk [vmem:[#allocation4 + $0x2f] sm:$0x1] %vm945_vm6, %v2859_v40 }
 0x535   : > { %3071 = vrot.lane.b32.xlu0 %v6655_v18, %s4875_s11  ;;  %v2861_v35 = vpop.permute.xlu1 %2860 }
 0x536   : > { %2995 = vst.msk [vmem:[#allocation4 + $0x2f] sm:$0xfe] %vm941_vm5, %v2861_v35 }
 0x537   : > { %v2863_v33 = vpop.permute.xlu0 %2862  ;;  %3073 = vrot.lane.b32.xlu1 %v6668_v49, %s4875_s11 }
 0x538   : > { %2996 = vst.msk [vmem:[#allocation4 + $0x37] sm:$0xff] %vm943_vm4, %v2863_v33 }
 0x539   : > { %3075 = vrot.lane.b32.xlu0 %v6965_v48, %s4875_s11  ;;  %v2865_v34 = vpop.permute.xlu1 %2864 }
 0x53a   : > { %2997 = vst.msk [vmem:[#allocation4 + $0x3f] sm:$0x1] %vm945_vm6, %v2865_v34 }
 0x53b   : > { %v2867_v39 = vpop.permute.xlu0 %2866  ;;  %3077 = vrot.lane.b32.xlu1 %v6651_v55, %s4875_s11 }
 0x53c   : > { %2998 = vst.msk [vmem:[#allocation4 + $0x3f] sm:$0xfe] %vm941_vm5, %v2867_v39 }
 0x53d   : > { %3079 = vrot.lane.b32.xlu0 %v6665_v22, %s4875_s11  ;;  %v2869_v40 = vpop.permute.xlu1 %2868 }
 0x53e   : > { %2999 = vst.msk [vmem:[#allocation4 + $0x47] sm:$0xff] %vm943_vm4, %v2869_v40 }
 0x53f   : > { %v2871_v35 = vpop.permute.xlu0 %2870  ;;  %3081 = vrot.lane.b32.xlu1 %v6976_v47, %s4875_s11 }
 0x540   : > { %3000 = vst.msk [vmem:[#allocation4 + $0x4f] sm:$0x1] %vm945_vm6, %v2871_v35 }
 0x541   : > { %3083 = vrot.lane.b32.xlu0 %v6691_v24, %s4875_s11  ;;  %v2873_v33 = vpop.permute.xlu1 %2872 }
 0x542   : > { %3001 = vst.msk [vmem:[#allocation4 + $0x4f] sm:$0xfe] %vm941_vm5, %v2873_v33 }
 0x543   : > { %v2875_v34 = vpop.permute.xlu0 %2874  ;;  %3085 = vrot.lane.b32.xlu1 %v6704_v52, %s4875_s11 }
 0x544   : > { %3002 = vst.msk [vmem:[#allocation4 + $0x57] sm:$0xff] %vm943_vm4, %v2875_v34 }
 0x545   : > { %3087 = vrot.lane.b32.xlu0 %v6987_v2, %s4875_s11  ;;  %v2877_v39 = vpop.permute.xlu1 %2876 }
 0x546   : > { %3003 = vst.msk [vmem:[#allocation4 + $0x5f] sm:$0x1] %vm945_vm6, %v2877_v39 }
 0x547   : > { %v2879_v40 = vpop.permute.xlu0 %2878  ;;  %3089 = vrot.lane.b32.xlu1 %v6687_v11, %s4875_s11 }
 0x548   : > { %3004 = vst.msk [vmem:[#allocation4 + $0x5f] sm:$0xfe] %vm941_vm5, %v2879_v40 }
 0x549   : > { %3091 = vrot.lane.b32.xlu0 %v6701_v50, %s4875_s11  ;;  %v2881_v35 = vpop.permute.xlu1 %2880 }
 0x54a   : > { %3005 = vst.msk [vmem:[#allocation4 + $0x67] sm:$0xff] %vm943_vm4, %v2881_v35 }
 0x54b   : > { %v2883_v33 = vpop.permute.xlu0 %2882  ;;  %3093 = vrot.lane.b32.xlu1 %v6998_v42, %s4875_s11 }
 0x54c   : > { %3006 = vst.msk [vmem:[#allocation4 + $0x6f] sm:$0x1] %vm945_vm6, %v2883_v33 }
 0x54d   : > { %3095 = vrot.lane.b32.xlu0 %v6727_v21, %s4875_s11  ;;  %v2885_v34 = vpop.permute.xlu1 %2884 }
 0x54e   : > { %3007 = vst.msk [vmem:[#allocation4 + $0x6f] sm:$0xfe] %vm941_vm5, %v2885_v34 }
 0x54f   : > { %v2887_v39 = vpop.permute.xlu0 %2886  ;;  %3097 = vrot.lane.b32.xlu1 %v6740_v63, %s4875_s11 }
 0x550   : > { %3008 = vst.msk [vmem:[#allocation4 + $0x77] sm:$0xff] %vm943_vm4, %v2887_v39 }
 0x551   : > { %3099 = vrot.lane.b32.xlu0 %v7009_v41, %s4875_s11  ;;  %v2889_v40 = vpop.permute.xlu1 %2888 }
 0x552   : > { %3009 = vst.msk [vmem:[#allocation4 + $0x7f] sm:$0x1] %vm945_vm6, %v2889_v40 }
 0x553   : > { %v2891_v35 = vpop.permute.xlu0 %2890  ;;  %3101 = vrot.lane.b32.xlu1 %v6723_v13, %s4875_s11 }
 0x554   : > { %3010 = vst.msk [vmem:[#allocation4 + $0x7f] sm:$0xfe] %vm941_vm5, %v2891_v35 }
 0x555   : > { %3103 = vrot.lane.b32.xlu0 %v6737_v9, %s4875_s11  ;;  %v2893_v33 = vpop.permute.xlu1 %2892 }
 0x556   : > { %3011 = vst.msk [vmem:[#allocation4 + $0x87] sm:$0xff] %vm943_vm4, %v2893_v33 }
 0x557   : > { %v2895_v34 = vpop.permute.xlu0 %2894  ;;  %3105 = vrot.lane.b32.xlu1 %v7020_v43, %s4875_s11 }
 0x558   : > { %3012 = vst.msk [vmem:[#allocation4 + $0x8f] sm:$0x1] %vm945_vm6, %v2895_v34 }
 0x559   : > { %3107 = vrot.lane.b32.xlu0 %v6763_v0, %s4875_s11  ;;  %v2897_v39 = vpop.permute.xlu1 %2896 }
 0x55a   : > { %3013 = vst.msk [vmem:[#allocation4 + $0x8f] sm:$0xfe] %vm941_vm5, %v2897_v39 }
 0x55b   : > { %v2899_v40 = vpop.permute.xlu0 %2898  ;;  %3109 = vrot.lane.b32.xlu1 %v6776_v61, %s4875_s11 }
 0x55c   : > { %3014 = vst.msk [vmem:[#allocation4 + $0x97] sm:$0xff] %vm943_vm4, %v2899_v40 }
 0x55d   : > { %3111 = vrot.lane.b32.xlu0 %v7031_v44, %s4875_s11  ;;  %v2901_v35 = vpop.permute.xlu1 %2900 }
 0x55e   : > { %3015 = vst.msk [vmem:[#allocation4 + $0x9f] sm:$0x1] %vm945_vm6, %v2901_v35 }
 0x55f   : > { %v2903_v43 = vpop.permute.xlu0 %2902  ;;  %3113 = vrot.lane.b32.xlu1 %v6759_v60, %s4875_s11 }
 0x560   : > { %3016 = vst.msk [vmem:[#allocation4 + $0x9f] sm:$0xfe] %vm941_vm5, %v2903_v43  ;;  %v2498_v43 = vld [vmem:[#allocation3 + $0x190] sm:$0x3] }
 0x561   : > { %3115 = vrot.lane.b32.xlu0 %v6773_v12, %s4875_s11  ;;  %v2905_v33 = vpop.permute.xlu1 %2904 }
 0x562   : > { %3017 = vst.msk [vmem:[#allocation4 + $0xa7] sm:$0xff] %vm943_vm4, %v2905_v33 }
 0x563   : > { %v2907_v34 = vpop.permute.xlu0 %2906  ;;  %3117 = vrot.lane.b32.xlu1 %v7042_v37, %s4875_s11 }
 0x564   : > { %3018 = vst.msk [vmem:[#allocation4 + $0xaf] sm:$0x1] %vm945_vm6, %v2907_v34 }
 0x565   : > { %3119 = vrot.lane.b32.xlu0 %v6793_v17, %s4875_s11  ;;  %v2909_v44 = vpop.permute.xlu1 %2908 }
 0x566   : > { %3019 = vst.msk [vmem:[#allocation4 + $0xaf] sm:$0xfe] %vm941_vm5, %v2909_v44 }
 0x567   : > { %v2911_v39 = vpop.permute.xlu0 %2910  ;;  %3121 = vrot.lane.b32.xlu1 %v6799_v46, %s4875_s11 }
 0x568   : > { %3020 = vst.msk [vmem:[#allocation4 + $0xb7] sm:$0xff] %vm943_vm4, %v2911_v39 }
 0x569   : > { %3123 = vrot.lane.b32.xlu0 %v7053_v38, %s4875_s11  ;;  %v2913_v40 = vpop.permute.xlu1 %2912 }
 0x56a   : > { %3021 = vst.msk [vmem:[#allocation4 + $0xbf] sm:$0x1] %vm945_vm6, %v2913_v40 }
 0x56b   : > { %v2915_v37 = vpop.permute.xlu0 %2914  ;;  %3125 = vrot.lane.b32.xlu1 %v6805_v59, %s4875_s11 }
 0x56c   : > { %3022 = vst.msk [vmem:[#allocation4 + $0xbf] sm:$0xfe] %vm941_vm5, %v2915_v37 }
 0x56d   : > { %3127 = vrot.lane.b32.xlu0 %v6809_v7, %s4875_s11  ;;  %v2917_v35 = vpop.permute.xlu1 %2916 }
 0x56e   : > { %3023 = vst.msk [vmem:[#allocation4 + $0xc7] sm:$0xff] %vm943_vm4, %v2917_v35 }
 0x56f   : > { %v2919_v33 = vpop.permute.xlu0 %2918  ;;  %3129 = vrot.lane.b32.xlu1 %v2498_v43, %s4875_s11 }
 0x570   : > { %3024 = vst.msk [vmem:[#allocation4 + $0xcf] sm:$0x1] %vm945_vm6, %v2919_v33 }
 0x571   : > { %3228 = vrot.lane.b32.xlu0 %v6543_v57, %s4876_s12  ;;  %v2921_v38 = vpop.permute.xlu1 %2920 }
 0x572   : > { %3025 = vst.msk [vmem:[#allocation4 + $0xcf] sm:$0xfe] %vm941_vm5, %v2921_v38 }
 0x573   : > { %v2923_v59 = vpop.permute.xlu0 %2922  ;;  %3230 = vrot.lane.b32.xlu1 %v6557_v6, %s4876_s12 }
 0x574   : > { %3026 = vst.msk [vmem:[#allocation4 + $0xd7] sm:$0xff] %vm943_vm4, %v2923_v59 }
 0x575   : > { %3232 = vrot.lane.b32.xlu0 %v6915_v19, %s4876_s12  ;;  %v2925_v7 = vpop.permute.xlu1 %2924 }
 0x576   : > { %3027 = vst.msk [vmem:[#allocation4 + $0xdf] sm:$0x1] %vm945_vm6, %v2925_v7 }
 0x577   : > { %v2927_v34 = vpop.permute.xlu0 %2926  ;;  %3234 = vrot.lane.b32.xlu1 %v6583_v10, %s4876_s12 }
 0x578   : > { %3028 = vst.msk [vmem:[#allocation4 + $0xdf] sm:$0xfe] %vm941_vm5, %v2927_v34 }
 0x579   : > { %3236 = vrot.lane.b32.xlu0 %v6596_v16, %s4876_s12  ;;  %v2929_v44 = vpop.permute.xlu1 %2928 }
 0x57a   : > { %3029 = vst.msk [vmem:[#allocation4 + $0xe7] sm:$0xff] %vm943_vm4, %v2929_v44 }
 0x57b   : > { %v2931_v39 = vpop.permute.xlu0 %2930  ;;  %3238 = vrot.lane.b32.xlu1 %v6925_v3, %s4876_s12 }
 0x57c   : > { %3030 = vst.msk [vmem:[#allocation4 + $0xef] sm:$0x1] %vm945_vm6, %v2931_v39 }
 0x57d   : > { %3240 = vrot.lane.b32.xlu0 %v6579_v20, %s4876_s12  ;;  %v2933_v40 = vpop.permute.xlu1 %2932 }
 0x57e   : > { %3031 = vst.msk [vmem:[#allocation4 + $0xef] sm:$0xfe] %vm941_vm5, %v2933_v40  ;;  %vm8143_vm5 = vmmov %vm8140_vm2 }
 0x57f   : > { %v2935_v37 = vpop.permute.xlu0 %2934  ;;  %3242 = vrot.lane.b32.xlu1 %v6593_v58, %s4876_s12 }
 0x580   : > { %3032 = vst.msk [vmem:[#allocation4 + $0xf7] sm:$0xff] %vm943_vm4, %v2935_v37  ;;  %vm8142_vm4 = vcmask 188576  }
 0x581   : > { %3244 = vrot.lane.b32.xlu0 %v6935_v62, %s4876_s12  ;;  %v2937_v35 = vpop.permute.xlu1 %2936 }
 0x582   : > { %3033 = vst.msk [vmem:[#allocation4 + $0xff] sm:$0x1] %vm945_vm6, %v2937_v35  ;;  %vm8144_vm6 = vmmov %vm8141_vm3 }
 0x583   : > { %v3036_v43 = vpop.permute.xlu0 %3035  ;;  %3246 = vrot.lane.b32.xlu1 %v6619_v54, %s4876_s12 }
 0x584   : > { %3179 = vst.msk [vmem:[#allocation4 - $0x1] sm:$0xfe] %vm1137_vm8, %v3036_v43 }
 0x585   : > { %3248 = vrot.lane.b32.xlu0 %v6632_v53, %s4876_s12  ;;  %v3038_v33 = vpop.permute.xlu1 %3037 }
 0x586   : > { %3180 = vst.msk [vmem:[#allocation4 + $0x7] sm:$0xff] %vm1139_vm7, %v3038_v33 }
 0x587   : > { %v3040_v38 = vpop.permute.xlu0 %3039  ;;  %3250 = vrot.lane.b32.xlu1 %v6945_v45, %s4876_s12 }
 0x588   : > { %3181 = vst.msk [vmem:[#allocation4 + $0xf] sm:$0x1] %vm1141_vm9, %v3040_v38 }
 0x589   : > { %3252 = vrot.lane.b32.xlu0 %v6615_v4, %s4876_s12  ;;  %v3042_v59 = vpop.permute.xlu1 %3041 }
 0x58a   : > { %3182 = vst.msk [vmem:[#allocation4 + $0xf] sm:$0xfe] %vm1137_vm8, %v3042_v59  ;;  %v4809_v59 = vld [vmem:[%s8086_s4] sm:$0xff]  }
 0x58b   : > { %v3044_v7 = vpop.permute.xlu0 %3043  ;;  %3254 = vrot.lane.b32.xlu1 %v6629_v23, %s4876_s12  ;;  %4749 = vmatprep.subr.bf16.mxu1 %v4809_v59 }
 0x58c   : > { %3183 = vst.msk [vmem:[#allocation4 + $0x17] sm:$0xff] %vm1139_vm7, %v3044_v7  ;;  %4750 = vmatpush3.bf16.msra.mxu1 %v4809_v59 }
 0x58d   : > { %3256 = vrot.lane.b32.xlu0 %v6955_v14, %s4876_s12  ;;  %v3046_v34 = vpop.permute.xlu1 %3045 }
 0x58e   : > { %3184 = vst.msk [vmem:[#allocation4 + $0x1f] sm:$0x1] %vm1141_vm9, %v3046_v34 }
 0x58f   : > { %v3048_v44 = vpop.permute.xlu0 %3047  ;;  %3258 = vrot.lane.b32.xlu1 %v6655_v18, %s4876_s12 }
 0x590   : > { %3185 = vst.msk [vmem:[#allocation4 + $0x1f] sm:$0xfe] %vm1137_vm8, %v3048_v44  ;;  %v4811_v44 = vld [vmem:[%s8086_s4 + $0x10] ss:$0 sps:$4 sm:$0x33]  }
 0x591   : > { %3260 = vrot.lane.b32.xlu0 %v6668_v49, %s4876_s12  ;;  %v3050_v39 = vpop.permute.xlu1 %3049 }
 0x592   : > { %3186 = vst.msk [vmem:[#allocation4 + $0x27] sm:$0xff] %vm1139_vm7, %v3050_v39 }
 0x593   : > { %v3052_v40 = vpop.permute.xlu0 %3051  ;;  %3420 = vrot.lane.b32.xlu1 %v6521_v5, %s4877_s13 }
 0x594   : > { %3187 = vst.msk [vmem:[#allocation4 + $0x2f] sm:$0x1] %vm1141_vm9, %v3052_v40  ;;  %v4113_v40 = vsel %vm2086_vm1, %v4811_v44, 0 }
 0x595   : > { %3422 = vrot.lane.b32.xlu0 %v6529_v8, %s4877_s13  ;;  %v3054_v37 = vpop.permute.xlu1 %3053 }
 0x596   : > { %3188 = vst.msk [vmem:[#allocation4 + $0x2f] sm:$0xfe] %vm1137_vm8, %v3054_v37 }
 0x597   : > { %v3056_v35 = vpop.permute.xlu0 %3055  ;;  %3424 = vrot.lane.b32.xlu1 %v6893_v51, %s4877_s13 }
 0x598   : > { %3189 = vst.msk [vmem:[#allocation4 + $0x37] sm:$0xff] %vm1139_vm7, %v3056_v35 }
 0x599   : > { %3426 = vrot.lane.b32.xlu0 %v6547_v1, %s4877_s13  ;;  %v3058_v43 = vpop.permute.xlu1 %3057 }
 0x59a   : > { %3190 = vst.msk [vmem:[#allocation4 + $0x3f] sm:$0x1] %vm1141_vm9, %v3058_v43 }
 0x59b   : > { %v3060_v5 = vpop.permute.xlu0 %3059  ;;  %3428 = vrot.lane.b32.xlu1 %v6560_v56, %s4877_s13 }
 0x59c   : > { %3191 = vst.msk [vmem:[#allocation4 + $0x3f] sm:$0xfe] %vm1137_vm8, %v3060_v5 }
 0x59d   : > { %3430 = vrot.lane.b32.xlu0 %v6905_v15, %s4877_s13  ;;  %v3062_v8 = vpop.permute.xlu1 %3061 }
 0x59e   : > { %3192 = vst.msk [vmem:[#allocation4 + $0x47] sm:$0xff] %vm1139_vm7, %v3062_v8 }
 0x59f   : > { %v3064_v51 = vpop.permute.xlu0 %3063  ;;  %3612 = vrot.lane.b32.xlu1 %v6547_v1, %s4878_s14 }
 0x5a0   : > { %3193 = vst.msk [vmem:[#allocation4 + $0x4f] sm:$0x1] %vm1141_vm9, %v3064_v51 }
 0x5a1   : > { %3614 = vrot.lane.b32.xlu0 %v6560_v56, %s4878_s14  ;;  %v3066_v33 = vpop.permute.xlu1 %3065 }
 0x5a2   : > { %3194 = vst.msk [vmem:[#allocation4 + $0x4f] sm:$0xfe] %vm1137_vm8, %v3066_v33 }
 0x5a3   : > { %v3068_v38 = vpop.permute.xlu0 %3067  ;;  %3616 = vrot.lane.b32.xlu1 %v6905_v15, %s4878_s14  ;;  %v4810_v15 = vld [vmem:[%s8086_s4 + $0x8] sm:$0xff]  }
 0x5a4   : > { %3195 = vst.msk [vmem:[#allocation4 + $0x57] sm:$0xff] %vm1139_vm7, %v3068_v38  ;;  %4751 = vmatprep.subr.bf16.mxu1 %v4810_v15 }
 0x5a5   : > { %3618 = vrot.lane.b32.xlu0 %v6543_v57, %s4878_s14  ;;  %v3070_v1 = vpop.permute.xlu1 %3069  ;;  %4752 = vmatpush3.bf16.msra.mxu1 %v4810_v15 }
 0x5a6   : > { %3196 = vst.msk [vmem:[#allocation4 + $0x5f] sm:$0x1] %vm1141_vm9, %v3070_v1  ;;  %4788 = vmatprep.subr.msk.bf16.mxu1 %vm2086_vm1, %v4811_v44  ;;  %vm8148_vm1 = vmmov %vm8142_vm4 }
 0x5a7   : > { %v3072_v56 = vpop.permute.xlu0 %3071  ;;  %3620 = vrot.lane.b32.xlu1 %v6557_v6, %s4878_s14 }
 0x5a8   : > { %3197 = vst.msk [vmem:[#allocation4 + $0x5f] sm:$0xfe] %vm1137_vm8, %v3072_v56 }
 0x5a9   : > { %3622 = vrot.lane.b32.xlu0 %v6915_v19, %s4878_s14  ;;  %v3074_v7 = vpop.permute.xlu1 %3073  ;;  %4754 = vmatpush3.bf16.msra.mxu1 %v4113_v40 }
 0x5aa   : > { %3198 = vst.msk [vmem:[#allocation4 + $0x67] sm:$0xff] %vm1139_vm7, %v3074_v7 }
 0x5ab   : > { %v3076_v34 = vpop.permute.xlu0 %3075  ;;  %3804 = vrot.lane.b32.xlu1 %v6543_v57, %s4879_s21 }
 0x5ac   : > { %3199 = vst.msk [vmem:[#allocation4 + $0x6f] sm:$0x1] %vm1141_vm9, %v3076_v34 }
 0x5ad   : > { %3806 = vrot.lane.b32.xlu0 %v6557_v6, %s4879_s21  ;;  %v3078_v39 = vpop.permute.xlu1 %3077 }
 0x5ae   : > { %3200 = vst.msk [vmem:[#allocation4 + $0x6f] sm:$0xfe] %vm1137_vm8, %v3078_v39 }
 0x5af   : > { %v3080_v37 = vpop.permute.xlu0 %3079  ;;  %3808 = vrot.lane.b32.xlu1 %v6915_v19, %s4879_s21 }
 0x5b0   : > { %3201 = vst.msk [vmem:[#allocation4 + $0x77] sm:$0xff] %vm1139_vm7, %v3080_v37 }
 0x5b1   : > { %3810 = vrot.lane.b32.xlu0 %v6583_v10, %s4879_s21  ;;  %v3082_v35 = vpop.permute.xlu1 %3081 }
 0x5b2   : > { %3202 = vst.msk [vmem:[#allocation4 + $0x7f] sm:$0x1] %vm1141_vm9, %v3082_v35 }
 0x5b3   : > { %v3084_v43 = vpop.permute.xlu0 %3083  ;;  %3812 = vrot.lane.b32.xlu1 %v6596_v16, %s4879_s21 }
 0x5b4   : > { %3203 = vst.msk [vmem:[#allocation4 + $0x7f] sm:$0xfe] %vm1137_vm8, %v3084_v43 }
 0x5b5   : > { %3814 = vrot.lane.b32.xlu0 %v6925_v3, %s4879_s21  ;;  %v3086_v5 = vpop.permute.xlu1 %3085 }
 0x5b6   : > { %3204 = vst.msk [vmem:[#allocation4 + $0x87] sm:$0xff] %vm1139_vm7, %v3086_v5 }
 0x5b7   : > { %v3088_v8 = vpop.permute.xlu0 %3087  ;;  %3432 = vrot.lane.b32.xlu1 %v6543_v57, %s4877_s13 }
 0x5b8   : > { %3205 = vst.msk [vmem:[#allocation4 + $0x8f] sm:$0x1] %vm1141_vm9, %v3088_v8 }
 0x5b9   : > { %3434 = vrot.lane.b32.xlu0 %v6557_v6, %s4877_s13  ;;  %v3090_v51 = vpop.permute.xlu1 %3089 }
 0x5ba   : > { %3206 = vst.msk [vmem:[#allocation4 + $0x8f] sm:$0xfe] %vm1137_vm8, %v3090_v51 }
 0x5bb   : > { %v3092_v33 = vpop.permute.xlu0 %3091  ;;  %3436 = vrot.lane.b32.xlu1 %v6915_v19, %s4877_s13 }
 0x5bc   : > { %3207 = vst.msk [vmem:[#allocation4 + $0x97] sm:$0xff] %vm1139_vm7, %v3092_v33 }
 0x5bd   : > { %3438 = vrot.lane.b32.xlu0 %v6583_v10, %s4877_s13  ;;  %v3094_v38 = vpop.permute.xlu1 %3093 }
 0x5be   : > { %3208 = vst.msk [vmem:[#allocation4 + $0x9f] sm:$0x1] %vm1141_vm9, %v3094_v38 }
 0x5bf   : > { %v3096_v57 = vpop.permute.xlu0 %3095  ;;  %3440 = vrot.lane.b32.xlu1 %v6596_v16, %s4877_s13 }
 0x5c0   : > { %3209 = vst.msk [vmem:[#allocation4 + $0x9f] sm:$0xfe] %vm1137_vm8, %v3096_v57 }
 0x5c1   : > { %3442 = vrot.lane.b32.xlu0 %v6925_v3, %s4877_s13  ;;  %v3098_v6 = vpop.permute.xlu1 %3097 }
 0x5c2   : > { %3210 = vst.msk [vmem:[#allocation4 + $0xa7] sm:$0xff] %vm1139_vm7, %v3098_v6 }
 0x5c3   : > { %v3100_v19 = vpop.permute.xlu0 %3099  ;;  %3624 = vrot.lane.b32.xlu1 %v6583_v10, %s4878_s14 }
 0x5c4   : > { %3211 = vst.msk [vmem:[#allocation4 + $0xaf] sm:$0x1] %vm1141_vm9, %v3100_v19 }
 0x5c5   : > { %3626 = vrot.lane.b32.xlu0 %v6596_v16, %s4878_s14  ;;  %v3102_v59 = vpop.permute.xlu1 %3101 }
 0x5c6   : > { %3212 = vst.msk [vmem:[#allocation4 + $0xaf] sm:$0xfe] %vm1137_vm8, %v3102_v59 }
 0x5c7   : > { %v3104_v1 = vpop.permute.xlu0 %3103  ;;  %3628 = vrot.lane.b32.xlu1 %v6925_v3, %s4878_s14 }
 0x5c8   : > { %3213 = vst.msk [vmem:[#allocation4 + $0xb7] sm:$0xff] %vm1139_vm7, %v3104_v1 }
 0x5c9   : > { %3630 = vrot.lane.b32.xlu0 %v6579_v20, %s4878_s14  ;;  %v3106_v56 = vpop.permute.xlu1 %3105 }
 0x5ca   : > { %3214 = vst.msk [vmem:[#allocation4 + $0xbf] sm:$0x1] %vm1141_vm9, %v3106_v56 }
 0x5cb   : > { %v3108_v10 = vpop.permute.xlu0 %3107  ;;  %3632 = vrot.lane.b32.xlu1 %v6593_v58, %s4878_s14 }
 0x5cc   : > { %3215 = vst.msk [vmem:[#allocation4 + $0xbf] sm:$0xfe] %vm1137_vm8, %v3108_v10 }
 0x5cd   : > { %3634 = vrot.lane.b32.xlu0 %v6935_v62, %s4878_s14  ;;  %v3110_v16 = vpop.permute.xlu1 %3109 }
 0x5ce   : > { %3216 = vst.msk [vmem:[#allocation4 + $0xc7] sm:$0xff] %vm1139_vm7, %v3110_v16 }
 0x5cf   : > { %v3112_v3 = vpop.permute.xlu0 %3111  ;;  %3816 = vrot.lane.b32.xlu1 %v6579_v20, %s4879_s21 }
 0x5d0   : > { %3217 = vst.msk [vmem:[#allocation4 + $0xcf] sm:$0x1] %vm1141_vm9, %v3112_v3 }
 0x5d1   : > { %3818 = vrot.lane.b32.xlu0 %v6593_v58, %s4879_s21  ;;  %v3114_v15 = vpop.permute.xlu1 %3113 }
 0x5d2   : > { %3218 = vst.msk [vmem:[#allocation4 + $0xcf] sm:$0xfe] %vm1137_vm8, %v3114_v15 }
 0x5d3   : > { %v3116_v7 = vpop.permute.xlu0 %3115  ;;  %3820 = vrot.lane.b32.xlu1 %v6935_v62, %s4879_s21 }
 0x5d4   : > { %3219 = vst.msk [vmem:[#allocation4 + $0xd7] sm:$0xff] %vm1139_vm7, %v3116_v7 }
 0x5d5   : > { %3822 = vrot.lane.b32.xlu0 %v6619_v54, %s4879_s21  ;;  %v3118_v34 = vpop.permute.xlu1 %3117 }
 0x5d6   : > { %3220 = vst.msk [vmem:[#allocation4 + $0xdf] sm:$0x1] %vm1141_vm9, %v3118_v34 }
 0x5d7   : > { %v3120_v44 = vpop.permute.xlu0 %3119  ;;  %3824 = vrot.lane.b32.xlu1 %v6632_v53, %s4879_s21 }
 0x5d8   : > { %3221 = vst.msk [vmem:[#allocation4 + $0xdf] sm:$0xfe] %vm1137_vm8, %v3120_v44 }
 0x5d9   : > { %3826 = vrot.lane.b32.xlu0 %v6945_v45, %s4879_s21  ;;  %v3122_v39 = vpop.permute.xlu1 %3121 }
 0x5da   : > { %3222 = vst.msk [vmem:[#allocation4 + $0xe7] sm:$0xff] %vm1139_vm7, %v3122_v39 }
 0x5db   : > { %v3124_v40 = vpop.permute.xlu0 %3123  ;;  %3262 = vrot.lane.b32.xlu1 %v6965_v48, %s4876_s12 }
 0x5dc   : > { %3223 = vst.msk [vmem:[#allocation4 + $0xef] sm:$0x1] %vm1141_vm9, %v3124_v40 }
 0x5dd   : > { %3444 = vrot.lane.b32.xlu0 %v6579_v20, %s4877_s13  ;;  %v3126_v37 = vpop.permute.xlu1 %3125 }
 0x5de   : > { %3224 = vst.msk [vmem:[#allocation4 + $0xef] sm:$0xfe] %vm1137_vm8, %v3126_v37  ;;  %vm8146_vm8 = vmmov %vm8140_vm2 }
 0x5df   : > { %v3128_v35 = vpop.permute.xlu0 %3127  ;;  %3446 = vrot.lane.b32.xlu1 %v6593_v58, %s4877_s13 }
 0x5e0   : > { %3225 = vst.msk [vmem:[#allocation4 + $0xf7] sm:$0xff] %vm1139_vm7, %v3128_v35  ;;  %vm8145_vm7 = vmmov %vm8142_vm4 }
 0x5e1   : > { %3448 = vrot.lane.b32.xlu0 %v6935_v62, %s4877_s13  ;;  %v3130_v43 = vpop.permute.xlu1 %3129 }
 0x5e2   : > { %3226 = vst.msk [vmem:[#allocation4 + $0xff] sm:$0x1] %vm1141_vm9, %v3130_v43  ;;  %vm8147_vm9 = vmmov %vm8141_vm3 }
 0x5e3   : > { %v3229_v5 = vpop.permute.xlu0 %3228  ;;  %3450 = vrot.lane.b32.xlu1 %v6619_v54, %s4877_s13 }
 0x5e4   : > { %3372 = vst.msk [vmem:[#allocation4 - $0x1] sm:$0xfe] %vm8140_vm2, %v3229_v5 }
 0x5e5   : > { %3452 = vrot.lane.b32.xlu0 %v6632_v53, %s4877_s13  ;;  %v3231_v20 = vpop.permute.xlu1 %3230 }
 0x5e6   : > { %3373 = vst.msk [vmem:[#allocation4 + $0x7] sm:$0xff] %vm8141_vm3, %v3231_v20 }
 0x5e7   : > { %v3233_v58 = vpop.permute.xlu0 %3232  ;;  %3454 = vrot.lane.b32.xlu1 %v6945_v45, %s4877_s13 }
 0x5e8   : > { %3374 = vst.msk [vmem:[#allocation4 + $0xf] sm:$0x1] %vm8142_vm4, %v3233_v58  ;;  %vm8149_vm4 = vmmov %vm8148_vm1 }
 0x5e9   : > { %3636 = vrot.lane.b32.xlu0 %v6619_v54, %s4878_s14  ;;  %v3235_v62 = vpop.permute.xlu1 %3234 }
 0x5ea   : > { %3375 = vst.msk [vmem:[#allocation4 + $0xf] sm:$0xfe] %vm8143_vm5, %v3235_v62  ;;  %vm8150_vm5 = vmmov %vm8140_vm2 }
 0x5eb   : > { %v3237_v8 = vpop.permute.xlu0 %3236  ;;  %3638 = vrot.lane.b32.xlu1 %v6632_v53, %s4878_s14 }
 0x5ec   : > { %3376 = vst.msk [vmem:[#allocation4 + $0x17] sm:$0xff] %vm8144_vm6, %v3237_v8  ;;  %vm8151_vm6 = vmmov %vm8141_vm3 }
 0x5ed   : > { %3640 = vrot.lane.b32.xlu0 %v6945_v45, %s4878_s14  ;;  %v3239_v51 = vpop.permute.xlu1 %3238 }
 0x5ee   : > { %3377 = vst.msk [vmem:[#allocation4 + $0x1f] sm:$0x1] %vm8145_vm7, %v3239_v51  ;;  %vm8152_vm7 = vmmov %vm8148_vm1 }
 0x5ef   : > { %v3241_v33 = vpop.permute.xlu0 %3240  ;;  %3642 = vrot.lane.b32.xlu1 %v6615_v4, %s4878_s14 }
 0x5f0   : > { %3378 = vst.msk [vmem:[#allocation4 + $0x1f] sm:$0xfe] %vm8146_vm8, %v3241_v33  ;;  %vm8153_vm8 = vmmov %vm8140_vm2 }
 0x5f1   : > { %3644 = vrot.lane.b32.xlu0 %v6629_v23, %s4878_s14  ;;  %v3243_v54 = vpop.permute.xlu1 %3242 }
 0x5f2   : > { %3379 = vst.msk [vmem:[#allocation4 + $0x27] sm:$0xff] %vm8147_vm9, %v3243_v54  ;;  %vm8154_vm9 = vmmov %vm8141_vm3 }
 0x5f3   : > { %v3245_v53 = vpop.permute.xlu0 %3244  ;;  %3646 = vrot.lane.b32.xlu1 %v6955_v14, %s4878_s14 }
 0x5f4   : > { %3380 = vst.msk [vmem:[#allocation4 + $0x2f] sm:$0x1] %vm8148_vm1, %v3245_v53  ;;  %vm8155_vm1 = vcmask 228546  }
 0x5f5   : > { %3828 = vrot.lane.b32.xlu0 %v6615_v4, %s4879_s21  ;;  %v3247_v45 = vpop.permute.xlu1 %3246 }
 0x5f6   : > { %3381 = vst.msk [vmem:[#allocation4 + $0x2f] sm:$0xfe] %vm8140_vm2, %v3247_v45  ;;  %vm8156_vm2 = vcmask 228544  }
 0x5f7   : > { %v3249_v38 = vpop.permute.xlu0 %3248  ;;  %3830 = vrot.lane.b32.xlu1 %v6629_v23, %s4879_s21 }
 0x5f8   : > { %3382 = vst.msk [vmem:[#allocation4 + $0x37] sm:$0xff] %vm8141_vm3, %v3249_v38  ;;  %vm8157_vm3 = vcmask 222400  }
 0x5f9   : > { %3832 = vrot.lane.b32.xlu0 %v6955_v14, %s4879_s21  ;;  %v3251_v57 = vpop.permute.xlu1 %3250 }
 0x5fa   : > { %3383 = vst.msk [vmem:[#allocation4 + $0x3f] sm:$0x1] %vm8149_vm4, %v3251_v57  ;;  %vm8158_vm4 = vmmov %vm8155_vm1 }
 0x5fb   : > { %v3253_v6 = vpop.permute.xlu0 %3252  ;;  %3834 = vrot.lane.b32.xlu1 %v6655_v18, %s4879_s21 }
 0x5fc   : > { %3384 = vst.msk [vmem:[#allocation4 + $0x3f] sm:$0xfe] %vm8150_vm5, %v3253_v6  ;;  %vm8159_vm5 = vmmov %vm8156_vm2 }
 0x5fd   : > { %3836 = vrot.lane.b32.xlu0 %v6668_v49, %s4879_s21  ;;  %v3255_v19 = vpop.permute.xlu1 %3254 }
 0x5fe   : > { %3385 = vst.msk [vmem:[#allocation4 + $0x47] sm:$0xff] %vm8151_vm6, %v3255_v19  ;;  %vm8160_vm6 = vmmov %vm8157_vm3 }
 0x5ff   : > { %v3257_v59 = vpop.permute.xlu0 %3256  ;;  %3838 = vrot.lane.b32.xlu1 %v6965_v48, %s4879_s21 }
 0x600   : > { %3386 = vst.msk [vmem:[#allocation4 + $0x4f] sm:$0x1] %vm8152_vm7, %v3257_v59  ;;  %vm8161_vm7 = vcmask 255200  }
 0x601   : > { %3264 = vrot.lane.b32.xlu0 %v6651_v55, %s4876_s12  ;;  %v3259_v1 = vpop.permute.xlu1 %3258 }
 0x602   : > { %3387 = vst.msk [vmem:[#allocation4 + $0x4f] sm:$0xfe] %vm8153_vm8, %v3259_v1  ;;  %vm8162_vm8 = vmmov %vm8161_vm7  ;;  %v4832_v1 = vld [vmem:[#allocation3 + $0xd0] sm:$0x3] }
 0x603   : > { %v3261_v56 = vpop.permute.xlu0 %3260  ;;  %3266 = vrot.lane.b32.xlu1 %v6665_v22, %s4876_s12 }
 0x604   : > { %3388 = vst.msk [vmem:[#allocation4 + $0x57] sm:$0xff] %vm8154_vm9, %v3261_v56  ;;  %vm8163_vm9 = vmmov %vm8155_vm1 }
 0x605   : > { %3268 = vrot.lane.b32.xlu0 %v6976_v47, %s4876_s12  ;;  %v3421_v10 = vpop.permute.xlu1 %3420 }
 0x606   : > { %3564 = vst.msk [vmem:[#allocation4 - $0x2] sm:$0xfc] %vm8155_vm1, %v3421_v10  ;;  %vm8164_vm1 = vmmov %vm8156_vm2  ;;  %v4833_v10 = vld [vmem:[#allocation3 + $0xe8] sm:$0x3] }
 0x607   : > { %v3423_v16 = vpop.permute.xlu0 %3422  ;;  %3270 = vrot.lane.b32.xlu1 %v6691_v24, %s4876_s12 }
 0x608   : > { %3565 = vst.msk [vmem:[#allocation4 + $0x6] sm:$0xff] %vm8156_vm2, %v3423_v16  ;;  %vm8165_vm2 = vmmov %vm8157_vm3 }
 0x609   : > { %3272 = vrot.lane.b32.xlu0 %v6704_v52, %s4876_s12  ;;  %v3425_v3 = vpop.permute.xlu1 %3424 }
 0x60a   : > { %3566 = vst.msk [vmem:[#allocation4 + $0xe] sm:$0x3] %vm8157_vm3, %v3425_v3  ;;  %vm8166_vm3 = vmmov %vm8158_vm4 }
 0x60b   : > { %v3427_v15 = vpop.permute.xlu0 %3426  ;;  %3274 = vrot.lane.b32.xlu1 %v6987_v2, %s4876_s12 }
 0x60c   : > { %3567 = vst.msk [vmem:[#allocation4 + $0xe] sm:$0xfc] %vm8158_vm4, %v3427_v15  ;;  %vm8167_vm4 = vmmov %vm8164_vm1 }
 0x60d   : > { %3456 = vrot.lane.b32.xlu0 %v6615_v4, %s4877_s13  ;;  %v3429_v7 = vpop.permute.xlu1 %3428 }
 0x60e   : > { %3568 = vst.msk [vmem:[#allocation4 + $0x16] sm:$0xff] %vm8159_vm5, %v3429_v7  ;;  %vm8168_vm5 = vmmov %vm8165_vm2 }
 0x60f   : > { %v3431_v34 = vpop.permute.xlu0 %3430  ;;  %3458 = vrot.lane.b32.xlu1 %v6629_v23, %s4877_s13 }
 0x610   : > { %3569 = vst.msk [vmem:[#allocation4 + $0x1e] sm:$0x3] %vm8160_vm6, %v3431_v34  ;;  %vm8169_vm6 = vmmov %vm8161_vm7 }
 0x611   : > { %3460 = vrot.lane.b32.xlu0 %v6955_v14, %s4877_s13  ;;  %v3613_v44 = vpop.permute.xlu1 %3612 }
 0x612   : > { %3756 = vst.msk [vmem:[#allocation4 - $0x2] sm:$0xfc] %vm1723_vm12, %v3613_v44 }
 0x613   : > { %v3615_v39 = vpop.permute.xlu0 %3614  ;;  %3462 = vrot.lane.b32.xlu1 %v6655_v18, %s4877_s13 }
 0x614   : > { %3757 = vst.msk [vmem:[#allocation4 + $0x6] sm:$0xff] %vm1725_vm14, %v3615_v39 }
 0x615   : > { %3464 = vrot.lane.b32.xlu0 %v6668_v49, %s4877_s13  ;;  %v3617_v4 = vpop.permute.xlu1 %3616 }
 0x616   : > { %3758 = vst.msk [vmem:[#allocation4 + $0xe] sm:$0x3] %vm8161_vm7, %v3617_v4  ;;  %vm8170_vm7 = vmmov %vm8169_vm6  ;;  %v4834_v4 = vld [vmem:[#allocation3 + $0x100] sm:$0x3] }
 0x617   : > { %v3619_v23 = vpop.permute.xlu0 %3618  ;;  %3466 = vrot.lane.b32.xlu1 %v6965_v48, %s4877_s13 }
 0x618   : > { %3759 = vst.msk [vmem:[#allocation4 + $0xe] sm:$0xfc] %vm1723_vm12, %v3619_v23 }
 0x619   : > { %3648 = vrot.lane.b32.xlu0 %v6655_v18, %s4878_s14  ;;  %v3621_v14 = vpop.permute.xlu1 %3620 }
 0x61a   : > { %3760 = vst.msk [vmem:[#allocation4 + $0x16] sm:$0xff] %vm1725_vm14, %v3621_v14 }
 0x61b   : > { %v3623_v40 = vpop.permute.xlu0 %3622  ;;  %3650 = vrot.lane.b32.xlu1 %v6668_v49, %s4878_s14 }
 0x61c   : > { %3761 = vst.msk [vmem:[#allocation4 + $0x1e] sm:$0x3] %vm8162_vm8, %v3623_v40  ;;  %vm8171_vm8 = vcmask 188576  }
 0x61d   : > { %3652 = vrot.lane.b32.xlu0 %v6965_v48, %s4878_s14  ;;  %v3805_v37 = vpop.permute.xlu1 %3804 }
 0x61e   : > { %3948 = vst.msk [vmem:[#allocation4 - $0x2] sm:$0xfc] %vm1918_vm10, %v3805_v37 }
 0x61f   : > { %v3807_v35 = vpop.permute.xlu0 %3806  ;;  %3654 = vrot.lane.b32.xlu1 %v6651_v55, %s4878_s14 }
 0x620   : > { %3949 = vst.msk [vmem:[#allocation4 + $0x6] sm:$0xff] %vm1920_vm13, %v3807_v35 }
 0x621   : > { %3656 = vrot.lane.b32.xlu0 %v6665_v22, %s4878_s14  ;;  %v3809_v18 = vpop.permute.xlu1 %3808 }
 0x622   : > { %3950 = vst.msk [vmem:[#allocation4 + $0xe] sm:$0x3] %vm1922_vm11, %v3809_v18 }
 0x623   : > { %v3811_v49 = vpop.permute.xlu0 %3810  ;;  %3658 = vrot.lane.b32.xlu1 %v6976_v47, %s4878_s14 }
 0x624   : > { %3951 = vst.msk [vmem:[#allocation4 + $0xe] sm:$0xfc] %vm1918_vm10, %v3811_v49 }
 0x625   : > { %3840 = vrot.lane.b32.xlu0 %v6651_v55, %s4879_s21  ;;  %v3813_v48 = vpop.permute.xlu1 %3812 }
 0x626   : > { %3952 = vst.msk [vmem:[#allocation4 + $0x16] sm:$0xff] %vm1920_vm13, %v3813_v48 }
 0x627   : > { %v3815_v43 = vpop.permute.xlu0 %3814  ;;  %3842 = vrot.lane.b32.xlu1 %v6665_v22, %s4879_s21  ;;  %v3996_v20 = vld [vmem:[#allocation4] sm:$0xff] }
 0x628   : > { %3953 = vst.msk [vmem:[#allocation4 + $0x1e] sm:$0x3] %vm1922_vm11, %v3815_v43 }
 0x629   : > { %3844 = vrot.lane.b32.xlu0 %v6976_v47, %s4879_s21  ;;  %v3433_v5 = vpop.permute.xlu1 %3432  ;;  %v3997_v58 = vld [vmem:[#allocation4 + $0x8] sm:$0xff] }
 0x62a   : > { %3570 = vst.msk [vmem:[#allocation4 + $0x1e] sm:$0xfc] %vm8163_vm9, %v3433_v5  ;;  %v4028_v62 = vpack.c.bf16 %v3997_v58, %v3996_v20  ;;  %vm8172_vm9 = vmmov %vm8166_vm3  ;;  %v4835_v5 = vld [vmem:[#allocation3 + $0x118] sm:$0x3] }
 0x62b   : > { %v3435_v8 = vpop.permute.xlu0 %3434  ;;  %3846 = vrot.lane.b32.xlu1 %v6691_v24, %s4879_s21 }
 0x62c   : > { %3571 = vst.msk [vmem:[#allocation4 + $0x26] sm:$0xff] %vm8164_vm1, %v3435_v8  ;;  %4755 = vmatprep.mubr.msk.bf16.mxu1 %vm2037_vm15, %v4028_v62  ;;  %v7576_v62 = vld [vmem:[#allocation3 + $0x130] sm:$0x3] }
 0x62d   : > { %3848 = vrot.lane.b32.xlu0 %v6704_v52, %s4879_s21  ;;  %v3437_v51 = vpop.permute.xlu1 %3436  ;;  %v3998_v33 = vld [vmem:[#allocation4 + $0x10] sm:$0xff] }
 0x62e   : > { %3572 = vst.msk [vmem:[#allocation4 + $0x2e] sm:$0x3] %vm8165_vm2, %v3437_v51 }
 0x62f   : > { %v3439_v47 = vpop.permute.xlu0 %3438  ;;  %3850 = vrot.lane.b32.xlu1 %v6987_v2, %s4879_s21  ;;  %v3999_v54 = vld [vmem:[#allocation4 + $0x18] sm:$0xff] }
 0x630   : > { %3573 = vst.msk [vmem:[#allocation4 + $0x2e] sm:$0xfc] %vm8166_vm3, %v3439_v47  ;;  %v4029_v53 = vpack.c.bf16 %v3999_v54, %v3998_v33  ;;  %v7587_v54 = vld [vmem:[#allocation3 + $0x148] sm:$0x3] }
 0x631   : > { %3276 = vrot.lane.b32.xlu0 %v6687_v11, %s4876_s12  ;;  %v3441_v45 = vpop.permute.xlu1 %3440 }
 0x632   : > { %3574 = vst.msk [vmem:[#allocation4 + $0x36] sm:$0xff] %vm8167_vm4, %v3441_v45  ;;  %4756 = vmatmul.mubr.msk.bf16.vlgmr.msra.gmra.mrb[0].mxu1 %vm2037_vm15, %v4029_v53  ;;  %vm8173_vm4 = vmmov %vm8164_vm1 }
 0x633   : > { %v3443_v38 = vpop.permute.xlu0 %3442  ;;  %3278 = vrot.lane.b32.xlu1 %v6701_v50, %s4876_s12 }
 0x634   : > { %3575 = vst.msk [vmem:[#allocation4 + $0x3e] sm:$0x3] %vm8168_vm5, %v3443_v38  ;;  %vm8174_vm5 = vmmov %vm8165_vm2 }
 0x635   : > { %3280 = vrot.lane.b32.xlu0 %v6998_v42, %s4876_s12  ;;  %v3625_v2 = vpop.permute.xlu1 %3624 }
 0x636   : > { %3762 = vst.msk [vmem:[#allocation4 + $0x1e] sm:$0xfc] %vm1723_vm12, %v3625_v2 }
 0x637   : > { %v3627_v57 = vpop.permute.xlu0 %3626  ;;  %3282 = vrot.lane.b32.xlu1 %v6727_v21, %s4876_s12 }
 0x638   : > { %3763 = vst.msk [vmem:[#allocation4 + $0x26] sm:$0xff] %vm1725_vm14, %v3627_v57 }
 0x639   : > { %3284 = vrot.lane.b32.xlu0 %v6740_v63, %s4876_s12  ;;  %v3629_v6 = vpop.permute.xlu1 %3628 }
 0x63a   : > { %3764 = vst.msk [vmem:[#allocation4 + $0x2e] sm:$0x3] %vm8169_vm6, %v3629_v6 }
 0x63b   : > { %v3631_v19 = vpop.permute.xlu0 %3630  ;;  %3286 = vrot.lane.b32.xlu1 %v7009_v41, %s4876_s12 }
 0x63c   : > { %3765 = vst.msk [vmem:[#allocation4 + $0x2e] sm:$0xfc] %vm1723_vm12, %v3631_v19 }
 0x63d   : > { %3468 = vrot.lane.b32.xlu0 %v6651_v55, %s4877_s13  ;;  %v3633_v42 = vpop.permute.xlu1 %3632 }
 0x63e   : > { %3766 = vst.msk [vmem:[#allocation4 + $0x36] sm:$0xff] %vm1725_vm14, %v3633_v42 }
 0x63f   : > { %v3635_v59 = vpop.permute.xlu0 %3634  ;;  %3470 = vrot.lane.b32.xlu1 %v6665_v22, %s4877_s13 }
 0x640   : > { %3767 = vst.msk [vmem:[#allocation4 + $0x3e] sm:$0x3] %vm8170_vm7, %v3635_v59  ;;  %vm8175_vm7 = vmmov %vm8169_vm6 }
 0x641   : > { %3472 = vrot.lane.b32.xlu0 %v4832_v1, %s4877_s13  ;;  %v3817_v56 = vpop.permute.xlu1 %3816 }
 0x642   : > { %3954 = vst.msk [vmem:[#allocation4 + $0x1e] sm:$0xfc] %vm1918_vm10, %v3817_v56 }
 0x643   : > { %v3819_v41 = vpop.permute.xlu0 %3818  ;;  %3474 = vrot.lane.b32.xlu1 %v6691_v24, %s4877_s13 }
 0x644   : > { %3955 = vst.msk [vmem:[#allocation4 + $0x26] sm:$0xff] %vm1920_vm13, %v3819_v41 }
 0x645   : > { %3476 = vrot.lane.b32.xlu0 %v6704_v52, %s4877_s13  ;;  %v3821_v55 = vpop.permute.xlu1 %3820 }
 0x646   : > { %3956 = vst.msk [vmem:[#allocation4 + $0x2e] sm:$0x3] %vm1922_vm11, %v3821_v55 }
 0x647   : > { %v3823_v22 = vpop.permute.xlu0 %3822  ;;  %3478 = vrot.lane.b32.xlu1 %v4833_v10, %s4877_s13 }
 0x648   : > { %3957 = vst.msk [vmem:[#allocation4 + $0x2e] sm:$0xfc] %vm1918_vm10, %v3823_v22 }
 0x649   : > { %3660 = vrot.lane.b32.xlu0 %v6691_v24, %s4878_s14  ;;  %v3825_v16 = vpop.permute.xlu1 %3824 }
 0x64a   : > { %3958 = vst.msk [vmem:[#allocation4 + $0x36] sm:$0xff] %vm1920_vm13, %v3825_v16 }
 0x64b   : > { %v3827_v3 = vpop.permute.xlu0 %3826  ;;  %3662 = vrot.lane.b32.xlu1 %v6704_v52, %s4878_s14  ;;  %v4000_v7 = vld [vmem:[#allocation4 + $0x20] sm:$0xff] }
 0x64c   : > { %3959 = vst.msk [vmem:[#allocation4 + $0x3e] sm:$0x3] %vm1922_vm11, %v3827_v3 }
 0x64d   : > { %3664 = vrot.lane.b32.xlu0 %v4833_v10, %s4878_s14  ;;  %v3263_v15 = vpop.permute.xlu1 %3262  ;;  %v4001_v34 = vld [vmem:[#allocation4 + $0x28] sm:$0xff] }
 0x64e   : > { %3389 = vst.msk [vmem:[#allocation4 + $0x5f] sm:$0x1] %vm8171_vm8, %v3263_v15  ;;  %v4030_v44 = vpack.c.bf16 %v4001_v34, %v4000_v7  ;;  %vm8176_vm8 = vcmask 195745  }
 0x64f   : > { %v3445_v39 = vpop.permute.xlu0 %3444  ;;  %3666 = vrot.lane.b32.xlu1 %v6687_v11, %s4878_s14 }
 0x650   : > { %3576 = vst.msk [vmem:[#allocation4 + $0x3e] sm:$0xfc] %vm8172_vm9, %v3445_v39  ;;  %4759 = vmatprep.mubr.msk.bf16.mxu1 %vm2037_vm15, %v4030_v44  ;;  %vm8177_vm9 = vcmask 195744  }
 0x651   : > { %3668 = vrot.lane.b32.xlu0 %v6701_v50, %s4878_s14  ;;  %v3447_v24 = vpop.permute.xlu1 %3446  ;;  %v4002_v23 = vld [vmem:[#allocation4 + $0x30] sm:$0xff] }
 0x652   : > { %3577 = vst.msk [vmem:[#allocation4 + $0x46] sm:$0xff] %vm8164_vm1, %v3447_v24  ;;  %vm8178_vm1 = vcmask 188576   ;;  %v7651_v24 = vld [vmem:[#allocation3 + $0x160] sm:$0x3] }
 0x653   : > { %v3449_v52 = vpop.permute.xlu0 %3448  ;;  %3670 = vrot.lane.b32.xlu1 %v4834_v4, %s4878_s14  ;;  %v4003_v14 = vld [vmem:[#allocation4 + $0x38] sm:$0xff] }
 0x654   : > { %3578 = vst.msk [vmem:[#allocation4 + $0x4e] sm:$0x3] %vm8165_vm2, %v3449_v52  ;;  %v4031_v40 = vpack.c.bf16 %v4003_v14, %v4002_v23  ;;  %vm8179_vm2 = vmmov %vm8176_vm8 }
 0x655   : > { %3852 = vrot.lane.b32.xlu0 %v6687_v11, %s4879_s21  ;;  %v3451_v37 = vpop.permute.xlu1 %3450 }
 0x656   : > { %3579 = vst.msk [vmem:[#allocation4 + $0x4e] sm:$0xfc] %vm8166_vm3, %v3451_v37  ;;  %4760 = vmatmul.mubr.msk.bf16.gmra.mrb[4].mxu1 %vm2037_vm15, %v4031_v40  ;;  %vm8180_vm3 = vmmov %vm8177_vm9  ;;  %v7662_v40 = vld [vmem:[#allocation3 + $0x178] sm:$0x3] }
 0x657   : > { %v3453_v35 = vpop.permute.xlu0 %3452  ;;  %3854 = vrot.lane.b32.xlu1 %v6701_v50, %s4879_s21 }
 0x658   : > { %3580 = vst.msk [vmem:[#allocation4 + $0x56] sm:$0xff] %vm8173_vm4, %v3453_v35  ;;  %vm8181_vm4 = vmmov %vm8178_vm1 }
 0x659   : > { %3856 = vrot.lane.b32.xlu0 %v4834_v4, %s4879_s21  ;;  %v3455_v18 = vpop.permute.xlu1 %3454 }
 0x65a   : > { %3581 = vst.msk [vmem:[#allocation4 + $0x5e] sm:$0x3] %vm8174_vm5, %v3455_v18  ;;  %vm8182_vm5 = vcmask 228546  }
 0x65b   : > { %v3637_v49 = vpop.permute.xlu0 %3636  ;;  %3858 = vrot.lane.b32.xlu1 %v6727_v21, %s4879_s21 }
 0x65c   : > { %3768 = vst.msk [vmem:[#allocation4 + $0x3e] sm:$0xfc] %vm1723_vm12, %v3637_v49 }
 0x65d   : > { %3860 = vrot.lane.b32.xlu0 %v6740_v63, %s4879_s21  ;;  %v3639_v48 = vpop.permute.xlu1 %3638 }
 0x65e   : > { %3769 = vst.msk [vmem:[#allocation4 + $0x46] sm:$0xff] %vm1725_vm14, %v3639_v48 }
 0x65f   : > { %v3641_v43 = vpop.permute.xlu0 %3640  ;;  %3862 = vrot.lane.b32.xlu1 %v4835_v5, %s4879_s21 }
 0x660   : > { %3770 = vst.msk [vmem:[#allocation4 + $0x4e] sm:$0x3] %vm8169_vm6, %v3641_v43  ;;  %vm8183_vm6 = vcmask 228544  }
 0x661   : > { %3288 = vrot.lane.b32.xlu0 %v6723_v13, %s4876_s12  ;;  %v3643_v20 = vpop.permute.xlu1 %3642 }
 0x662   : > { %3771 = vst.msk [vmem:[#allocation4 + $0x4e] sm:$0xfc] %vm1723_vm12, %v3643_v20 }
 0x663   : > { %v3645_v58 = vpop.permute.xlu0 %3644  ;;  %3290 = vrot.lane.b32.xlu1 %v6737_v9, %s4876_s12 }
 0x664   : > { %3772 = vst.msk [vmem:[#allocation4 + $0x56] sm:$0xff] %vm1725_vm14, %v3645_v58 }
 0x665   : > { %3292 = vrot.lane.b32.xlu0 %v7576_v62, %s4876_s12  ;;  %v3647_v8 = vpop.permute.xlu1 %3646 }
 0x666   : > { %3773 = vst.msk [vmem:[#allocation4 + $0x5e] sm:$0x3] %vm8175_vm7, %v3647_v8  ;;  %vm8184_vm7 = vcmask 222400  }
 0x667   : > { %v3829_v51 = vpop.permute.xlu0 %3828  ;;  %3294 = vrot.lane.b32.xlu1 %v6763_v0, %s4876_s12 }
 0x668   : > { %3960 = vst.msk [vmem:[#allocation4 + $0x3e] sm:$0xfc] %vm1918_vm10, %v3829_v51 }
 0x669   : > { %3296 = vrot.lane.b32.xlu0 %v6776_v61, %s4876_s12  ;;  %v3831_v47 = vpop.permute.xlu1 %3830 }
 0x66a   : > { %3961 = vst.msk [vmem:[#allocation4 + $0x46] sm:$0xff] %vm1920_vm13, %v3831_v47 }
 0x66b   : > { %v3833_v33 = vpop.permute.xlu0 %3832  ;;  %3298 = vrot.lane.b32.xlu1 %v7587_v54, %s4876_s12 }
 0x66c   : > { %3962 = vst.msk [vmem:[#allocation4 + $0x4e] sm:$0x3] %vm1922_vm11, %v3833_v33 }
 0x66d   : > { %3480 = vrot.lane.b32.xlu0 %v6687_v11, %s4877_s13  ;;  %v3835_v53 = vpop.permute.xlu1 %3834 }
 0x66e   : > { %3963 = vst.msk [vmem:[#allocation4 + $0x4e] sm:$0xfc] %vm1918_vm10, %v3835_v53 }
 0x66f   : > { %v3837_v45 = vpop.permute.xlu0 %3836  ;;  %3482 = vrot.lane.b32.xlu1 %v6701_v50, %s4877_s13 }
 0x670   : > { %3964 = vst.msk [vmem:[#allocation4 + $0x56] sm:$0xff] %vm1920_vm13, %v3837_v45 }
 0x671   : > { %3484 = vrot.lane.b32.xlu0 %v4834_v4, %s4877_s13  ;;  %v3839_v38 = vpop.permute.xlu1 %3838  ;;  %v4004_v57 = vld [vmem:[#allocation4 + $0x40] sm:$0xff] }
 0x672   : > { %3965 = vst.msk [vmem:[#allocation4 + $0x5e] sm:$0x3] %vm1922_vm11, %v3839_v38 }
 0x673   : > { %v3265_v2 = vpop.permute.xlu0 %3264  ;;  %3486 = vrot.lane.b32.xlu1 %v6727_v21, %s4877_s13  ;;  %v4005_v11 = vld [vmem:[#allocation4 + $0x48] sm:$0xff] }
 0x674   : > { %3390 = vst.msk [vmem:[#allocation4 + $0x5f] sm:$0xfe] %vm8176_vm8, %v3265_v2  ;;  %v4032_v6 = vpack.c.bf16 %v4005_v11, %v4004_v57  ;;  %vm8185_vm8 = vmmov %vm8182_vm5  ;;  %v7723_v11 = vld [vmem:[#allocation3 + $0x180] sm:$0xff] }
 0x675   : > { %3488 = vrot.lane.b32.xlu0 %v6740_v63, %s4877_s13  ;;  %v3267_v50 = vpop.permute.xlu1 %3266 }
 0x676   : > { %3391 = vst.msk [vmem:[#allocation4 + $0x67] sm:$0xff] %vm8177_vm9, %v3267_v50  ;;  %4763 = vmatprep.mubr.msk.bf16.mxu1 %vm2037_vm15, %v4032_v6  ;;  %vm8186_vm9 = vmmov %vm8183_vm6 }
 0x677   : > { %v3269_v19 = vpop.permute.xlu0 %3268  ;;  %3490 = vrot.lane.b32.xlu1 %v4835_v5, %s4877_s13  ;;  %v4006_v59 = vld [vmem:[#allocation4 + $0x50] sm:$0xff] }
 0x678   : > { %3392 = vst.msk [vmem:[#allocation4 + $0x6f] sm:$0x1] %vm8178_vm1, %v3269_v19  ;;  %vm8187_vm1 = vmmov %vm8184_vm7  ;;  %v7728_v19 = vld [vmem:[#allocation3 + $0x188] sm:$0xff] }
 0x679   : > { %3672 = vrot.lane.b32.xlu0 %v6727_v21, %s4878_s14  ;;  %v3271_v42 = vpop.permute.xlu1 %3270  ;;  %v4007_v1 = vld [vmem:[#allocation4 + $0x58] sm:$0xff] }
 0x67a   : > { %3393 = vst.msk [vmem:[#allocation4 + $0x6f] sm:$0xfe] %vm8179_vm2, %v3271_v42  ;;  %v4033_v56 = vpack.c.bf16 %v4007_v1, %v4006_v59  ;;  %vm8188_vm2 = vcmask 255200   ;;  %v7733_v42 = vld [vmem:[#allocation3 + $0x190] sm:$0x3] }
 0x67b   : > { %v3273_v41 = vpop.permute.xlu0 %3272  ;;  %3674 = vrot.lane.b32.xlu1 %v6740_v63, %s4878_s14 }
 0x67c   : > { %3394 = vst.msk [vmem:[#allocation4 + $0x77] sm:$0xff] %vm8180_vm3, %v3273_v41  ;;  %4764 = vmatmul.mubr.msk.bf16.gmra.mrb[8].mxu1 %vm2037_vm15, %v4033_v56  ;;  %vm8189_vm3 = vmmov %vm8188_vm2  ;;  %v7738_v56 = vld [vmem:[#allocation3 + $0x198] sm:$0xff]  ;;  %v7743_v41 = vld [vmem:[#allocation3 + $0x1a8] sm:$0x3] }
 0x67d   : > { %3676 = vrot.lane.b32.xlu0 %v4835_v5, %s4878_s14  ;;  %v3275_v55 = vpop.permute.xlu1 %3274 }
 0x67e   : > { %3395 = vst.msk [vmem:[#allocation4 + $0x7f] sm:$0x1] %vm8181_vm4, %v3275_v55  ;;  %vm8190_vm4 = vcmask 195745   ;;  %v7745_v55 = vld [vmem:[#allocation3 + $0x1a0] sm:$0xff] }
 0x67f   : > { %v3457_v21 = vpop.permute.xlu0 %3456  ;;  %3678 = vrot.lane.b32.xlu1 %v6723_v13, %s4878_s14 }
 0x680   : > { %3582 = vst.msk [vmem:[#allocation4 + $0x5e] sm:$0xfc] %vm8182_vm5, %v3457_v21  ;;  %vm8191_vm5 = vcmask 195744  }
 0x681   : > { %3680 = vrot.lane.b32.xlu0 %v6737_v9, %s4878_s14  ;;  %v3459_v22 = vpop.permute.xlu1 %3458 }
 0x682   : > { %3583 = vst.msk [vmem:[#allocation4 + $0x66] sm:$0xff] %vm8183_vm6, %v3459_v22  ;;  %vm8192_vm6 = vcmask 188576  }
 0x683   : > { %v3461_v63 = vpop.permute.xlu0 %3460  ;;  %3682 = vrot.lane.b32.xlu1 %v7576_v62, %s4878_s14 }
 0x684   : > { %3584 = vst.msk [vmem:[#allocation4 + $0x6e] sm:$0x3] %vm8184_vm7, %v3461_v63  ;;  %vm8193_vm7 = vmmov %vm8190_vm4 }
 0x685   : > { %3864 = vrot.lane.b32.xlu0 %v6723_v13, %s4879_s21  ;;  %v3463_v10 = vpop.permute.xlu1 %3462 }
 0x686   : > { %3585 = vst.msk [vmem:[#allocation4 + $0x6e] sm:$0xfc] %vm8185_vm8, %v3463_v10  ;;  %vm8194_vm8 = vmmov %vm8191_vm5 }
 0x687   : > { %v3465_v16 = vpop.permute.xlu0 %3464  ;;  %3866 = vrot.lane.b32.xlu1 %v6737_v9, %s4879_s21 }
 0x688   : > { %3586 = vst.msk [vmem:[#allocation4 + $0x76] sm:$0xff] %vm8186_vm9, %v3465_v16  ;;  %vm8195_vm9 = vmmov %vm8192_vm6 }
 0x689   : > { %3868 = vrot.lane.b32.xlu0 %v7576_v62, %s4879_s21  ;;  %v3467_v3 = vpop.permute.xlu1 %3466 }
 0x68a   : > { %3587 = vst.msk [vmem:[#allocation4 + $0x7e] sm:$0x3] %vm8187_vm1, %v3467_v3  ;;  %vm8196_vm1 = vcmask 228546  }
 0x68b   : > { %v3649_v15 = vpop.permute.xlu0 %3648  ;;  %3870 = vrot.lane.b32.xlu1 %v6763_v0, %s4879_s21 }
 0x68c   : > { %3774 = vst.msk [vmem:[#allocation4 + $0x5e] sm:$0xfc] %vm1723_vm12, %v3649_v15 }
 0x68d   : > { %3872 = vrot.lane.b32.xlu0 %v6776_v61, %s4879_s21  ;;  %v3651_v7 = vpop.permute.xlu1 %3650 }
 0x68e   : > { %3775 = vst.msk [vmem:[#allocation4 + $0x66] sm:$0xff] %vm1725_vm14, %v3651_v7 }
 0x68f   : > { %v3653_v34 = vpop.permute.xlu0 %3652  ;;  %3874 = vrot.lane.b32.xlu1 %v7587_v54, %s4879_s21 }
 0x690   : > { %3776 = vst.msk [vmem:[#allocation4 + $0x6e] sm:$0x3] %vm8188_vm2, %v3653_v34  ;;  %vm8197_vm2 = vcmask 228544  }
 0x691   : > { %3300 = vrot.lane.b32.xlu0 %v6759_v60, %s4876_s12  ;;  %v3655_v44 = vpop.permute.xlu1 %3654 }
 0x692   : > { %3777 = vst.msk [vmem:[#allocation4 + $0x6e] sm:$0xfc] %vm1723_vm12, %v3655_v44 }
 0x693   : > { %v3657_v39 = vpop.permute.xlu0 %3656  ;;  %3302 = vrot.lane.b32.xlu1 %v6773_v12, %s4876_s12 }
 0x694   : > { %3778 = vst.msk [vmem:[#allocation4 + $0x76] sm:$0xff] %vm1725_vm14, %v3657_v39 }
 0x695   : > { %3304 = vrot.lane.b32.xlu0 %v7651_v24, %s4876_s12  ;;  %v3659_v52 = vpop.permute.xlu1 %3658 }
 0x696   : > { %3779 = vst.msk [vmem:[#allocation4 + $0x7e] sm:$0x3] %vm8189_vm3, %v3659_v52  ;;  %vm8198_vm3 = vcmask 222400  }
 0x697   : > { %v3841_v4 = vpop.permute.xlu0 %3840  ;;  %3306 = vrot.lane.b32.xlu1 %v6793_v17, %s4876_s12 }
 0x698   : > { %3966 = vst.msk [vmem:[#allocation4 + $0x5e] sm:$0xfc] %vm1918_vm10, %v3841_v4 }
 0x699   : > { %3308 = vrot.lane.b32.xlu0 %v6799_v46, %s4876_s12  ;;  %v3843_v23 = vpop.permute.xlu1 %3842 }
 0x69a   : > { %3967 = vst.msk [vmem:[#allocation4 + $0x66] sm:$0xff] %vm1920_vm13, %v3843_v23 }
 0x69b   : > { %v3845_v14 = vpop.permute.xlu0 %3844  ;;  %3310 = vrot.lane.b32.xlu1 %v7662_v40, %s4876_s12 }
 0x69c   : > { %3968 = vst.msk [vmem:[#allocation4 + $0x6e] sm:$0x3] %vm1922_vm11, %v3845_v14 }
 0x69d   : > { %3492 = vrot.lane.b32.xlu0 %v6723_v13, %s4877_s13  ;;  %v3847_v37 = vpop.permute.xlu1 %3846 }
 0x69e   : > { %3969 = vst.msk [vmem:[#allocation4 + $0x6e] sm:$0xfc] %vm1918_vm10, %v3847_v37 }
 0x69f   : > { %v3849_v35 = vpop.permute.xlu0 %3848  ;;  %3494 = vrot.lane.b32.xlu1 %v6737_v9, %s4877_s13 }
 0x6a0   : > { %3970 = vst.msk [vmem:[#allocation4 + $0x76] sm:$0xff] %vm1920_vm13, %v3849_v35 }
 0x6a1   : > { %3496 = vrot.lane.b32.xlu0 %v7576_v62, %s4877_s13  ;;  %v3851_v18 = vpop.permute.xlu1 %3850  ;;  %v4008_v13 = vld [vmem:[#allocation4 + $0x60] sm:$0xff] }
 0x6a2   : > { %3971 = vst.msk [vmem:[#allocation4 + $0x7e] sm:$0x3] %vm1922_vm11, %v3851_v18 }
 0x6a3   : > { %v3277_v49 = vpop.permute.xlu0 %3276  ;;  %3498 = vrot.lane.b32.xlu1 %v6763_v0, %s4877_s13  ;;  %v4009_v48 = vld [vmem:[#allocation4 + $0x68] sm:$0xff] }
 0x6a4   : > { %3396 = vst.msk [vmem:[#allocation4 + $0x7f] sm:$0xfe] %vm8190_vm4, %v3277_v49  ;;  %v4034_v43 = vpack.c.bf16 %v4009_v48, %v4008_v13  ;;  %vm8199_vm4 = vmmov %vm8196_vm1 }
 0x6a5   : > { %3500 = vrot.lane.b32.xlu0 %v6776_v61, %s4877_s13  ;;  %v3279_v9 = vpop.permute.xlu1 %3278 }
 0x6a6   : > { %3397 = vst.msk [vmem:[#allocation4 + $0x87] sm:$0xff] %vm8191_vm5, %v3279_v9  ;;  %4767 = vmatprep.mubr.msk.bf16.mxu1 %vm2037_vm15, %v4034_v43  ;;  %vm8200_vm5 = vmmov %vm8197_vm2 }
 0x6a7   : > { %v3281_v5 = vpop.permute.xlu0 %3280  ;;  %3502 = vrot.lane.b32.xlu1 %v7587_v54, %s4877_s13  ;;  %v4010_v58 = vld [vmem:[#allocation4 + $0x70] sm:$0xff] }
 0x6a8   : > { %3398 = vst.msk [vmem:[#allocation4 + $0x8f] sm:$0x1] %vm8192_vm6, %v3281_v5  ;;  %vm8201_vm6 = vmmov %vm8198_vm3 }
 0x6a9   : > { %3684 = vrot.lane.b32.xlu0 %v6763_v0, %s4878_s14  ;;  %v3283_v20 = vpop.permute.xlu1 %3282  ;;  %v4011_v62 = vld [vmem:[#allocation4 + $0x78] sm:$0xff] }
 0x6aa   : > { %3399 = vst.msk [vmem:[#allocation4 + $0x8f] sm:$0xfe] %vm8193_vm7, %v3283_v20  ;;  %v4035_v8 = vpack.c.bf16 %v4011_v62, %v4010_v58  ;;  %vm8202_vm7 = vcmask 255200  }
 0x6ab   : > { %v3285_v51 = vpop.permute.xlu0 %3284  ;;  %3686 = vrot.lane.b32.xlu1 %v6776_v61, %s4878_s14 }
 0x6ac   : > { %3400 = vst.msk [vmem:[#allocation4 + $0x97] sm:$0xff] %vm8194_vm8, %v3285_v51  ;;  %4768 = vmatmul.mubr.msk.bf16.gmra.mrb[12].mxu1 %vm2037_vm15, %v4035_v8  ;;  %vm8203_vm8 = vmmov %vm8202_vm7 }
 0x6ad   : > { %3688 = vrot.lane.b32.xlu0 %v7587_v54, %s4878_s14  ;;  %v3287_v47 = vpop.permute.xlu1 %3286 }
 0x6ae   : > { %3401 = vst.msk [vmem:[#allocation4 + $0x9f] sm:$0x1] %vm8195_vm9, %v3287_v47  ;;  %vm8204_vm9 = vcmask 195745  }
 0x6af   : > { %v3469_v0 = vpop.permute.xlu0 %3468  ;;  %3690 = vrot.lane.b32.xlu1 %v6759_v60, %s4878_s14 }
 0x6b0   : > { %3588 = vst.msk [vmem:[#allocation4 + $0x7e] sm:$0xfc] %vm8196_vm1, %v3469_v0  ;;  %vm8205_vm1 = vcmask 195744   ;;  %v7821_v0 = vld [vmem:[%s8087_s5] ss:$0 sm:$0xff] }
 0x6b1   : > { %3692 = vrot.lane.b32.xlu0 %v6773_v12, %s4878_s14  ;;  %v3471_v61 = vpop.permute.xlu1 %3470 }
 0x6b2   : > { %3589 = vst.msk [vmem:[#allocation4 + $0x86] sm:$0xff] %vm8197_vm2, %v3471_v61  ;;  %vm8206_vm2 = vcmask 188576   ;;  %v4360_v61 = vrot.slane %v5209_v25, 1  ;;  %v4845_v25 = vld [vmem:[#allocation2 + $0x40] sm:$0x3] }
 0x6b3   : > { %v3473_v33 = vpop.permute.xlu0 %3472  ;;  %3694 = vrot.lane.b32.xlu1 %v7651_v24, %s4878_s14 }
 0x6b4   : > { %3590 = vst.msk [vmem:[#allocation4 + $0x8e] sm:$0x3] %vm8198_vm3, %v3473_v33  ;;  %vm8207_vm3 = vmmov %vm8204_vm9  ;;  %v4361_v33 = vrot.slane %v5213_v27, 1 }
 0x6b5   : > { %3876 = vrot.lane.b32.xlu0 %v6759_v60, %s4879_s21  ;;  %v3475_v54 = vpop.permute.xlu1 %3474 }
 0x6b6   : > { %3591 = vst.msk [vmem:[#allocation4 + $0x8e] sm:$0xfc] %vm8199_vm4, %v3475_v54  ;;  %vm8208_vm4 = vmmov %vm8205_vm1 }
 0x6b7   : > { %v3477_v53 = vpop.permute.xlu0 %3476  ;;  %3878 = vrot.lane.b32.xlu1 %v6773_v12, %s4879_s21 }
 0x6b8   : > { %3592 = vst.msk [vmem:[#allocation4 + $0x96] sm:$0xff] %vm8200_vm5, %v3477_v53  ;;  %vm8209_vm5 = vmmov %vm8206_vm2 }
 0x6b9   : > { %3880 = vrot.lane.b32.xlu0 %v7651_v24, %s4879_s21  ;;  %v3479_v45 = vpop.permute.xlu1 %3478 }
 0x6ba   : > { %3593 = vst.msk [vmem:[#allocation4 + $0x9e] sm:$0x3] %vm8201_vm6, %v3479_v45  ;;  %vm8210_vm6 = vcmask 228546   ;;  %v4355_v45 = vrot.slane %v5211_v26, 1  ;;  %v4846_v26 = vld [vmem:[#allocation2 + $0x28] sm:$0x3] }
 0x6bb   : > { %v3661_v38 = vpop.permute.xlu0 %3660  ;;  %3882 = vrot.lane.b32.xlu1 %v6793_v17, %s4879_s21 }
 0x6bc   : > { %3780 = vst.msk [vmem:[#allocation4 + $0x7e] sm:$0xfc] %vm1723_vm12, %v3661_v38  ;;  %v4356_v38 = vrot.slane %v5228_v28, 1 }
 0x6bd   : > { %3884 = vrot.lane.b32.xlu0 %v6799_v46, %s4879_s21  ;;  %v3663_v2 = vpop.permute.xlu1 %3662 }
 0x6be   : > { %3781 = vst.msk [vmem:[#allocation4 + $0x86] sm:$0xff] %vm1725_vm14, %v3663_v2 }
 0x6bf   : > { %v3665_v57 = vpop.permute.xlu0 %3664  ;;  %3886 = vrot.lane.b32.xlu1 %v7662_v40, %s4879_s21 }
 0x6c0   : > { %3782 = vst.msk [vmem:[#allocation4 + $0x8e] sm:$0x3] %vm8202_vm7, %v3665_v57  ;;  %vm8211_vm7 = vcmask 228544  }
 0x6c1   : > { %3312 = vrot.lane.b32.xlu0 %v7723_v11, %s4876_s12  ;;  %v3667_v6 = vpop.permute.xlu1 %3666 }
 0x6c2   : > { %3783 = vst.msk [vmem:[#allocation4 + $0x8e] sm:$0xfc] %vm1723_vm12, %v3667_v6 }
 0x6c3   : > { %v3669_v50 = vpop.permute.xlu0 %3668  ;;  %3314 = vrot.lane.b32.xlu1 %v7728_v19, %s4876_s12 }
 0x6c4   : > { %3784 = vst.msk [vmem:[#allocation4 + $0x96] sm:$0xff] %vm1725_vm14, %v3669_v50  ;;  %v4363_v50 = vrot.slane %v4845_v25, 1  ;;  %v4848_v25 = vld [vmem:[#allocation2 + $0x58] sm:$0x3] }
 0x6c5   : > { %3316 = vrot.lane.b32.xlu0 %v7733_v42, %s4876_s12  ;;  %v3671_v59 = vpop.permute.xlu1 %3670 }
 0x6c6   : > { %3785 = vst.msk [vmem:[#allocation4 + $0x9e] sm:$0x3] %vm8203_vm8, %v3671_v59  ;;  %vm8212_vm8 = vcmask 222400  }
 0x6c7   : > { %v3853_v1 = vpop.permute.xlu0 %3852  ;;  %3318 = vrot.lane.b32.xlu1 %v7738_v56, %s4876_s12 }
 0x6c8   : > { %3972 = vst.msk [vmem:[#allocation4 + $0x7e] sm:$0xfc] %vm1918_vm10, %v3853_v1 }
 0x6c9   : > { %3320 = vrot.lane.b32.xlu0 %v7745_v55, %s4876_s12  ;;  %v3855_v21 = vpop.permute.xlu1 %3854 }
 0x6ca   : > { %3973 = vst.msk [vmem:[#allocation4 + $0x86] sm:$0xff] %vm1920_vm13, %v3855_v21 }
 0x6cb   : > { %v3857_v22 = vpop.permute.xlu0 %3856  ;;  %3322 = vrot.lane.b32.xlu1 %v7743_v41, %s4876_s12 }
 0x6cc   : > { %3974 = vst.msk [vmem:[#allocation4 + $0x8e] sm:$0x3] %vm1922_vm11, %v3857_v22 }
 0x6cd   : > { %3504 = vrot.lane.b32.xlu0 %v6759_v60, %s4877_s13  ;;  %v3859_v63 = vpop.permute.xlu1 %3858 }
 0x6ce   : > { %3975 = vst.msk [vmem:[#allocation4 + $0x8e] sm:$0xfc] %vm1918_vm10, %v3859_v63 }
 0x6cf   : > { %v3861_v10 = vpop.permute.xlu0 %3860  ;;  %3506 = vrot.lane.b32.xlu1 %v6773_v12, %s4877_s13 }
 0x6d0   : > { %3976 = vst.msk [vmem:[#allocation4 + $0x96] sm:$0xff] %vm1920_vm13, %v3861_v10 }
 0x6d1   : > { %3508 = vrot.lane.b32.xlu0 %v7651_v24, %s4877_s13  ;;  %v3863_v16 = vpop.permute.xlu1 %3862  ;;  %v4012_v60 = vld [vmem:[#allocation4 + $0x80] sm:$0xff] }
 0x6d2   : > { %3977 = vst.msk [vmem:[#allocation4 + $0x9e] sm:$0x3] %vm1922_vm11, %v3863_v16 }
 0x6d3   : > { %v3289_v3 = vpop.permute.xlu0 %3288  ;;  %3510 = vrot.lane.b32.xlu1 %v6793_v17, %s4877_s13  ;;  %v4013_v15 = vld [vmem:[#allocation4 + $0x88] sm:$0xff] }
 0x6d4   : > { %3402 = vst.msk [vmem:[#allocation4 + $0x9f] sm:$0xfe] %vm8204_vm9, %v3289_v3  ;;  %v4036_v7 = vpack.c.bf16 %v4013_v15, %v4012_v60  ;;  %vm8213_vm9 = vmmov %vm8210_vm6 }
 0x6d5   : > { %3512 = vrot.lane.b32.xlu0 %v6799_v46, %s4877_s13  ;;  %v3291_v12 = vpop.permute.xlu1 %3290 }
 0x6d6   : > { %3403 = vst.msk [vmem:[#allocation4 + $0xa7] sm:$0xff] %vm8205_vm1, %v3291_v12  ;;  %4771 = vmatprep.mubr.msk.bf16.mxu1 %vm2037_vm15, %v4036_v7  ;;  %vm8214_vm1 = vmmov %vm8211_vm7 }
 0x6d7   : > { %v3293_v34 = vpop.permute.xlu0 %3292  ;;  %3514 = vrot.lane.b32.xlu1 %v7662_v40, %s4877_s13  ;;  %v4014_v39 = vld [vmem:[#allocation4 + $0x90] sm:$0xff] }
 0x6d8   : > { %3404 = vst.msk [vmem:[#allocation4 + $0xaf] sm:$0x1] %vm8206_vm2, %v3293_v34  ;;  %vm8215_vm2 = vmmov %vm8212_vm8 }
 0x6d9   : > { %3696 = vrot.lane.b32.xlu0 %v6793_v17, %s4878_s14  ;;  %v3295_v44 = vpop.permute.xlu1 %3294  ;;  %v4015_v24 = vld [vmem:[#allocation4 + $0x98] sm:$0xff] }
 0x6da   : > { %3405 = vst.msk [vmem:[#allocation4 + $0xaf] sm:$0xfe] %vm8207_vm3, %v3295_v44  ;;  %v4037_v52 = vpack.c.bf16 %v4015_v24, %v4014_v39  ;;  %vm8216_vm3 = vcmask 255200  }
 0x6db   : > { %v3297_v4 = vpop.permute.xlu0 %3296  ;;  %3698 = vrot.lane.b32.xlu1 %v6799_v46, %s4878_s14 }
 0x6dc   : > { %3406 = vst.msk [vmem:[#allocation4 + $0xb7] sm:$0xff] %vm8208_vm4, %v3297_v4  ;;  %4772 = vmatmul.mubr.msk.bf16.gmra.mrb[16].mxu1 %vm2037_vm15, %v4037_v52  ;;  %vm8217_vm4 = vmmov %vm8216_vm3 }
 0x6dd   : > { %3700 = vrot.lane.b32.xlu0 %v7662_v40, %s4878_s14  ;;  %v3299_v23 = vpop.permute.xlu1 %3298 }
 0x6de   : > { %3407 = vst.msk [vmem:[#allocation4 + $0xbf] sm:$0x1] %vm8209_vm5, %v3299_v23  ;;  %vm8218_vm5 = vcmask 195745  }
 0x6df   : > { %v3481_v17 = vpop.permute.xlu0 %3480  ;;  %3702 = vrot.lane.b32.xlu1 %v7723_v11, %s4878_s14 }
 0x6e0   : > { %3594 = vst.msk [vmem:[#allocation4 + $0x9e] sm:$0xfc] %vm8210_vm6, %v3481_v17  ;;  %vm4354_vm6 = vcmask 1046528  }
 0x6e1   : > { %3704 = vrot.lane.b32.xlu0 %v7728_v19, %s4878_s14  ;;  %v3483_v46 = vpop.permute.xlu1 %3482  ;;  %v4362_v28 = vsel %vm4354_vm6, %v4360_v61, %v4361_v33  ;;  %v4364_v10 = vsel %vm4354_vm6, %v4361_v33, %v4363_v50  ;;  %v4371_v61 = vrot.slane %v5240_v31, 1  ;;  %v4365_v33 = vrot.slane %v5232_v30, 1 }
 0x6e2   : > { %3595 = vst.msk [vmem:[#allocation4 + $0xa6] sm:$0xff] %vm8211_vm7, %v3483_v46  ;;  %vm8219_vm7 = vcmask 195744   ;;  %v4368_v50 = vrot.slane %v4848_v25, 1 }
 0x6e3   : > { %v3485_v14 = vpop.permute.xlu0 %3484  ;;  %3706 = vrot.lane.b32.xlu1 %v7733_v42, %s4878_s14 }
 0x6e4   : > { %3596 = vst.msk [vmem:[#allocation4 + $0xae] sm:$0x3] %vm8212_vm8, %v3485_v14  ;;  %vm8220_vm8 = vcmask 188576  }
 0x6e5   : > { %3888 = vrot.lane.b32.xlu0 %v7723_v11, %s4879_s21  ;;  %v3487_v40 = vpop.permute.xlu1 %3486  ;;  %v7831_v11 = vld [vmem:[%s8088_s6] ss:$0 sm:$0xff] }
 0x6e6   : > { %3597 = vst.msk [vmem:[#allocation4 + $0xae] sm:$0xfc] %vm8213_vm9, %v3487_v40  ;;  %vm8221_vm9 = vmmov %vm8218_vm5 }
 0x6e7   : > { %v3489_v37 = vpop.permute.xlu0 %3488  ;;  %3890 = vrot.lane.b32.xlu1 %v7728_v19, %s4879_s21 }
 0x6e8   : > { %3598 = vst.msk [vmem:[#allocation4 + $0xb6] sm:$0xff] %vm8214_vm1, %v3489_v37  ;;  %vm8222_vm1 = vmmov %vm8219_vm7 }
 0x6e9   : > { %3892 = vrot.lane.b32.xlu0 %v7733_v42, %s4879_s21  ;;  %v3491_v35 = vpop.permute.xlu1 %3490  ;;  %v4358_v42 = vrot.slane %v4846_v26, 1 }
 0x6ea   : > { %3599 = vst.msk [vmem:[#allocation4 + $0xbe] sm:$0x3] %vm8215_vm2, %v3491_v35  ;;  %vm8223_vm2 = vmmov %vm8220_vm8 }
 0x6eb   : > { %v3673_v18 = vpop.permute.xlu0 %3672  ;;  %3894 = vrot.lane.b32.xlu1 %v7738_v56, %s4879_s21  ;;  %v4359_v34 = vsel %vm4354_vm6, %v4356_v38, %v4358_v42 }
 0x6ec   : > { %3786 = vst.msk [vmem:[#allocation4 + $0x9e] sm:$0xfc] %vm1723_vm12, %v3673_v18 }
 0x6ed   : > { %3896 = vrot.lane.b32.xlu0 %v7745_v55, %s4879_s21  ;;  %v3675_v49 = vpop.permute.xlu1 %3674  ;;  %v4357_v55 = vsel %vm4354_vm6, %v4355_v45, %v4356_v38  ;;  %v4847_v38 = vld [vmem:[#allocation2 + $0x70] sm:$0x3] }
 0x6ee   : > { %3787 = vst.msk [vmem:[#allocation4 + $0xa6] sm:$0xff] %vm1725_vm14, %v3675_v49 }
 0x6ef   : > { %v3677_v13 = vpop.permute.xlu0 %3676  ;;  %3898 = vrot.lane.b32.xlu1 %v7743_v41, %s4879_s21 }
 0x6f0   : > { %3788 = vst.msk [vmem:[#allocation4 + $0xae] sm:$0x3] %vm8216_vm3, %v3677_v13  ;;  %vm8224_vm3 = vcmask 228546  }
 0x6f1   : > { %v3679_v48 = vpop.permute.xlu1 %3678 }
 0x6f2   : > { %3789 = vst.msk [vmem:[#allocation4 + $0xae] sm:$0xfc] %vm1723_vm12, %v3679_v48 }
 0x6f3   : > { %v3681_v43 = vpop.permute.xlu0 %3680 }
 0x6f4   : > { %3790 = vst.msk [vmem:[#allocation4 + $0xb6] sm:$0xff] %vm1725_vm14, %v3681_v43 }
 0x6f5   : > { %v3683_v9 = vpop.permute.xlu1 %3682 }
 0x6f6   : > { %3791 = vst.msk [vmem:[#allocation4 + $0xbe] sm:$0x3] %vm8217_vm4, %v3683_v9  ;;  %vm8225_vm4 = vcmask 228544  }
 0x6f7   : > { %v3865_v5 = vpop.permute.xlu0 %3864 }
 0x6f8   : > { %3978 = vst.msk [vmem:[#allocation4 + $0x9e] sm:$0xfc] %vm1918_vm10, %v3865_v5 }
 0x6f9   : > { %v3867_v20 = vpop.permute.xlu1 %3866 }
 0x6fa   : > { %3979 = vst.msk [vmem:[#allocation4 + $0xa6] sm:$0xff] %vm1920_vm13, %v3867_v20 }
 0x6fb   : > { %v3869_v58 = vpop.permute.xlu0 %3868 }
 0x6fc   : > { %3980 = vst.msk [vmem:[#allocation4 + $0xae] sm:$0x3] %vm1922_vm11, %v3869_v58 }
 0x6fd   : > { %v3871_v62 = vpop.permute.xlu1 %3870 }
 0x6fe   : > { %3981 = vst.msk [vmem:[#allocation4 + $0xae] sm:$0xfc] %vm1918_vm10, %v3871_v62 }
 0x6ff   : > { %v3873_v8 = vpop.permute.xlu0 %3872 }
 0x700   : > { %3982 = vst.msk [vmem:[#allocation4 + $0xb6] sm:$0xff] %vm1920_vm13, %v3873_v8 }
 0x701   : > { %v3875_v51 = vpop.permute.xlu1 %3874  ;;  %v4016_v54 = vld [vmem:[#allocation4 + $0xa0] sm:$0xff] }
 0x702   : > { %3983 = vst.msk [vmem:[#allocation4 + $0xbe] sm:$0x3] %vm1922_vm11, %v3875_v51 }
 0x703   : > { %v3301_v47 = vpop.permute.xlu0 %3300  ;;  %v4017_v53 = vld [vmem:[#allocation4 + $0xa8] sm:$0xff] }
 0x704   : > { %3408 = vst.msk [vmem:[#allocation4 + $0xbf] sm:$0xfe] %vm8218_vm5, %v3301_v47  ;;  %v4038_v2 = vpack.c.bf16 %v4017_v53, %v4016_v54  ;;  %vm8226_vm5 = vcmask 222400   ;;  %v4370_v47 = vrot.slane %v5242_v32, 1  ;;  %v4366_v54 = vrot.slane %v5230_v29, 1 }
 0x705   : > { %v4757_v57 = vpop.f32.mrb[0].mxu1  ;;  %v3303_v6 = vpop.permute.xlu1 %3302 }
 0x706   : > { %v4285_v27 = vmul.f32 %v4757_v57, %v7821_v0  ;;  %3409 = vst.msk [vmem:[#allocation4 + $0xc7] sm:$0xff] %vm8219_vm7, %v3303_v6  ;;  %v4149_v19 = vpop.f32.mrb[1].mxu1  ;;  %4775 = vmatprep.mubr.msk.bf16.mxu1 %vm2037_vm15, %v4038_v2  ;;  %vm8227_vm7 = vmmov %vm8224_vm3  ;;  %v4373_v2 = vrot.slane %v4847_v38, 1  ;;  %v4372_v32 = vsel %vm4354_vm6, %v4370_v47, %v4371_v61  ;;  %v4367_v29 = vsel %vm4354_vm6, %v4365_v33, %v4366_v54 }
 0x707   : > { %v4283_v59 = vmul.f32 %v7821_v0, %v4149_v19  ;;  %v3305_v1 = vpop.permute.xlu0 %3304  ;;  %v4758_v56 = vpop.f32.mrb[2].mxu1  ;;  %v4018_v60 = vld [vmem:[#allocation4 + $0xb0] sm:$0xff] }
 0x708   : > { %v4324_v41 = vadd.f32 %v7831_v11, %v4285_v27  ;;  %3410 = vst.msk [vmem:[#allocation4 + $0xcf] sm:$0x1] %vm8220_vm8, %v3305_v1  ;;  %v4286_v21 = vmul.f32 %v4758_v56, %v7821_v0  ;;  %v4152_v22 = vpop.f32.mrb[3].mxu1  ;;  %vm8228_vm8 = vmmov %vm8225_vm4 }
 0x709   : > { %v4322_v63 = vadd.f32 %v7831_v11, %v4283_v59  ;;  %v4284_v16 = vmul.f32 %v7821_v0, %v4152_v22  ;;  %v3307_v3 = vpop.permute.xlu1 %3306  ;;  %v4019_v15 = vld [vmem:[#allocation4 + $0xb8] sm:$0xff]  ;;  %v4374_v59 = vsel %vm4354_vm6, %v4371_v61, %v4373_v2  ;;  %v8246_v61 = vld [vmem:[#allocation6_spill] sm:$0xff] }
 0x70a   : > { %v4469_v7 = vadd.f32 %v4362_v28, %v4324_v41  ;;  %v4325_v12 = vadd.f32 %v7831_v11, %v4286_v21  ;;  %3411 = vst.msk [vmem:[#allocation4 + $0xcf] sm:$0xfe] %vm8221_vm9, %v3307_v3  ;;  %v4039_v44 = vpack.c.bf16 %v4019_v15, %v4018_v60  ;;  %vm8229_vm9 = vmmov %vm8226_vm5  ;;  %v4369_v21 = vsel %vm4354_vm6, %v4366_v54, %v4368_v50 }
 0x70b   : > { %v4467_v39 = vadd.f32 %v4357_v55, %v4322_v63  ;;  %v4323_v24 = vadd.f32 %v7831_v11, %v4284_v16  ;;  %v3309_v52 = vpop.permute.xlu0 %3308  ;;  %v4376_v33 = vrot.slane %v8246_v61, 1 }
 0x70c   : > { %v4501_v4 = vmax.f32 %v4469_v7, 0.0  ;;  %v4470_v23 = vadd.f32 %v4364_v10, %v4325_v12  ;;  %3412 = vst.msk [vmem:[#allocation4 + $0xd7] sm:$0xff] %vm8222_vm1, %v3309_v52  ;;  %4776 = vmatmul.mubr.msk.bf16.gmra.mrb[20].mxu1 %vm2037_vm15, %v4039_v44  ;;  %vm8230_vm1 = vcmask 255200  }
 0x70d   : > { %v4499_v17 = vmax.f32 %v4467_v39, 0.0  ;;  %v4468_v46 = vadd.f32 %v4359_v34, %v4323_v24  ;;  %v3311_v14 = vpop.permute.xlu1 %3310 }
 0x70e   : > { %4533 = vst.msk [vmem:[%s7853_s18 + $0x10] sm:$0xff] %vm280_vm0, %v4501_v4  ;;  %v4502_v40 = vmax.f32 %v4470_v23, 0.0 }
 0x70f   : > { %3413 = vst.msk [vmem:[#allocation4 + $0xdf] sm:$0x1] %vm8223_vm2, %v3311_v14  ;;  %v4500_v37 = vmax.f32 %v4468_v46, 0.0  ;;  %v3493_v35 = vpop.permute.xlu0 %3492  ;;  %vm8231_vm2 = vmmov %vm8230_vm1 }
 0x710   : > { %4531 = vst.msk [vmem:[%s7853_s18] sm:$0xff] %vm280_vm0, %v4499_v17  ;;  %4534 = vst.msk [vmem:[%s7853_s18 + $0x18] sm:$0xff] %vm280_vm0, %v4502_v40 }
 0x711   : > { %3600 = vst.msk [vmem:[#allocation4 + $0xbe] sm:$0xfc] %vm8224_vm3, %v3493_v35  ;;  %v3495_v18 = vpop.permute.xlu1 %3494  ;;  %vm8232_vm3 = vcmask 195745  }
 0x712   : > { %4532 = vst.msk [vmem:[%s7853_s18 + $0x8] sm:$0xff] %vm280_vm0, %v4500_v37 }
 0x713   : > { %3601 = vst.msk [vmem:[#allocation4 + $0xc6] sm:$0xff] %vm8225_vm4, %v3495_v18  ;;  %v3497_v49 = vpop.permute.xlu0 %3496  ;;  %vm8233_vm4 = vcmask 195744  }
 0x714   : > { %3602 = vst.msk [vmem:[#allocation4 + $0xce] sm:$0x3] %vm8226_vm5, %v3497_v49  ;;  %vm8234_vm5 = vcmask 188576  }
 0x715   : > { %v3499_v13 = vpop.permute.xlu1 %3498 }
 0x716   : > { %3603 = vst.msk [vmem:[#allocation4 + $0xce] sm:$0xfc] %vm8227_vm7, %v3499_v13  ;;  %vm8235_vm7 = vmmov %vm8232_vm3 }
 0x717   : > { %v3501_v48 = vpop.permute.xlu0 %3500 }
 0x718   : > { %3604 = vst.msk [vmem:[#allocation4 + $0xd6] sm:$0xff] %vm8228_vm8, %v3501_v48  ;;  %vm8236_vm8 = vmmov %vm8233_vm4 }
 0x719   : > { %v3503_v43 = vpop.permute.xlu1 %3502 }
 0x71a   : > { %3605 = vst.msk [vmem:[#allocation4 + $0xde] sm:$0x3] %vm8229_vm9, %v3503_v43  ;;  %vm8237_vm9 = vmmov %vm8234_vm5 }
 0x71b   : > { %v3685_v9 = vpop.permute.xlu0 %3684 }
 0x71c   : > { %3792 = vst.msk [vmem:[#allocation4 + $0xbe] sm:$0xfc] %vm1723_vm12, %v3685_v9 }
 0x71d   : > { %v3687_v5 = vpop.permute.xlu1 %3686 }
 0x71e   : > { %3793 = vst.msk [vmem:[#allocation4 + $0xc6] sm:$0xff] %vm1725_vm14, %v3687_v5 }
 0x71f   : > { %v3689_v20 = vpop.permute.xlu0 %3688 }
 0x720   : > { %3794 = vst.msk [vmem:[#allocation4 + $0xce] sm:$0x3] %vm8230_vm1, %v3689_v20  ;;  %vm8238_vm1 = vcmask 228546  }
 0x721   : > { %v3691_v58 = vpop.permute.xlu1 %3690 }
 0x722   : > { %3795 = vst.msk [vmem:[#allocation4 + $0xce] sm:$0xfc] %vm1723_vm12, %v3691_v58  ;;  %v4380_v58 = vrot.slane %v5256_v36, 1 }
 0x723   : > { %v3693_v62 = vpop.permute.xlu0 %3692 }
 0x724   : > { %3796 = vst.msk [vmem:[#allocation4 + $0xd6] sm:$0xff] %vm1725_vm14, %v3693_v62  ;;  %v8244_v62 = vld [vmem:[#allocation7_spill] sm:$0xff] }
 0x725   : > { %v3695_v8 = vpop.permute.xlu1 %3694 }
 0x726   : > { %3797 = vst.msk [vmem:[#allocation4 + $0xde] sm:$0x3] %vm8231_vm2, %v3695_v8  ;;  %vm8239_vm2 = vcmask 228544   ;;  %v4381_v8 = vrot.slane %v8244_v62, 1 }
 0x727   : > { %v3877_v51 = vpop.permute.xlu0 %3876 }
 0x728   : > { %3984 = vst.msk [vmem:[#allocation4 + $0xbe] sm:$0xfc] %vm1918_vm10, %v3877_v51  ;;  %v8245_v51 = vld [vmem:[#allocation5_spill] sm:$0xff]  ;;  %v4382_v36 = vsel %vm4354_vm6, %v4380_v58, %v4381_v8 }
 0x729   : > { %v4761_v53 = vpop.f32.mrb[4].mxu1  ;;  %v3879_v45 = vpop.permute.xlu1 %3878  ;;  %v4375_v47 = vrot.slane %v8245_v51, 1 }
 0x72a   : > { %v4289_v57 = vmul.f32 %v4761_v53, %v7821_v0  ;;  %3985 = vst.msk [vmem:[#allocation4 + $0xc6] sm:$0xff] %vm1920_vm13, %v3879_v45  ;;  %v4165_v6 = vpop.f32.mrb[5].mxu1  ;;  %v4849_v45 = vld [vmem:[#allocation2 + $0xa0] sm:$0x3] }
 0x72b   : > { %v4287_v31 = vmul.f32 %v7821_v0, %v4165_v6  ;;  %v3881_v27 = vpop.permute.xlu0 %3880  ;;  %v4762_v19 = vpop.f32.mrb[6].mxu1  ;;  %v4383_v38 = vrot.slane %v4849_v45, 1  ;;  %v4850_v6 = vld [vmem:[#allocation2 + $0x88] sm:$0x3] }
 0x72c   : > { %v4328_v30 = vadd.f32 %v7831_v11, %v4289_v57  ;;  %3986 = vst.msk [vmem:[#allocation4 + $0xce] sm:$0x3] %vm1922_vm11, %v3881_v27  ;;  %v4290_v26 = vmul.f32 %v4762_v19, %v7821_v0  ;;  %v4168_v42 = vpop.f32.mrb[7].mxu1  ;;  %v4378_v25 = vrot.slane %v4850_v6, 1  ;;  %v4377_v19 = vsel %vm4354_vm6, %v4375_v47, %v4376_v33 }
 0x72d   : > { %v4326_v28 = vadd.f32 %v7831_v11, %v4287_v31  ;;  %v4288_v1 = vmul.f32 %v7821_v0, %v4168_v42  ;;  %v3883_v56 = vpop.permute.xlu1 %3882  ;;  %v4384_v42 = vsel %vm4354_vm6, %v4381_v8, %v4383_v38  ;;  %v4852_v8 = vld [vmem:[#allocation2 + $0xb8] sm:$0x3] }
 0x72e   : > { %v4473_v41 = vadd.f32 %v4372_v32, %v4328_v30  ;;  %v4329_v55 = vadd.f32 %v7831_v11, %v4290_v26  ;;  %3987 = vst.msk [vmem:[#allocation4 + $0xce] sm:$0xfc] %vm1918_vm10, %v3883_v56  ;;  %v4388_v51 = vrot.slane %v4852_v8, 1 }
 0x72f   : > { %v4471_v22 = vadd.f32 %v4367_v29, %v4326_v28  ;;  %v4327_v63 = vadd.f32 %v7831_v11, %v4288_v1  ;;  %v3885_v10 = vpop.permute.xlu0 %3884 }
 0x730   : > { %v4505_v16 = vmax.f32 %v4473_v41, 0.0  ;;  %v4474_v3 = vadd.f32 %v4374_v59, %v4329_v55  ;;  %3988 = vst.msk [vmem:[#allocation4 + $0xd6] sm:$0xff] %vm1920_vm13, %v3885_v10  ;;  %v4379_v41 = vsel %vm4354_vm6, %v4376_v33, %v4378_v25 }
 0x731   : > { %v4503_v60 = vmax.f32 %v4471_v22, 0.0  ;;  %v4472_v15 = vadd.f32 %v4369_v21, %v4327_v63  ;;  %v3887_v7 = vpop.permute.xlu1 %3886  ;;  %v4020_v39 = vld [vmem:[#allocation4 + $0xc0] sm:$0xff] }
 0x732   : > { %4537 = vst.msk [vmem:[%s7853_s18 + $0x30] sm:$0xff] %vm280_vm0, %v4505_v16  ;;  %v4506_v12 = vmax.f32 %v4474_v3, 0.0 }
 0x733   : > { %3989 = vst.msk [vmem:[#allocation4 + $0xde] sm:$0x3] %vm1922_vm11, %v3887_v7  ;;  %v4504_v34 = vmax.f32 %v4472_v15, 0.0  ;;  %v3313_v44 = vpop.permute.xlu0 %3312  ;;  %v4021_v24 = vld [vmem:[#allocation4 + $0xc8] sm:$0xff] }
 0x734   : > { %4535 = vst.msk [vmem:[%s7853_s18 + $0x20] sm:$0xff] %vm280_vm0, %v4503_v60  ;;  %4538 = vst.msk [vmem:[%s7853_s18 + $0x38] sm:$0xff] %vm280_vm0, %v4506_v12  ;;  %v4040_v52 = vpack.c.bf16 %v4021_v24, %v4020_v39 }
 0x735   : > { %3414 = vst.msk [vmem:[#allocation4 + $0xdf] sm:$0xfe] %vm8232_vm3, %v3313_v44  ;;  %v3315_v4 = vpop.permute.xlu1 %3314  ;;  %vm8240_vm3 = vcmask 222400  }
 0x736   : > { %4536 = vst.msk [vmem:[%s7853_s18 + $0x28] sm:$0xff] %vm280_vm0, %v4504_v34  ;;  %4779 = vmatprep.mubr.msk.bf16.mxu1 %vm2037_vm15, %v4040_v52 }
 0x737   : > { %3415 = vst.msk [vmem:[#allocation4 + $0xe7] sm:$0xff] %vm8233_vm4, %v3315_v4  ;;  %v3317_v23 = vpop.permute.xlu0 %3316  ;;  %v4022_v46 = vld [vmem:[#allocation4 + $0xd0] sm:$0xff]  ;;  %vm8241_vm4 = vmmov %vm8238_vm1 }
 0x738   : > { %3416 = vst.msk [vmem:[#allocation4 + $0xef] sm:$0x1] %vm8234_vm5, %v3317_v23  ;;  %vm8242_vm5 = vmmov %vm8239_vm2 }
 0x739   : > { %v3319_v17 = vpop.permute.xlu1 %3318 }
 0x73a   : > { %v4023_v14 = vld [vmem:[#allocation4 + $0xd8] sm:$0xff]  ;;  %3417 = vst.msk [vmem:[#allocation4 + $0xef] sm:$0xfe] %vm8235_vm7, %v3319_v17  ;;  %vm8243_vm7 = vmmov %vm8240_vm3 }
 0x73b   : > { %v4041_v40 = vpack.c.bf16 %v4023_v14, %v4022_v46  ;;  %v3321_v37 = vpop.permute.xlu0 %3320 }
 0x73c   : > { %3418 = vst.msk [vmem:[#allocation4 + $0xf7] sm:$0xff] %vm8236_vm8, %v3321_v37  ;;  %vm8247_vm8 = vcmask 255200  }
 0x73d   : > { %4780 = vmatmul.mubr.msk.bf16.gmra.mrb[24].mxu1 %vm2037_vm15, %v4041_v40  ;;  %v3323_v35 = vpop.permute.xlu1 %3322  ;;  %v8249_v40 = vld [vmem:[#allocation10_spill] sm:$0xff] }
 0x73e   : > { %3419 = vst.msk [vmem:[#allocation4 + $0xff] sm:$0x1] %vm8237_vm9, %v3323_v35  ;;  %v4390_v37 = vrot.slane %v8249_v40, 1  ;;  %v8250_v35 = vld [vmem:[#allocation11_spill] sm:$0xff] }
 0x73f   : > { %v3505_v18 = vpop.permute.xlu0 %3504 }
 0x740   : > { %3606 = vst.msk [vmem:[#allocation4 + $0xde] sm:$0xfc] %vm8238_vm1, %v3505_v18  ;;  %v4391_v18 = vrot.slane %v8250_v35, 1 }
 0x741   : > { %v3507_v49 = vpop.permute.xlu1 %3506 }
 0x742   : > { %3607 = vst.msk [vmem:[#allocation4 + $0xe6] sm:$0xff] %vm8239_vm2, %v3507_v49  ;;  %v8251_v49 = vld [vmem:[#allocation9_spill] sm:$0xff]  ;;  %v4392_v47 = vsel %vm4354_vm6, %v4390_v37, %v4391_v18 }
 0x743   : > { %v3509_v13 = vpop.permute.xlu0 %3508 }
 0x744   : > { %3608 = vst.msk [vmem:[#allocation4 + $0xee] sm:$0x3] %vm8240_vm3, %v3509_v13  ;;  %v4385_v13 = vrot.slane %v8251_v49, 1 }
 0x745   : > { %v3511_v48 = vpop.permute.xlu1 %3510 }
 0x746   : > { %3609 = vst.msk [vmem:[#allocation4 + $0xee] sm:$0xfc] %vm8241_vm4, %v3511_v48  ;;  %v8252_v48 = vld [vmem:[#allocation8_spill] sm:$0xff] }
 0x747   : > { %v3513_v43 = vpop.permute.xlu0 %3512 }
 0x748   : > { %3610 = vst.msk [vmem:[#allocation4 + $0xf6] sm:$0xff] %vm8242_vm5, %v3513_v43  ;;  %v4386_v43 = vrot.slane %v8252_v48, 1 }
 0x749   : > { %v3515_v9 = vpop.permute.xlu1 %3514 }
 0x74a   : > { %3611 = vst.msk [vmem:[#allocation4 + $0xfe] sm:$0x3] %vm8243_vm7, %v3515_v9 }
 0x74b   : > { %v3697_v5 = vpop.permute.xlu0 %3696 }
 0x74c   : > { %3798 = vst.msk [vmem:[#allocation4 + $0xde] sm:$0xfc] %vm1723_vm12, %v3697_v5  ;;  %v4851_v5 = vld [vmem:[#allocation2 + $0xd0] sm:$0x3] }
 0x74d   : > { %v3699_v20 = vpop.permute.xlu1 %3698 }
 0x74e   : > { %3799 = vst.msk [vmem:[#allocation4 + $0xe6] sm:$0xff] %vm1725_vm14, %v3699_v20  ;;  %v4393_v20 = vrot.slane %v4851_v5, 1 }
 0x74f   : > { %v3701_v54 = vpop.permute.xlu0 %3700  ;;  %v4765_v53 = vpop.f32.mrb[8].mxu1 }
 0x750   : > { %3800 = vst.msk [vmem:[#allocation4 + $0xee] sm:$0x3] %vm8247_vm8, %v3701_v54  ;;  %v4293_v2 = vmul.f32 %v4765_v53, %v7821_v0  ;;  %v4181_v57 = vpop.f32.mrb[9].mxu1  ;;  %v4387_v53 = vsel %vm4354_vm6, %v4385_v13, %v4386_v43 }
 0x751   : > { %v4291_v50 = vmul.f32 %v7821_v0, %v4181_v57  ;;  %v4766_v32 = vpop.f32.mrb[10].mxu1  ;;  %v3703_v31 = vpop.permute.xlu1 %3702  ;;  %v4394_v57 = vsel %vm4354_vm6, %v4391_v18, %v4393_v20  ;;  %v8257_v20 = vld [vmem:[#allocation19_spill] sm:$0xff] }
 0x752   : > { %v4332_v27 = vadd.f32 %v7831_v11, %v4293_v2  ;;  %v4294_v30 = vmul.f32 %v4766_v32, %v7821_v0  ;;  %3801 = vst.msk [vmem:[#allocation4 + $0xee] sm:$0xfc] %vm1723_vm12, %v3703_v31  ;;  %v4184_v29 = vpop.f32.mrb[11].mxu1  ;;  %vm8248_vm12 = vmmov %vm8247_vm8 }
 0x753   : > { %v4330_v26 = vadd.f32 %v7831_v11, %v4291_v50  ;;  %v4292_v28 = vmul.f32 %v7821_v0, %v4184_v29  ;;  %v3705_v59 = vpop.permute.xlu0 %3704  ;;  %v4389_v50 = vsel %vm4354_vm6, %v4386_v43, %v4388_v51  ;;  %v8259_v51 = vld [vmem:[#allocation16_spill] sm:$0xff] }
 0x754   : > { %v4477_v1 = vadd.f32 %v4382_v36, %v4332_v27  ;;  %v4333_v56 = vadd.f32 %v7831_v11, %v4294_v30  ;;  %3802 = vst.msk [vmem:[#allocation4 + $0xf6] sm:$0xff] %vm1725_vm14, %v3705_v59 }
 0x755   : > { %v4475_v55 = vadd.f32 %v4377_v19, %v4330_v26  ;;  %v4331_v21 = vadd.f32 %v7831_v11, %v4292_v28  ;;  %v3707_v22 = vpop.permute.xlu1 %3706  ;;  %v8253_v28 = vld [vmem:[#allocation15_spill] sm:$0xff] }
 0x756   : > { %v4509_v63 = vmax.f32 %v4477_v1, 0.0  ;;  %v4478_v10 = vadd.f32 %v4384_v42, %v4333_v56  ;;  %3803 = vst.msk [vmem:[#allocation4 + $0xfe] sm:$0x3] %vm8248_vm12, %v3707_v22  ;;  %v4400_v59 = vrot.slane %v8253_v28, 1  ;;  %v8254_v1 = vld [vmem:[#allocation14_spill] sm:$0xff] }
 0x757   : > { %v4507_v16 = vmax.f32 %v4475_v55, 0.0  ;;  %v4476_v3 = vadd.f32 %v4379_v41, %v4331_v21  ;;  %v3889_v60 = vpop.permute.xlu0 %3888  ;;  %v4401_v56 = vrot.slane %v8254_v1, 1  ;;  %v8255_v41 = vld [vmem:[#allocation13_spill] sm:$0xff]  ;;  %v8256_v21 = vld [vmem:[#allocation12_spill] sm:$0xff] }
 0x758   : > { %4541 = vst.msk [vmem:[%s7853_s18 + $0x50] sm:$0xff] %vm280_vm0, %v4509_v63  ;;  %v4510_v15 = vmax.f32 %v4478_v10, 0.0  ;;  %v4395_v55 = vrot.slane %v8255_v41, 1  ;;  %v4396_v22 = vrot.slane %v8256_v21, 1  ;;  %v4853_v10 = vld [vmem:[#allocation2 + $0x100] sm:$0x3] }
 0x759   : > { %3990 = vst.msk [vmem:[#allocation4 + $0xde] sm:$0xfc] %vm1918_vm10, %v3889_v60  ;;  %v4508_v7 = vmax.f32 %v4476_v3, 0.0  ;;  %v3891_v12 = vpop.permute.xlu1 %3890 }
 0x75a   : > { %4539 = vst.msk [vmem:[%s7853_s18 + $0x40] sm:$0xff] %vm280_vm0, %v4507_v16  ;;  %4542 = vst.msk [vmem:[%s7853_s18 + $0x58] sm:$0xff] %vm280_vm0, %v4510_v15  ;;  %v4403_v16 = vrot.slane %v4853_v10, 1  ;;  %v4854_v15 = vld [vmem:[#allocation2 + $0xe8] sm:$0x3] }
 0x75b   : > { %3991 = vst.msk [vmem:[#allocation4 + $0xe6] sm:$0xff] %vm1920_vm13, %v3891_v12  ;;  %v3893_v34 = vpop.permute.xlu0 %3892  ;;  %v4402_v12 = vsel %vm4354_vm6, %v4400_v59, %v4401_v56 }
 0x75c   : > { %4540 = vst.msk [vmem:[%s7853_s18 + $0x48] sm:$0xff] %vm280_vm0, %v4508_v7  ;;  %v4398_v7 = vrot.slane %v4854_v15, 1 }
 0x75d   : > { %3992 = vst.msk [vmem:[#allocation4 + $0xee] sm:$0x3] %vm1922_vm11, %v3893_v34  ;;  %v3895_v44 = vpop.permute.xlu1 %3894 }
 0x75e   : > { %3993 = vst.msk [vmem:[#allocation4 + $0xee] sm:$0xfc] %vm1918_vm10, %v3895_v44  ;;  %v4399_v37 = vsel %vm4354_vm6, %v4396_v22, %v4398_v7  ;;  %v8263_v7 = vld [vmem:[#allocation21_spill] sm:$0xff] }
 0x75f   : > { %v3897_v39 = vpop.permute.xlu0 %3896 }
 0x760   : > { %3994 = vst.msk [vmem:[#allocation4 + $0xf6] sm:$0xff] %vm1920_vm13, %v3897_v39 }
 0x761   : > { %v3899_v24 = vpop.permute.xlu1 %3898 }
 0x762   : > { %3995 = vst.msk [vmem:[#allocation4 + $0xfe] sm:$0x3] %vm1922_vm11, %v3899_v24  ;;  %v4024_v52 = vld [vmem:[#allocation4 + $0xe0] sm:$0xff]  ;;  %v4397_v24 = vsel %vm4354_vm6, %v4395_v55, %v4396_v22 }
 0x764   : > { %v4025_v4 = vld [vmem:[#allocation4 + $0xe8] sm:$0xff] }
 0x765   : > { %v4042_v23 = vpack.c.bf16 %v4025_v4, %v4024_v52 }
 0x767   : > { %4783 = vmatprep.mubr.msk.bf16.mxu1 %vm2037_vm15, %v4042_v23  ;;  %v4026_v17 = vld [vmem:[#allocation4 + $0xf0] sm:$0xff] }
 0x769   : > { %v4027_v46 = vld [vmem:[#allocation4 + $0xf8] sm:$0xff] }
 0x76a   : > { %v4043_v14 = vpack.c.bf16 %v4027_v46, %v4026_v17  ;;  %v4404_v17 = vsel %vm4354_vm6, %v4401_v56, %v4403_v16  ;;  %v8261_v16 = vld [vmem:[#allocation22_spill] sm:$0xff] }
 0x76c   : > { %4784 = vmatmul.mubr.msk.bf16.gmra.mrb[28].mxu1 %vm2037_vm15, %v4043_v14 }
 0x77f   : > { %v4769_v9 = vpop.f32.mrb[12].mxu1 }
 0x780   : > { %v4297_v58 = vmul.f32 %v4769_v9, %v7821_v0  ;;  %v4197_v62 = vpop.f32.mrb[13].mxu1 }
 0x781   : > { %v4295_v61 = vmul.f32 %v7821_v0, %v4197_v62  ;;  %v4770_v33 = vpop.f32.mrb[14].mxu1  ;;  %v8258_v62 = vld [vmem:[#allocation18_spill] sm:$0xff] }
 0x782   : > { %v4336_v54 = vadd.f32 %v7831_v11, %v4297_v58  ;;  %v4298_v45 = vmul.f32 %v4770_v33, %v7821_v0  ;;  %v4200_v38 = vpop.f32.mrb[15].mxu1  ;;  %v4410_v58 = vrot.slane %v8257_v20, 1  ;;  %v4411_v8 = vrot.slane %v8258_v62, 1 }
 0x783   : > { %v4334_v2 = vadd.f32 %v7831_v11, %v4295_v61  ;;  %v4296_v6 = vmul.f32 %v7821_v0, %v4200_v38  ;;  %v8260_v61 = vld [vmem:[#allocation17_spill] sm:$0xff] }
 0x784   : > { %v4481_v25 = vadd.f32 %v4392_v47, %v4336_v54  ;;  %v4337_v36 = vadd.f32 %v7831_v11, %v4298_v45  ;;  %v4405_v47 = vrot.slane %v8259_v51, 1  ;;  %v4406_v33 = vrot.slane %v8260_v61, 1 }
 0x785   : > { %v4479_v32 = vadd.f32 %v4387_v53, %v4334_v2  ;;  %v4335_v31 = vadd.f32 %v7831_v11, %v4296_v6  ;;  %v4855_v53 = vld [vmem:[#allocation2 + $0x130] sm:$0x3] }
 0x786   : > { %v4513_v27 = vmax.f32 %v4481_v25, 0.0  ;;  %v4482_v19 = vadd.f32 %v4394_v57, %v4337_v36  ;;  %v4413_v45 = vrot.slane %v4855_v53, 1  ;;  %v4856_v57 = vld [vmem:[#allocation2 + $0x118] sm:$0x3]  ;;  %v4412_v25 = vsel %vm4354_vm6, %v4410_v58, %v4411_v8 }
 0x787   : > { %v4511_v30 = vmax.f32 %v4479_v32, 0.0  ;;  %v4480_v29 = vadd.f32 %v4389_v50, %v4335_v31  ;;  %v4408_v6 = vrot.slane %v4856_v57, 1  ;;  %v4407_v31 = vsel %vm4354_vm6, %v4405_v47, %v4406_v33 }
 0x788   : > { %4545 = vst.msk [vmem:[%s7853_s18 + $0x70] sm:$0xff] %vm280_vm0, %v4513_v27  ;;  %v4514_v26 = vmax.f32 %v4482_v19, 0.0 }
 0x789   : > { %4543 = vst.msk [vmem:[%s7853_s18 + $0x60] sm:$0xff] %vm280_vm0, %v4511_v30  ;;  %v4512_v42 = vmax.f32 %v4480_v29, 0.0  ;;  %v4414_v29 = vsel %vm4354_vm6, %v4411_v8, %v4413_v45  ;;  %v4409_v59 = vsel %vm4354_vm6, %v4406_v33, %v4408_v6  ;;  %v4859_v45 = vld [vmem:[#allocation2 + $0x180] sm:$0xff]  ;;  %v8265_v6 = vld [vmem:[#allocation24_spill] sm:$0xff] }
 0x78a   : > { %4546 = vst.msk [vmem:[%s7853_s18 + $0x78] sm:$0xff] %vm280_vm0, %v4514_v26 }
 0x78b   : > { %4544 = vst.msk [vmem:[%s7853_s18 + $0x68] sm:$0xff] %vm280_vm0, %v4512_v42 }
 0x7af   : > { %v4773_v63 = vpop.f32.mrb[16].mxu1 }
 0x7b0   : > { %v4301_v3 = vmul.f32 %v4773_v63, %v7821_v0  ;;  %v4213_v60 = vpop.f32.mrb[17].mxu1 }
 0x7b1   : > { %v4299_v34 = vmul.f32 %v7821_v0, %v4213_v60  ;;  %v4774_v44 = vpop.f32.mrb[18].mxu1  ;;  %v8262_v60 = vld [vmem:[#allocation23_spill] sm:$0xff] }
 0x7b2   : > { %v4340_v39 = vadd.f32 %v7831_v11, %v4301_v3  ;;  %v4302_v52 = vmul.f32 %v4774_v44, %v7821_v0  ;;  %v4216_v4 = vpop.f32.mrb[19].mxu1  ;;  %v4420_v3 = vrot.slane %v8261_v16, 1  ;;  %v4421_v15 = vrot.slane %v8262_v60, 1 }
 0x7b3   : > { %v4338_v23 = vadd.f32 %v7831_v11, %v4299_v34  ;;  %v4300_v46 = vmul.f32 %v7821_v0, %v4216_v4  ;;  %v8264_v34 = vld [vmem:[#allocation20_spill] sm:$0xff] }
 0x7b4   : > { %v4485_v14 = vadd.f32 %v4402_v12, %v4340_v39  ;;  %v4341_v40 = vadd.f32 %v7831_v11, %v4302_v52  ;;  %v4415_v12 = vrot.slane %v8263_v7, 1  ;;  %v4416_v44 = vrot.slane %v8264_v34, 1 }
 0x7b5   : > { %v4483_v35 = vadd.f32 %v4397_v24, %v4338_v23  ;;  %v4339_v18 = vadd.f32 %v7831_v11, %v4300_v46  ;;  %v4857_v24 = vld [vmem:[#allocation2 + $0x160] sm:$0x3] }
 0x7b6   : > { %v4517_v49 = vmax.f32 %v4485_v14, 0.0  ;;  %v4486_v13 = vadd.f32 %v4404_v17, %v4341_v40  ;;  %v4423_v52 = vrot.slane %v4857_v24, 1  ;;  %v4858_v17 = vld [vmem:[#allocation2 + $0x148] sm:$0x3]  ;;  %v4422_v14 = vsel %vm4354_vm6, %v4420_v3, %v4421_v15 }
 0x7b7   : > { %v4515_v48 = vmax.f32 %v4483_v35, 0.0  ;;  %v4484_v43 = vadd.f32 %v4399_v37, %v4339_v18  ;;  %v4418_v46 = vrot.slane %v4858_v17, 1  ;;  %v4417_v18 = vsel %vm4354_vm6, %v4415_v12, %v4416_v44 }
 0x7b8   : > { %4549 = vst.msk [vmem:[%s7853_s18 + $0x90] sm:$0xff] %vm280_vm0, %v4517_v49  ;;  %v4518_v9 = vmax.f32 %v4486_v13, 0.0 }
 0x7b9   : > { %4547 = vst.msk [vmem:[%s7853_s18 + $0x80] sm:$0xff] %vm280_vm0, %v4515_v48  ;;  %v4516_v5 = vmax.f32 %v4484_v43, 0.0  ;;  %v4424_v43 = vsel %vm4354_vm6, %v4421_v15, %v4423_v52  ;;  %v4419_v58 = vsel %vm4354_vm6, %v4416_v44, %v4418_v46 }
 0x7ba   : > { %4550 = vst.msk [vmem:[%s7853_s18 + $0x98] sm:$0xff] %vm280_vm0, %v4518_v9 }
 0x7bb   : > { %4548 = vst.msk [vmem:[%s7853_s18 + $0x88] sm:$0xff] %vm280_vm0, %v4516_v5 }
 0x7df   : > { %v4777_v54 = vpop.f32.mrb[20].mxu1 }
 0x7e0   : > { %v4305_v38 = vmul.f32 %v4777_v54, %v7821_v0  ;;  %v4229_v2 = vpop.f32.mrb[21].mxu1 }
 0x7e1   : > { %v4303_v36 = vmul.f32 %v7821_v0, %v4229_v2  ;;  %v4778_v50 = vpop.f32.mrb[22].mxu1  ;;  %v4860_v2 = vld [vmem:[#allocation2 + $0x188] sm:$0xff] }
 0x7e2   : > { %v4344_v32 = vadd.f32 %v7831_v11, %v4305_v38  ;;  %v4306_v27 = vmul.f32 %v4778_v50, %v7821_v0  ;;  %v4232_v19 = vpop.f32.mrb[23].mxu1  ;;  %v4430_v38 = vrot.slane %v4859_v45, 1  ;;  %v4431_v57 = vrot.slane %v4860_v2, 1 }
 0x7e3   : > { %v4342_v30 = vadd.f32 %v7831_v11, %v4303_v36  ;;  %v4304_v26 = vmul.f32 %v7821_v0, %v4232_v19  ;;  %v8266_v36 = vld [vmem:[#allocation25_spill] sm:$0xff] }
 0x7e4   : > { %v4489_v42 = vadd.f32 %v4412_v25, %v4344_v32  ;;  %v4345_v28 = vadd.f32 %v7831_v11, %v4306_v27  ;;  %v4425_v25 = vrot.slane %v8265_v6, 1  ;;  %v4426_v50 = vrot.slane %v8266_v36, 1 }
 0x7e5   : > { %v4487_v1 = vadd.f32 %v4407_v31, %v4342_v30  ;;  %v4343_v56 = vadd.f32 %v7831_v11, %v4304_v26  ;;  %v4861_v31 = vld [vmem:[#allocation2 + $0x190] sm:$0x3] }
 0x7e6   : > { %v4521_v41 = vmax.f32 %v4489_v42, 0.0  ;;  %v4490_v55 = vadd.f32 %v4414_v29, %v4345_v28  ;;  %v4433_v27 = vrot.slane %v4861_v31, 1  ;;  %v4862_v29 = vld [vmem:[#allocation2 + $0x178] sm:$0x3]  ;;  %v4432_v42 = vsel %vm4354_vm6, %v4430_v38, %v4431_v57 }
 0x7e7   : > { %v4519_v21 = vmax.f32 %v4487_v1, 0.0  ;;  %v4488_v22 = vadd.f32 %v4409_v59, %v4343_v56  ;;  %v4428_v26 = vrot.slane %v4862_v29, 1  ;;  %v4427_v56 = vsel %vm4354_vm6, %v4425_v25, %v4426_v50 }
 0x7e8   : > { %4553 = vst.msk [vmem:[%s7853_s18 + $0xb0] sm:$0xff] %vm280_vm0, %v4521_v41  ;;  %v4522_v63 = vmax.f32 %v4490_v55, 0.0 }
 0x7e9   : > { %4551 = vst.msk [vmem:[%s7853_s18 + $0xa0] sm:$0xff] %vm280_vm0, %v4519_v21  ;;  %v4520_v10 = vmax.f32 %v4488_v22, 0.0  ;;  %v4434_v22 = vsel %vm4354_vm6, %v4431_v57, %v4433_v27  ;;  %v4429_v3 = vsel %vm4354_vm6, %v4426_v50, %v4428_v26 }
 0x7ea   : > { %4554 = vst.msk [vmem:[%s7853_s18 + $0xb8] sm:$0xff] %vm280_vm0, %v4522_v63 }
 0x7eb   : > { %4552 = vst.msk [vmem:[%s7853_s18 + $0xa8] sm:$0xff] %vm280_vm0, %v4520_v10 }
 0x810   : > { %v4781_v39 = vpop.f32.mrb[24].mxu1 }
 0x811   : > { %v4309_v4 = vmul.f32 %v4781_v39, %v7821_v0  ;;  %v4245_v23 = vpop.f32.mrb[25].mxu1 }
 0x812   : > { %v4307_v40 = vmul.f32 %v7821_v0, %v4245_v23  ;;  %v4782_v37 = vpop.f32.mrb[26].mxu1 }
 0x813   : > { %v4348_v35 = vadd.f32 %v7831_v11, %v4309_v4  ;;  %v4310_v49 = vmul.f32 %v4782_v37, %v7821_v0  ;;  %v4248_v13 = vpop.f32.mrb[27].mxu1 }
 0x814   : > { %v4346_v48 = vadd.f32 %v7831_v11, %v4307_v40  ;;  %v4308_v9 = vmul.f32 %v7821_v0, %v4248_v13 }
 0x815   : > { %v4493_v5 = vadd.f32 %v4422_v14, %v4348_v35  ;;  %v4349_v20 = vadd.f32 %v7831_v11, %v4310_v49 }
 0x816   : > { %v4491_v62 = vadd.f32 %v4417_v18, %v4346_v48  ;;  %v4347_v8 = vadd.f32 %v7831_v11, %v4308_v9 }
 0x817   : > { %v4525_v51 = vmax.f32 %v4493_v5, 0.0  ;;  %v4494_v47 = vadd.f32 %v4424_v43, %v4349_v20 }
 0x818   : > { %v4523_v61 = vmax.f32 %v4491_v62, 0.0  ;;  %v4492_v33 = vadd.f32 %v4419_v58, %v4347_v8 }
 0x819   : > { %4557 = vst.msk [vmem:[%s7853_s18 + $0xd0] sm:$0xff] %vm280_vm0, %v4525_v51  ;;  %v4526_v54 = vmax.f32 %v4494_v47, 0.0 }
 0x81a   : > { %4555 = vst.msk [vmem:[%s7853_s18 + $0xc0] sm:$0xff] %vm280_vm0, %v4523_v61  ;;  %v4524_v53 = vmax.f32 %v4492_v33, 0.0 }
 0x81b   : > { %4558 = vst.msk [vmem:[%s7853_s18 + $0xd8] sm:$0xff] %vm280_vm0, %v4526_v54 }
 0x81c   : > { %4556 = vst.msk [vmem:[%s7853_s18 + $0xc8] sm:$0xff] %vm280_vm0, %v4524_v53 }
 0x83f   : > { %v4785_v32 = vpop.f32.mrb[28].mxu1 }
 0x840   : > { %v4313_v19 = vmul.f32 %v4785_v32, %v7821_v0  ;;  %v4261_v30 = vpop.f32.mrb[29].mxu1 }
 0x841   : > { %v4311_v28 = vmul.f32 %v7821_v0, %v4261_v30  ;;  %v4786_v59 = vpop.f32.mrb[30].mxu1 }
 0x842   : > { %v4352_v1 = vadd.f32 %v7831_v11, %v4313_v19  ;;  %v4314_v41 = vmul.f32 %v4786_v59, %v7821_v0  ;;  %v4264_v55 = vpop.f32.mrb[31].mxu1 }
 0x843   : > { %v4350_v21 = vadd.f32 %v7831_v11, %v4311_v28  ;;  %v4312_v63 = vmul.f32 %v7821_v0, %v4264_v55 }
 0x844   : > { %v4497_v10 = vadd.f32 %v4432_v42, %v4352_v1  ;;  %v4353_v16 = vadd.f32 %v7831_v11, %v4314_v41 }
 0x845   : > { %v4495_v60 = vadd.f32 %v4427_v56, %v4350_v21  ;;  %v4351_v15 = vadd.f32 %v7831_v11, %v4312_v63 }
 0x846   : > { %v4529_v7 = vmax.f32 %v4497_v10, 0.0  ;;  %v4498_v12 = vadd.f32 %v4434_v22, %v4353_v16 }
 0x847   : > { %v4527_v34 = vmax.f32 %v4495_v60, 0.0  ;;  %v4496_v44 = vadd.f32 %v4429_v3, %v4351_v15 }
 0x848   : > { %4561 = vst.msk [vmem:[%s7853_s18 + $0xf0] sm:$0xff] %vm280_vm0, %v4529_v7  ;;  %v4530_v39 = vmax.f32 %v4498_v12, 0.0 }
 0x849   : > { %4559 = vst.msk [vmem:[%s7853_s18 + $0xe0] sm:$0xff] %vm280_vm0, %v4527_v34  ;;  %v4528_v24 = vmax.f32 %v4496_v44, 0.0 }
 0x84a   : > { %4562 = vst.msk [vmem:[%s7853_s18 + $0xf8] sm:$0xff] %vm280_vm0, %v4530_v39 }
 0x84b   : > { %4560 = vst.msk [vmem:[%s7853_s18 + $0xe8] sm:$0xff] %vm280_vm0, %v4528_v24 }
 0x84c PF: > { %s17_s24 = sadd.s32 1, %s4869_s24  }
 0x84d   : > { %p14_p4 = scmp.ge.s32.totalorder %s17_s24, 4  }
 0x84f   :  { %16 = sbr.rel (!%p14_p4) target bundleno = 1 (0x1), region = 80 }

</bundles_post_ra>
